<compile_context>
chip_gen: v7x
topology: tpu7x:2x2x1
jax: 0.10.0
libtpu: 0.0.40
codegen_flags: <defaults>
</compile_context>

<pallas_src>
import functools

import jax
import jax.numpy as jnp
from jax import lax
from jax.experimental import pallas as pl
from jax.experimental.pallas import tpu as pltpu


# ----------------------------------------------------------------------------
# Pallas kernels
# ----------------------------------------------------------------------------
def _wx_act_kernel(w_ref, x_ref, o_ref, *, slope):
    """o = leaky_relu(W @ X) in transposed (lane-dense) layout.

    w_ref: (bn, K) bf16 weight block, x_ref: (K, bm) bf16 patch slab,
    o_ref: (bn, bm) bf16. Output last dim is the big B*Ho*Wo axis, so patch
    loads and output stores are lane-dense."""
    acc = jnp.dot(w_ref[...], x_ref[...], preferred_element_type=jnp.float32)
    if slope is not None:
        acc = jnp.where(acc >= 0, acc, slope * acc)
    o_ref[...] = acc.astype(o_ref.dtype)


def _attn_kernel(x_ref, wqkv_ref, bqkv_ref, g_ref, o_ref, *, c8):
    """Self-attention for one batch element. x_ref block: (1, C, N) bf16.

    Q/K/V projections are fused into one matmul against the concatenated
    (2*C8 + C, C) weight; the two "transposed" contractions use dot_general
    dimension numbers so no XLU transpose / bad-layout intermediate is made."""
    x = x_ref[0]                                                       # (C, N)
    qkv = jnp.dot(wqkv_ref[...], x, preferred_element_type=jnp.float32)
    qkv = qkv + bqkv_ref[...]                                          # (2*C8+C, N)
    q = qkv[:c8].astype(jnp.bfloat16)                                  # (C8, N)
    k = qkv[c8:2 * c8].astype(jnp.bfloat16)                            # (C8, N)
    v = qkv[2 * c8:].astype(jnp.bfloat16)                              # (C, N)
    # energy[i, j] = sum_c q[c, i] * k[c, j]
    energy = lax.dot_general(q, k, (((0,), (0,)), ((), ())),
                             preferred_element_type=jnp.float32)       # (N, N)
    energy = energy - jnp.max(energy, axis=-1, keepdims=True)
    e = jnp.exp(energy)
    attn = (e / jnp.sum(e, axis=-1, keepdims=True)).astype(jnp.bfloat16)
    # out[c, i] = sum_j v[c, j] * attn[i, j]
    out = lax.dot_general(v, attn, (((1,), (1,)), ((), ())),
                          preferred_element_type=jnp.float32)          # (C, N)
    o_ref[0] = (g_ref[0] * out + x.astype(jnp.float32)).astype(o_ref.dtype)


# ----------------------------------------------------------------------------
# Wrappers
# ----------------------------------------------------------------------------
def _pick_bm(m):
    """Split the big M axis into >=2 lane-aligned blocks when possible."""
    if m % 256 == 0:
        return min(m // 2, 2048)
    return m


def matmul_wt_x(w, x_t, slope):
    """w: (Cout, K) bf16, x_t: (K, M) bf16 -> (Cout, M) bf16 via Pallas."""
    cout, kdim = w.shape
    _, m = x_t.shape
    bm = _pick_bm(m)
    nm = m // bm
    # If M cannot be split, split Cout so v7x's 2 TensorCores both get work.
    if nm == 1 and cout % 32 == 0:
        bn = cout // 2
    else:
        bn = cout
    nn = cout // bn
    kern = functools.partial(_wx_act_kernel, slope=slope)
    return pl.pallas_call(
        kern,
        out_shape=jax.ShapeDtypeStruct((cout, m), jnp.bfloat16),
        grid=(nn, nm),
        in_specs=[
            pl.BlockSpec((bn, kdim), lambda n, i: (n, 0)),
            pl.BlockSpec((kdim, bm), lambda n, i: (0, i)),
        ],
        out_specs=pl.BlockSpec((bn, bm), lambda n, i: (n, i)),
        compiler_params=pltpu.CompilerParams(
            dimension_semantics=("parallel", "parallel")),
    )(w, x_t)


def im2col_km(x_cbhw, k, stride, pad):
    """(C, B, H, W) -> (C*k*k, B*Ho*Wo) patches, K-major, flattened in
    (C, kh, kw) order to match PyTorch's weight.reshape(Cout, -1).
    No transpose: the stack/reshape is layout-contiguous."""
    c, b, h, w = x_cbhw.shape
    xp = jnp.pad(x_cbhw, ((0, 0), (0, 0), (pad, pad), (pad, pad)))
    ho = (h + 2 * pad - k) // stride + 1
    wo = (w + 2 * pad - k) // stride + 1
    parts = []
    for i in range(k):
        for j in range(k):
            parts.append(xp[:, :, i:i + stride * ho:stride,
                            j:j + stride * wo:stride])         # (C, B, Ho, Wo)
    p = jnp.stack(parts, axis=1)                               # (C, k*k, B, Ho, Wo)
    p = p.reshape(c * k * k, b * ho * wo)
    return p, ho, wo


def spectral_normalize(w2d, u):
    """1-step power iteration (torch.nn.utils.spectral_norm semantics).
    u: persistent (Cout,) vector stored with the params."""
    eps = 1e-12
    v = w2d.T @ u
    v = v / (jnp.linalg.norm(v) + eps)
    u_new = w2d @ v
    u_new = u_new / (jnp.linalg.norm(u_new) + eps)
    sigma = jnp.dot(u_new, w2d @ v)
    return w2d / sigma


def conv2d_sn(x_cbhw, w, u, stride, pad, slope):
    """Spectral-normed Conv2d (no bias) + optional LeakyReLU, transposed matmul."""
    cout = w.shape[0]
    k = w.shape[2]
    _, b, _, _ = x_cbhw.shape
    w_sn = spectral_normalize(w.reshape(cout, -1), u)              # f32
    patches, ho, wo = im2col_km(x_cbhw, k, stride, pad)            # bf16 (K, M)
    y = matmul_wt_x(w_sn.astype(jnp.bfloat16), patches, slope)     # (Cout, M) bf16
    return y.reshape(cout, b, ho, wo)


def final_conv_sn(x_cbhw, w, u):
    """Final 4x4 valid conv (Cout=1, M=B): plain jnp.dot, not worth a dispatch."""
    cout = w.shape[0]
    k = w.shape[2]
    _, b, _, _ = x_cbhw.shape
    w_sn = spectral_normalize(w.reshape(cout, -1), u)
    patches, ho, wo = im2col_km(x_cbhw, k, 1, 0)                   # (K, B)
    y = jnp.dot(w_sn, patches.astype(jnp.float32))                 # (1, B) f32
    return y.reshape(cout, b, ho, wo)


def self_attention(x_cbhw, wq, bq, wk, bk, wv, bv, gamma):
    """x_cbhw: (C, B, H, W) bf16. 1x1-conv weights wq/wk: (C//8, C), wv: (C, C)."""
    c, b, h, w = x_cbhw.shape
    n = h * w
    c8 = wq.shape[0]
    xf = x_cbhw.reshape(c, b, n).transpose(1, 0, 2)                # (B, C, N) bf16
    wqkv = jnp.concatenate([wq, wk, wv], axis=0).astype(jnp.bfloat16)
    bqkv = jnp.concatenate([bq, bk, bv], axis=0).reshape(-1, 1).astype(jnp.float32)
    out = pl.pallas_call(
        functools.partial(_attn_kernel, c8=c8),
        out_shape=jax.ShapeDtypeStruct((b, c, n), jnp.bfloat16),
        grid=(b,),
        in_specs=[
            pl.BlockSpec((1, c, n), lambda i: (i, 0, 0)),
            pl.BlockSpec((2 * c8 + c, c), lambda i: (0, 0)),
            pl.BlockSpec((2 * c8 + c, 1), lambda i: (0, 0)),
            pl.BlockSpec(memory_space=pltpu.MemorySpace.SMEM),
        ],
        out_specs=pl.BlockSpec((1, c, n), lambda i: (i, 0, 0)),
        compiler_params=pltpu.CompilerParams(
            dimension_semantics=("parallel",)),
    )(xf, wqkv, bqkv, gamma)
    return out.transpose(1, 0, 2).reshape(c, b, h, w)


# ----------------------------------------------------------------------------
# Discriminator: parameter construction + forward
# ----------------------------------------------------------------------------
def init_params(key, nc=3, ndf=8):
    def conv_wu(k, cout, cin, ks):
        kw, ku = jax.random.split(k)
        w = 0.05 * jax.random.normal(kw, (cout, cin, ks, ks), jnp.float32)
        u = jax.random.normal(ku, (cout,), jnp.float32)
        u = u / (jnp.linalg.norm(u) + 1e-12)
        return w, u

    def attn_params(k, c):
        ks = jax.random.split(k, 6)
        return dict(
            wq=0.05 * jax.random.normal(ks[0], (c // 8, c), jnp.float32),
            bq=0.01 * jax.random.normal(ks[1], (c // 8,), jnp.float32),
            wk=0.05 * jax.random.normal(ks[2], (c // 8, c), jnp.float32),
            bk=0.01 * jax.random.normal(ks[3], (c // 8,), jnp.float32),
            wv=0.05 * jax.random.normal(ks[4], (c, c), jnp.float32),
            bv=0.01 * jax.random.normal(ks[5], (c,), jnp.float32),
            gamma=jnp.zeros((1,), jnp.float32),  # nn.Parameter(torch.zeros(1))
        )

    ks = jax.random.split(key, 8)
    p = {}
    p["w1"], p["u1"] = conv_wu(ks[0], ndf, nc, 4)
    p["w2"], p["u2"] = conv_wu(ks[1], ndf * 2, ndf, 4)
    p["w3"], p["u3"] = conv_wu(ks[2], ndf * 4, ndf * 2, 4)
    p["attn1"] = attn_params(ks[3], ndf * 4)
    p["w4"], p["u4"] = conv_wu(ks[4], ndf * 8, ndf * 4, 4)
    p["attn2"] = attn_params(ks[5], ndf * 8)
    p["w5"], p["u5"] = conv_wu(ks[6], ndf * 16, ndf * 8, 4)
    p["w6"], p["u6"] = conv_wu(ks[7], 1, ndf * 16, 4)
    return p


def discriminator_forward(params, x):
    slope = 0.2
    # (B, C, H, W) f32 -> (C, B, H, W) bf16 working layout.
    h = x.transpose(1, 0, 2, 3).astype(jnp.bfloat16)
    h = conv2d_sn(h, params["w1"], params["u1"], 2, 1, slope)
    h = conv2d_sn(h, params["w2"], params["u2"], 2, 1, slope)
    h = conv2d_sn(h, params["w3"], params["u3"], 2, 1, slope)
    a1 = params["attn1"]
    h = self_attention(h, a1["wq"], a1["bq"], a1["wk"], a1["bk"],
                       a1["wv"], a1["bv"], a1["gamma"])
    h = conv2d_sn(h, params["w4"], params["u4"], 2, 1, slope)
    a2 = params["attn2"]
    h = self_attention(h, a2["wq"], a2["bq"], a2["wk"], a2["bk"],
                       a2["wv"], a2["bv"], a2["gamma"])
    h = conv2d_sn(h, params["w5"], params["u5"], 2, 1, slope)
    # TODO(synk): u buffers are read-only here (inference-style spectral norm);
    # a training-equivalent update of u would be returned alongside the output.
    y = final_conv_sn(h, params["w6"], params["u6"])       # (1, B, 1, 1) f32
    return y.reshape(-1)                                   # matches .view(-1)


if __name__ == "__main__":
    # nc=3 as in the module; ndf=8 keeps the run light. Spatial must be 128 so
    # the final 4x4 valid conv sees a 4x4 map (as the architecture implies).
    B, NC, NDF, HW = 2, 3, 8, 128
    key = jax.random.PRNGKey(0)
    k_par, k_x = jax.random.split(key)
    params = init_params(k_par, nc=NC, ndf=NDF)
    x = jax.random.normal(k_x, (B, NC, HW, HW), jnp.float32)

    fwd = jax.jit(discriminator_forward)
    out = fwd(params, x)
    jax.block_until_ready(out)
    assert out.shape == (B,), out.shape
    print("KERNEL_OK")
</pallas_src>

<mosaic_0001>
module attributes {stable_mosaic.version = 11 : i64} {
  func.func @_wx_act_kernel(%arg0: i32, %arg1: i32, %arg2: memref<8x48xbf16, #tpu.memory_space<vmem>>, %arg3: memref<48x2048xbf16, #tpu.memory_space<vmem>>, %arg4: memref<8x2048xbf16, #tpu.memory_space<vmem>>) attributes {dimension_semantics = [#tpu.dimension_semantics<parallel>, #tpu.dimension_semantics<parallel>], iteration_bounds = array<i64: 1, 4>, scalar_prefetch = 0 : i64, scratch_operands = 0 : i64, tpu.core_type = #tpu.core_type<tc>, window_params = [{transform_indices = @transform_0, window_bounds = array<i64: 8, 48>}, {transform_indices = @transform_1, window_bounds = array<i64: 48, 2048>}, {transform_indices = @transform_2, window_bounds = array<i64: 8, 2048>}]} {
    %c0 = arith.constant 0 : index
    %c0_0 = arith.constant 0 : index
    %0 = vector.load %arg2[%c0, %c0_0] : memref<8x48xbf16, #tpu.memory_space<vmem>>, vector<8x48xbf16>
    %c0_1 = arith.constant 0 : index
    %c0_2 = arith.constant 0 : index
    %1 = vector.load %arg3[%c0_1, %c0_2] : memref<48x2048xbf16, #tpu.memory_space<vmem>>, vector<48x2048xbf16>
    %cst = arith.constant dense<0.000000e+00> : vector<8x2048xf32>
    %2 = tpu.matmul %0, %1, %cst {dimension_numbers = #tpu.dot_dimension_numbers<[1], [0], [0], [1], [0, 0, 1, 1], [], []>} : vector<8x48xbf16>, vector<48x2048xbf16>, vector<8x2048xf32> -> vector<8x2048xf32>
    %cst_3 = arith.constant 0.000000e+00 : f32
    %3 = vector.broadcast %cst_3 : f32 to vector<8x2048xf32>
    %4 = arith.cmpf oge, %2, %3 : vector<8x2048xf32>
    %cst_4 = arith.constant 2.000000e-01 : f32
    %5 = vector.broadcast %cst_4 : f32 to vector<8x2048xf32>
    %6 = arith.mulf %5, %2 : vector<8x2048xf32>
    %7 = arith.select %4, %2, %6 : vector<8x2048xi1>, vector<8x2048xf32>
    %8 = arith.truncf %7 : vector<8x2048xf32> to vector<8x2048xbf16>
    %c0_5 = arith.constant 0 : index
    %c0_6 = arith.constant 0 : index
    %9 = vector.load %arg4[%c0_5, %c0_6] : memref<8x2048xbf16, #tpu.memory_space<vmem>>, vector<8x2048xbf16>
    tpu.vector_store %arg4[%c0_5, %c0_6], %8 {strides = array<i32>} : memref<8x2048xbf16, #tpu.memory_space<vmem>>, vector<8x2048xbf16>,
    return
  }
  func.func @transform_0(%arg0: i32, %arg1: i32) -> (i32, i32) {
    %c0_i32 = arith.constant 0 : i32
    %c0_i32_0 = arith.constant 0 : i32
    return %arg0, %c0_i32 : i32, i32
  }
  func.func @transform_1(%arg0: i32, %arg1: i32) -> (i32, i32) {
    %c0_i32 = arith.constant 0 : i32
    %c0_i32_0 = arith.constant 0 : i32
    return %c0_i32, %arg1 : i32, i32
  }
  func.func @transform_2(%arg0: i32, %arg1: i32) -> (i32, i32) {
    %c0_i32 = arith.constant 0 : i32
    return %arg0, %arg1 : i32, i32
  }
}

module attributes {stable_mosaic.version = 11 : i64} {
  func.func @_wx_act_kernel(%arg0: i32, %arg1: i32, %arg2: memref<16x128xbf16, #tpu.memory_space<vmem>>, %arg3: memref<128x1024xbf16, #tpu.memory_space<vmem>>, %arg4: memref<16x1024xbf16, #tpu.memory_space<vmem>>) attributes {dimension_semantics = [#tpu.dimension_semantics<parallel>, #tpu.dimension_semantics<parallel>], iteration_bounds = array<i64: 1, 2>, scalar_prefetch = 0 : i64, scratch_operands = 0 : i64, tpu.core_type = #tpu.core_type<tc>, window_params = [{transform_indices = @transform_0, window_bounds = array<i64: 16, 128>}, {transform_indices = @transform_1, window_bounds = array<i64: 128, 1024>}, {transform_indices = @transform_2, window_bounds = array<i64: 16, 1024>}]} {
    %c0 = arith.constant 0 : index
    %c0_0 = arith.constant 0 : index
    %0 = vector.load %arg2[%c0, %c0_0] : memref<16x128xbf16, #tpu.memory_space<vmem>>, vector<16x128xbf16>
    %c0_1 = arith.constant 0 : index
    %c0_2 = arith.constant 0 : index
    %1 = vector.load %arg3[%c0_1, %c0_2] : memref<128x1024xbf16, #tpu.memory_space<vmem>>, vector<128x1024xbf16>
    %cst = arith.constant dense<0.000000e+00> : vector<16x1024xf32>
    %2 = tpu.matmul %0, %1, %cst {dimension_numbers = #tpu.dot_dimension_numbers<[1], [0], [0], [1], [0, 0, 1, 1], [], []>} : vector<16x128xbf16>, vector<128x1024xbf16>, vector<16x1024xf32> -> vector<16x1024xf32>
    %cst_3 = arith.constant 0.000000e+00 : f32
    %3 = vector.broadcast %cst_3 : f32 to vector<16x1024xf32>
    %4 = arith.cmpf oge, %2, %3 : vector<16x1024xf32>
    %cst_4 = arith.constant 2.000000e-01 : f32
    %5 = vector.broadcast %cst_4 : f32 to vector<16x1024xf32>
    %6 = arith.mulf %5, %2 : vector<16x1024xf32>
    %7 = arith.select %4, %2, %6 : vector<16x1024xi1>, vector<16x1024xf32>
    %8 = arith.truncf %7 : vector<16x1024xf32> to vector<16x1024xbf16>
    %c0_5 = arith.constant 0 : index
    %c0_6 = arith.constant 0 : index
    %9 = vector.load %arg4[%c0_5, %c0_6] : memref<16x1024xbf16, #tpu.memory_space<vmem>>, vector<16x1024xbf16>
    tpu.vector_store %arg4[%c0_5, %c0_6], %8 {strides = array<i32>} : memref<16x1024xbf16, #tpu.memory_space<vmem>>, vector<16x1024xbf16>,
    return
  }
  func.func @transform_0(%arg0: i32, %arg1: i32) -> (i32, i32) {
    %c0_i32 = arith.constant 0 : i32
    %c0_i32_0 = arith.constant 0 : i32
    return %arg0, %c0_i32 : i32, i32
  }
  func.func @transform_1(%arg0: i32, %arg1: i32) -> (i32, i32) {
    %c0_i32 = arith.constant 0 : i32
    %c0_i32_0 = arith.constant 0 : i32
    return %c0_i32, %arg1 : i32, i32
  }
  func.func @transform_2(%arg0: i32, %arg1: i32) -> (i32, i32) {
    %c0_i32 = arith.constant 0 : i32
    return %arg0, %arg1 : i32, i32
  }
}

module attributes {stable_mosaic.version = 11 : i64} {
  func.func @_wx_act_kernel(%arg0: i32, %arg1: i32, %arg2: memref<32x256xbf16, #tpu.memory_space<vmem>>, %arg3: memref<256x256xbf16, #tpu.memory_space<vmem>>, %arg4: memref<32x256xbf16, #tpu.memory_space<vmem>>) attributes {dimension_semantics = [#tpu.dimension_semantics<parallel>, #tpu.dimension_semantics<parallel>], iteration_bounds = array<i64: 1, 2>, scalar_prefetch = 0 : i64, scratch_operands = 0 : i64, tpu.core_type = #tpu.core_type<tc>, window_params = [{transform_indices = @transform_0, window_bounds = array<i64: 32, 256>}, {transform_indices = @transform_1, window_bounds = array<i64: 256, 256>}, {transform_indices = @transform_2, window_bounds = array<i64: 32, 256>}]} {
    %c0 = arith.constant 0 : index
    %c0_0 = arith.constant 0 : index
    %0 = vector.load %arg2[%c0, %c0_0] : memref<32x256xbf16, #tpu.memory_space<vmem>>, vector<32x256xbf16>
    %c0_1 = arith.constant 0 : index
    %c0_2 = arith.constant 0 : index
    %1 = vector.load %arg3[%c0_1, %c0_2] : memref<256x256xbf16, #tpu.memory_space<vmem>>, vector<256x256xbf16>
    %cst = arith.constant dense<0.000000e+00> : vector<32x256xf32>
    %2 = tpu.matmul %0, %1, %cst {dimension_numbers = #tpu.dot_dimension_numbers<[1], [0], [0], [1], [0, 0, 1, 1], [], []>} : vector<32x256xbf16>, vector<256x256xbf16>, vector<32x256xf32> -> vector<32x256xf32>
    %cst_3 = arith.constant 0.000000e+00 : f32
    %3 = vector.broadcast %cst_3 : f32 to vector<32x256xf32>
    %4 = arith.cmpf oge, %2, %3 : vector<32x256xf32>
    %cst_4 = arith.constant 2.000000e-01 : f32
    %5 = vector.broadcast %cst_4 : f32 to vector<32x256xf32>
    %6 = arith.mulf %5, %2 : vector<32x256xf32>
    %7 = arith.select %4, %2, %6 : vector<32x256xi1>, vector<32x256xf32>
    %8 = arith.truncf %7 : vector<32x256xf32> to vector<32x256xbf16>
    %c0_5 = arith.constant 0 : index
    %c0_6 = arith.constant 0 : index
    %9 = vector.load %arg4[%c0_5, %c0_6] : memref<32x256xbf16, #tpu.memory_space<vmem>>, vector<32x256xbf16>
    tpu.vector_store %arg4[%c0_5, %c0_6], %8 {strides = array<i32>} : memref<32x256xbf16, #tpu.memory_space<vmem>>, vector<32x256xbf16>,
    return
  }
  func.func @transform_0(%arg0: i32, %arg1: i32) -> (i32, i32) {
    %c0_i32 = arith.constant 0 : i32
    %c0_i32_0 = arith.constant 0 : i32
    return %arg0, %c0_i32 : i32, i32
  }
  func.func @transform_1(%arg0: i32, %arg1: i32) -> (i32, i32) {
    %c0_i32 = arith.constant 0 : i32
    %c0_i32_0 = arith.constant 0 : i32
    return %c0_i32, %arg1 : i32, i32
  }
  func.func @transform_2(%arg0: i32, %arg1: i32) -> (i32, i32) {
    %c0_i32 = arith.constant 0 : i32
    return %arg0, %arg1 : i32, i32
  }
}

module attributes {stable_mosaic.version = 11 : i64} {
  func.func @_attn_kernel(%arg0: i32, %arg1: memref<1x32x256xbf16, #tpu.memory_space<vmem>>, %arg2: memref<40x32xbf16, #tpu.memory_space<vmem>>, %arg3: memref<40x1xf32, #tpu.memory_space<vmem>>, %arg4: memref<1xf32, #tpu.memory_space<smem>>, %arg5: memref<1x32x256xbf16, #tpu.memory_space<vmem>>) attributes {dimension_semantics = [#tpu.dimension_semantics<parallel>], iteration_bounds = array<i64: 2>, scalar_prefetch = 0 : i64, scratch_operands = 0 : i64, tpu.core_type = #tpu.core_type<tc>, window_params = [{transform_indices = @transform_0, window_bounds = array<i64: 1, 32, 256>}, {pipeline_mode = #tpu.pipeline_mode<synchronous>, transform_indices = @transform_1, window_bounds = array<i64: 40, 32>}, {pipeline_mode = #tpu.pipeline_mode<synchronous>, transform_indices = @transform_2, window_bounds = array<i64: 40, 1>}, {transform_indices = @transform_3, window_bounds = array<i64: 1>}, {transform_indices = @transform_4, window_bounds = array<i64: 1, 32, 256>}]} {
    %c0 = arith.constant 0 : index
    %c0_0 = arith.constant 0 : index
    %c0_1 = arith.constant 0 : index
    %0 = vector.load %arg1[%c0, %c0_0, %c0_1] : memref<1x32x256xbf16, #tpu.memory_space<vmem>>, vector<1x32x256xbf16>
    %1 = vector.shape_cast %0 : vector<1x32x256xbf16> to vector<32x256xbf16>
    %c0_2 = arith.constant 0 : index
    %c0_3 = arith.constant 0 : index
    %2 = vector.load %arg2[%c0_2, %c0_3] : memref<40x32xbf16, #tpu.memory_space<vmem>>, vector<40x32xbf16>
    %cst = arith.constant dense<0.000000e+00> : vector<40x256xf32>
    %3 = tpu.matmul %2, %1, %cst {dimension_numbers = #tpu.dot_dimension_numbers<[1], [0], [0], [1], [0, 0, 1, 1], [], []>} : vector<40x32xbf16>, vector<32x256xbf16>, vector<40x256xf32> -> vector<40x256xf32>
    %c0_4 = arith.constant 0 : index
    %c0_5 = arith.constant 0 : index
    %4 = vector.load %arg3[%c0_4, %c0_5] : memref<40x1xf32, #tpu.memory_space<vmem>>, vector<40x1xf32>
    %5 = vector.broadcast %4 : vector<40x1xf32> to vector<40x256xf32>
    %6 = arith.addf %3, %5 : vector<40x256xf32>
    %7 = vector.extract_strided_slice %6 {offsets = [0, 0], sizes = [4, 256], strides = [1, 1]} : vector<40x256xf32> to vector<4x256xf32>
    %8 = arith.truncf %7 : vector<4x256xf32> to vector<4x256xbf16>
    %9 = vector.extract_strided_slice %6 {offsets = [4, 0], sizes = [4, 256], strides = [1, 1]} : vector<40x256xf32> to vector<4x256xf32>
    %10 = arith.truncf %9 : vector<4x256xf32> to vector<4x256xbf16>
    %11 = vector.extract_strided_slice %6 {offsets = [8, 0], sizes = [32, 256], strides = [1, 1]} : vector<40x256xf32> to vector<32x256xf32>
    %12 = arith.truncf %11 : vector<32x256xf32> to vector<32x256xbf16>
    %cst_6 = arith.constant dense<0.000000e+00> : vector<256x256xf32>
    %13 = tpu.matmul %8, %10, %cst_6 {dimension_numbers = #tpu.dot_dimension_numbers<[0], [0], [1], [1], [0, 1, 1, 1], [], []>} : vector<4x256xbf16>, vector<4x256xbf16>, vector<256x256xf32> -> vector<256x256xf32>
    %cst_7 = arith.constant dense<0xFF800000> : vector<256xf32>
    %14 = vector.multi_reduction <maximumf>, %13, %cst_7 [1] : vector<256x256xf32> to vector<256xf32>
    %15 = vector.shape_cast %14 : vector<256xf32> to vector<256x1xf32>
    %16 = vector.broadcast %15 : vector<256x1xf32> to vector<256x256xf32>
    %17 = arith.subf %13, %16 : vector<256x256xf32>
    %18 = math.exp %17 : vector<256x256xf32>
    %cst_8 = arith.constant dense<0.000000e+00> : vector<256xf32>
    %19 = vector.multi_reduction <add>, %18, %cst_8 [1] : vector<256x256xf32> to vector<256xf32>
    %20 = vector.shape_cast %19 : vector<256xf32> to vector<256x1xf32>
    %21 = vector.broadcast %20 : vector<256x1xf32> to vector<256x256xf32>
    %22 = arith.divf %18, %21 : vector<256x256xf32>
    %23 = arith.truncf %22 : vector<256x256xf32> to vector<256x256xbf16>
    %cst_9 = arith.constant dense<0.000000e+00> : vector<32x256xf32>
    %24 = tpu.matmul %12, %23, %cst_9 {dimension_numbers = #tpu.dot_dimension_numbers<[1], [1], [0], [0], [0, 0, 1, 0], [], []>} : vector<32x256xbf16>, vector<256x256xbf16>, vector<32x256xf32> -> vector<32x256xf32>
    %c0_10 = arith.constant 0 : index
    %25 = memref.load %arg4[%c0_10] : memref<1xf32, #tpu.memory_space<smem>>
    %26 = vector.broadcast %25 : f32 to vector<32x256xf32>
    %27 = arith.mulf %26, %24 : vector<32x256xf32>
    %28 = arith.extf %1 : vector<32x256xbf16> to vector<32x256xf32>
    %29 = arith.addf %27, %28 : vector<32x256xf32>
    %30 = arith.truncf %29 : vector<32x256xf32> to vector<32x256xbf16>
    %c0_11 = arith.constant 0 : index
    %c0_12 = arith.constant 0 : index
    %c0_13 = arith.constant 0 : index
    %31 = vector.load %arg5[%c0_11, %c0_12, %c0_13] : memref<1x32x256xbf16, #tpu.memory_space<vmem>>, vector<1x32x256xbf16>
    %32 = vector.shape_cast %31 : vector<1x32x256xbf16> to vector<32x256xbf16>
    %33 = vector.shape_cast %30 : vector<32x256xbf16> to vector<1x32x256xbf16>
    tpu.vector_store %arg5[%c0_11, %c0_12, %c0_13], %33 {strides = array<i32>} : memref<1x32x256xbf16, #tpu.memory_space<vmem>>, vector<1x32x256xbf16>,
    return
  }
  func.func @transform_0(%arg0: i32) -> (i32, i32, i32) {
    %c0_i32 = arith.constant 0 : i32
    %c0_i32_0 = arith.constant 0 : i32
    %c0_i32_1 = arith.constant 0 : i32
    return %arg0, %c0_i32, %c0_i32_0 : i32, i32, i32
  }
  func.func @transform_1(%arg0: i32) -> (i32, i32) {
    %c0_i32 = arith.constant 0 : i32
    %c0_i32_0 = arith.constant 0 : i32
    %c0_i32_1 = arith.constant 0 : i32
    return %c0_i32, %c0_i32_0 : i32, i32
  }
  func.func @transform_2(%arg0: i32) -> (i32, i32) {
    %c0_i32 = arith.constant 0 : i32
    %c0_i32_0 = arith.constant 0 : i32
    %c0_i32_1 = arith.constant 0 : i32
    return %c0_i32, %c0_i32_0 : i32, i32
  }
  func.func @transform_3(%arg0: i32) -> i32 {
    %c0_i32 = arith.constant 0 : i32
    %c0_i32_0 = arith.constant 0 : i32
    return %c0_i32 : i32
  }
  func.func @transform_4(%arg0: i32) -> (i32, i32, i32) {
    %c0_i32 = arith.constant 0 : i32
    %c0_i32_0 = arith.constant 0 : i32
    %c0_i32_1 = arith.constant 0 : i32
    return %arg0, %c0_i32, %c0_i32_0 : i32, i32, i32
  }
}

module attributes {stable_mosaic.version = 11 : i64} {
  func.func @_wx_act_kernel(%arg0: i32, %arg1: i32, %arg2: memref<32x512xbf16, #tpu.memory_space<vmem>>, %arg3: memref<512x128xbf16, #tpu.memory_space<vmem>>, %arg4: memref<32x128xbf16, #tpu.memory_space<vmem>>) attributes {dimension_semantics = [#tpu.dimension_semantics<parallel>, #tpu.dimension_semantics<parallel>], iteration_bounds = array<i64: 2, 1>, scalar_prefetch = 0 : i64, scratch_operands = 0 : i64, tpu.core_type = #tpu.core_type<tc>, window_params = [{transform_indices = @transform_0, window_bounds = array<i64: 32, 512>}, {transform_indices = @transform_1, window_bounds = array<i64: 512, 128>}, {transform_indices = @transform_2, window_bounds = array<i64: 32, 128>}]} {
    %c0 = arith.constant 0 : index
    %c0_0 = arith.constant 0 : index
    %0 = vector.load %arg2[%c0, %c0_0] : memref<32x512xbf16, #tpu.memory_space<vmem>>, vector<32x512xbf16>
    %c0_1 = arith.constant 0 : index
    %c0_2 = arith.constant 0 : index
    %1 = vector.load %arg3[%c0_1, %c0_2] : memref<512x128xbf16, #tpu.memory_space<vmem>>, vector<512x128xbf16>
    %cst = arith.constant dense<0.000000e+00> : vector<32x128xf32>
    %2 = tpu.matmul %0, %1, %cst {dimension_numbers = #tpu.dot_dimension_numbers<[1], [0], [0], [1], [0, 0, 1, 1], [], []>} : vector<32x512xbf16>, vector<512x128xbf16>, vector<32x128xf32> -> vector<32x128xf32>
    %cst_3 = arith.constant 0.000000e+00 : f32
    %3 = vector.broadcast %cst_3 : f32 to vector<32x128xf32>
    %4 = arith.cmpf oge, %2, %3 : vector<32x128xf32>
    %cst_4 = arith.constant 2.000000e-01 : f32
    %5 = vector.broadcast %cst_4 : f32 to vector<32x128xf32>
    %6 = arith.mulf %5, %2 : vector<32x128xf32>
    %7 = arith.select %4, %2, %6 : vector<32x128xi1>, vector<32x128xf32>
    %8 = arith.truncf %7 : vector<32x128xf32> to vector<32x128xbf16>
    %c0_5 = arith.constant 0 : index
    %c0_6 = arith.constant 0 : index
    %9 = vector.load %arg4[%c0_5, %c0_6] : memref<32x128xbf16, #tpu.memory_space<vmem>>, vector<32x128xbf16>
    tpu.vector_store %arg4[%c0_5, %c0_6], %8 {strides = array<i32>} : memref<32x128xbf16, #tpu.memory_space<vmem>>, vector<32x128xbf16>,
    return
  }
  func.func @transform_0(%arg0: i32, %arg1: i32) -> (i32, i32) {
    %c0_i32 = arith.constant 0 : i32
    %c0_i32_0 = arith.constant 0 : i32
    return %arg0, %c0_i32 : i32, i32
  }
  func.func @transform_1(%arg0: i32, %arg1: i32) -> (i32, i32) {
    %c0_i32 = arith.constant 0 : i32
    %c0_i32_0 = arith.constant 0 : i32
    return %c0_i32, %arg1 : i32, i32
  }
  func.func @transform_2(%arg0: i32, %arg1: i32) -> (i32, i32) {
    %c0_i32 = arith.constant 0 : i32
    return %arg0, %arg1 : i32, i32
  }
}

module attributes {stable_mosaic.version = 11 : i64} {
  func.func @_attn_kernel(%arg0: i32, %arg1: memref<1x64x64xbf16, #tpu.memory_space<vmem>>, %arg2: memref<80x64xbf16, #tpu.memory_space<vmem>>, %arg3: memref<80x1xf32, #tpu.memory_space<vmem>>, %arg4: memref<1xf32, #tpu.memory_space<smem>>, %arg5: memref<1x64x64xbf16, #tpu.memory_space<vmem>>) attributes {dimension_semantics = [#tpu.dimension_semantics<parallel>], iteration_bounds = array<i64: 2>, scalar_prefetch = 0 : i64, scratch_operands = 0 : i64, tpu.core_type = #tpu.core_type<tc>, window_params = [{transform_indices = @transform_0, window_bounds = array<i64: 1, 64, 64>}, {pipeline_mode = #tpu.pipeline_mode<synchronous>, transform_indices = @transform_1, window_bounds = array<i64: 80, 64>}, {pipeline_mode = #tpu.pipeline_mode<synchronous>, transform_indices = @transform_2, window_bounds = array<i64: 80, 1>}, {transform_indices = @transform_3, window_bounds = array<i64: 1>}, {transform_indices = @transform_4, window_bounds = array<i64: 1, 64, 64>}]} {
    %c0 = arith.constant 0 : index
    %c0_0 = arith.constant 0 : index
    %c0_1 = arith.constant 0 : index
    %0 = vector.load %arg1[%c0, %c0_0, %c0_1] : memref<1x64x64xbf16, #tpu.memory_space<vmem>>, vector<1x64x64xbf16>
    %1 = vector.shape_cast %0 : vector<1x64x64xbf16> to vector<64x64xbf16>
    %c0_2 = arith.constant 0 : index
    %c0_3 = arith.constant 0 : index
    %2 = vector.load %arg2[%c0_2, %c0_3] : memref<80x64xbf16, #tpu.memory_space<vmem>>, vector<80x64xbf16>
    %cst = arith.constant dense<0.000000e+00> : vector<80x64xf32>
    %3 = tpu.matmul %2, %1, %cst {dimension_numbers = #tpu.dot_dimension_numbers<[1], [0], [0], [1], [0, 0, 1, 1], [], []>} : vector<80x64xbf16>, vector<64x64xbf16>, vector<80x64xf32> -> vector<80x64xf32>
    %c0_4 = arith.constant 0 : index
    %c0_5 = arith.constant 0 : index
    %4 = vector.load %arg3[%c0_4, %c0_5] : memref<80x1xf32, #tpu.memory_space<vmem>>, vector<80x1xf32>
    %5 = vector.broadcast %4 : vector<80x1xf32> to vector<80x64xf32>
    %6 = arith.addf %3, %5 : vector<80x64xf32>
    %7 = vector.extract_strided_slice %6 {offsets = [0, 0], sizes = [8, 64], strides = [1, 1]} : vector<80x64xf32> to vector<8x64xf32>
    %8 = arith.truncf %7 : vector<8x64xf32> to vector<8x64xbf16>
    %9 = vector.extract_strided_slice %6 {offsets = [8, 0], sizes = [8, 64], strides = [1, 1]} : vector<80x64xf32> to vector<8x64xf32>
    %10 = arith.truncf %9 : vector<8x64xf32> to vector<8x64xbf16>
    %11 = vector.extract_strided_slice %6 {offsets = [16, 0], sizes = [64, 64], strides = [1, 1]} : vector<80x64xf32> to vector<64x64xf32>
    %12 = arith.truncf %11 : vector<64x64xf32> to vector<64x64xbf16>
    %cst_6 = arith.constant dense<0.000000e+00> : vector<64x64xf32>
    %13 = tpu.matmul %8, %10, %cst_6 {dimension_numbers = #tpu.dot_dimension_numbers<[0], [0], [1], [1], [0, 1, 1, 1], [], []>} : vector<8x64xbf16>, vector<8x64xbf16>, vector<64x64xf32> -> vector<64x64xf32>
    %cst_7 = arith.constant dense<0xFF800000> : vector<64xf32>
    %14 = vector.multi_reduction <maximumf>, %13, %cst_7 [1] : vector<64x64xf32> to vector<64xf32>
    %15 = vector.shape_cast %14 : vector<64xf32> to vector<64x1xf32>
    %16 = vector.broadcast %15 : vector<64x1xf32> to vector<64x64xf32>
    %17 = arith.subf %13, %16 : vector<64x64xf32>
    %18 = math.exp %17 : vector<64x64xf32>
    %cst_8 = arith.constant dense<0.000000e+00> : vector<64xf32>
    %19 = vector.multi_reduction <add>, %18, %cst_8 [1] : vector<64x64xf32> to vector<64xf32>
    %20 = vector.shape_cast %19 : vector<64xf32> to vector<64x1xf32>
    %21 = vector.broadcast %20 : vector<64x1xf32> to vector<64x64xf32>
    %22 = arith.divf %18, %21 : vector<64x64xf32>
    %23 = arith.truncf %22 : vector<64x64xf32> to vector<64x64xbf16>
    %cst_9 = arith.constant dense<0.000000e+00> : vector<64x64xf32>
    %24 = tpu.matmul %12, %23, %cst_9 {dimension_numbers = #tpu.dot_dimension_numbers<[1], [1], [0], [0], [0, 0, 1, 0], [], []>} : vector<64x64xbf16>, vector<64x64xbf16>, vector<64x64xf32> -> vector<64x64xf32>
    %c0_10 = arith.constant 0 : index
    %25 = memref.load %arg4[%c0_10] : memref<1xf32, #tpu.memory_space<smem>>
    %26 = vector.broadcast %25 : f32 to vector<64x64xf32>
    %27 = arith.mulf %26, %24 : vector<64x64xf32>
    %28 = arith.extf %1 : vector<64x64xbf16> to vector<64x64xf32>
    %29 = arith.addf %27, %28 : vector<64x64xf32>
    %30 = arith.truncf %29 : vector<64x64xf32> to vector<64x64xbf16>
    %c0_11 = arith.constant 0 : index
    %c0_12 = arith.constant 0 : index
    %c0_13 = arith.constant 0 : index
    %31 = vector.load %arg5[%c0_11, %c0_12, %c0_13] : memref<1x64x64xbf16, #tpu.memory_space<vmem>>, vector<1x64x64xbf16>
    %32 = vector.shape_cast %31 : vector<1x64x64xbf16> to vector<64x64xbf16>
    %33 = vector.shape_cast %30 : vector<64x64xbf16> to vector<1x64x64xbf16>
    tpu.vector_store %arg5[%c0_11, %c0_12, %c0_13], %33 {strides = array<i32>} : memref<1x64x64xbf16, #tpu.memory_space<vmem>>, vector<1x64x64xbf16>,
    return
  }
  func.func @transform_0(%arg0: i32) -> (i32, i32, i32) {
    %c0_i32 = arith.constant 0 : i32
    %c0_i32_0 = arith.constant 0 : i32
    %c0_i32_1 = arith.constant 0 : i32
    return %arg0, %c0_i32, %c0_i32_0 : i32, i32, i32
  }
  func.func @transform_1(%arg0: i32) -> (i32, i32) {
    %c0_i32 = arith.constant 0 : i32
    %c0_i32_0 = arith.constant 0 : i32
    %c0_i32_1 = arith.constant 0 : i32
    return %c0_i32, %c0_i32_0 : i32, i32
  }
  func.func @transform_2(%arg0: i32) -> (i32, i32) {
    %c0_i32 = arith.constant 0 : i32
    %c0_i32_0 = arith.constant 0 : i32
    %c0_i32_1 = arith.constant 0 : i32
    return %c0_i32, %c0_i32_0 : i32, i32
  }
  func.func @transform_3(%arg0: i32) -> i32 {
    %c0_i32 = arith.constant 0 : i32
    %c0_i32_0 = arith.constant 0 : i32
    return %c0_i32 : i32
  }
  func.func @transform_4(%arg0: i32) -> (i32, i32, i32) {
    %c0_i32 = arith.constant 0 : i32
    %c0_i32_0 = arith.constant 0 : i32
    %c0_i32_1 = arith.constant 0 : i32
    return %arg0, %c0_i32, %c0_i32_0 : i32, i32, i32
  }
}

module attributes {stable_mosaic.version = 11 : i64} {
  func.func @_wx_act_kernel(%arg0: i32, %arg1: i32, %arg2: memref<64x1024xbf16, #tpu.memory_space<vmem>>, %arg3: memref<1024x32xbf16, #tpu.memory_space<vmem>>, %arg4: memref<64x32xbf16, #tpu.memory_space<vmem>>) attributes {dimension_semantics = [#tpu.dimension_semantics<parallel>, #tpu.dimension_semantics<parallel>], iteration_bounds = array<i64: 2, 1>, scalar_prefetch = 0 : i64, scratch_operands = 0 : i64, tpu.core_type = #tpu.core_type<tc>, window_params = [{transform_indices = @transform_0, window_bounds = array<i64: 64, 1024>}, {transform_indices = @transform_1, window_bounds = array<i64: 1024, 32>}, {transform_indices = @transform_2, window_bounds = array<i64: 64, 32>}]} {
    %c0 = arith.constant 0 : index
    %c0_0 = arith.constant 0 : index
    %0 = vector.load %arg2[%c0, %c0_0] : memref<64x1024xbf16, #tpu.memory_space<vmem>>, vector<64x1024xbf16>
    %c0_1 = arith.constant 0 : index
    %c0_2 = arith.constant 0 : index
    %1 = vector.load %arg3[%c0_1, %c0_2] : memref<1024x32xbf16, #tpu.memory_space<vmem>>, vector<1024x32xbf16>
    %cst = arith.constant dense<0.000000e+00> : vector<64x32xf32>
    %2 = tpu.matmul %0, %1, %cst {dimension_numbers = #tpu.dot_dimension_numbers<[1], [0], [0], [1], [0, 0, 1, 1], [], []>} : vector<64x1024xbf16>, vector<1024x32xbf16>, vector<64x32xf32> -> vector<64x32xf32>
    %cst_3 = arith.constant 0.000000e+00 : f32
    %3 = vector.broadcast %cst_3 : f32 to vector<64x32xf32>
    %4 = arith.cmpf oge, %2, %3 : vector<64x32xf32>
    %cst_4 = arith.constant 2.000000e-01 : f32
    %5 = vector.broadcast %cst_4 : f32 to vector<64x32xf32>
    %6 = arith.mulf %5, %2 : vector<64x32xf32>
    %7 = arith.select %4, %2, %6 : vector<64x32xi1>, vector<64x32xf32>
    %8 = arith.truncf %7 : vector<64x32xf32> to vector<64x32xbf16>
    %c0_5 = arith.constant 0 : index
    %c0_6 = arith.constant 0 : index
    %9 = vector.load %arg4[%c0_5, %c0_6] : memref<64x32xbf16, #tpu.memory_space<vmem>>, vector<64x32xbf16>
    tpu.vector_store %arg4[%c0_5, %c0_6], %8 {strides = array<i32>} : memref<64x32xbf16, #tpu.memory_space<vmem>>, vector<64x32xbf16>,
    return
  }
  func.func @transform_0(%arg0: i32, %arg1: i32) -> (i32, i32) {
    %c0_i32 = arith.constant 0 : i32
    %c0_i32_0 = arith.constant 0 : i32
    return %arg0, %c0_i32 : i32, i32
  }
  func.func @transform_1(%arg0: i32, %arg1: i32) -> (i32, i32) {
    %c0_i32 = arith.constant 0 : i32
    %c0_i32_0 = arith.constant 0 : i32
    return %c0_i32, %arg1 : i32, i32
  }
  func.func @transform_2(%arg0: i32, %arg1: i32) -> (i32, i32) {
    %c0_i32 = arith.constant 0 : i32
    return %arg0, %arg1 : i32, i32
  }
}

</mosaic_0001>

<bundles_post_ra>
// kernel: discriminator_forward.7
= control target key start
LH: loop header
LB: loop body
LE: loop exit
PB: predicated region body
PF: predicated region fallthrough
CT: control target
= control target key end

     0   :  { %s1327_s9 = smov 0   ;;  %s1329_s10 = smov 0   ;;  %s1581_s0 = inlined_call_operand.vmem [shape: bf16[8,48], index: 0, kind: input, shape index: {}]   ;;  %s1582_s1 = inlined_call_operand.vmem [shape: bf16[48,8192], index: 1, kind: input, shape index: {}]   ;;  %s1583_s2 = inlined_call_operand.vmem [shape: bf16[8,8192], index: 2, kind: output, shape index: {}]  }
   0x1   :  { %s1331_s11 = smov 0   ;;  %s1333_s12 = smov 0  }
   0x2   :  { %s1335_s13 = smov 0  }
   0x3 LB: > { %s21_s14 = sadd.s32 1, %s1305_s12  ;;  %p64_p1 = scmp.ne.s32.totalorder %s1297_s10, %s1293_s9  ;;  %s1309_s13 = sphi %s1335_s13, %s12_s13   ;;  %s1305_s12 = sphi %s1333_s12, %s1587_s12   ;;  %s1301_s11 = sphi %s1331_s11, %s1586_s11   ;;  %s1297_s10 = sphi %s1329_s10, %s1585_s10   ;;  %s1293_s9 = sphi %s1327_s9, %s1584_s9  }
   0x4   : > { %p22_p0 = scmp.ge.s32.totalorder %s21_s14, 4  ;;  %p65_p2 = scmp.eq.s32.totalorder %s1309_s13, 0 }
   0x5   : > { %s57_s16 = sadd.s32 1, %s1297_s10  ;;  %p1147_p5 = scmp.ge.s32.totalorder %s1309_s13, 4 }
   0x6   : > { %s1589_s14 = smov (%p22_p0, %s21_s14), 0  ;;  %p66_p3 = por %p65_p2, %p64_p1 }
   0x7   : > { %s54_s15 = ssub.s32 %s1305_s12, %s1589_s14  ;;  %125 = sbr.rel (%p1147_p5) target bundleno = 43 (0x2b), region = 20 }
   0x8   : > { %p55_p4 = scmp.eq.s32.totalorder %s54_s15, 0 }
   0xa   : > { %s1362_s17 = scalar_select %p55_p4, %s1297_s10, %s57_s16  }
   0xe   : > { %128 = sbr.rel (!%p66_p3) target bundleno = 43 (0x2b), region = 24  ;;  %s130_s18 = sand.u32 (%p66_p3), 1, %s1297_s10  }
   0xf   : > { %s1219_s19 = sshll.u32 (%p66_p3), %s1305_s12, 6  ;;  %s1228_s20 = smul.u32 (%p66_p3), 384, %s130_s18 }
  0x10   : > { %s1370_s23 = scalar_lea.vmem (%p66_p3), %s1582_s1, %s1219_s19 }
  0x11   : > { %v148_v0 = vld [vmem:[%s1370_s23] sm:$0xff] (%p66_p3)  ;;  %v150_v1 = vld [vmem:[%s1370_s23 + $0x8] sm:$0xff] (%p66_p3)  ;;  %v152_v2 = vld [vmem:[%s1370_s23 + $0x10] sm:$0xff] (%p66_p3)  ;;  %s1378_s24 = scalar_lea.vmem (%p66_p3), [#allocation2], %s1228_s20 }
  0x12   : > { %v154_v3 = vld [vmem:[%s1370_s23 + $0x18] sm:$0xff] (%p66_p3)  ;;  %v156_v4 = vld [vmem:[%s1370_s23 + $0x20] sm:$0xff] (%p66_p3)  ;;  %v158_v5 = vld [vmem:[%s1370_s23 + $0x28] sm:$0xff] (%p66_p3)  ;;  %149 = vst [vmem:[%s1378_s24] sm:$0xff] (%p66_p3), %v148_v0 }
  0x13   : > { %151 = vst [vmem:[%s1378_s24 + $0x8] sm:$0xff] (%p66_p3), %v150_v1  ;;  %153 = vst [vmem:[%s1378_s24 + $0x10] sm:$0xff] (%p66_p3), %v152_v2  ;;  %v160_v6 = vld [vmem:[%s1370_s23 + $0x30] sm:$0xff] (%p66_p3)  ;;  %v162_v7 = vld [vmem:[%s1370_s23 + $0x38] sm:$0xff] (%p66_p3) }
  0x14   : > { %155 = vst [vmem:[%s1378_s24 + $0x18] sm:$0xff] (%p66_p3), %v154_v3  ;;  %157 = vst [vmem:[%s1378_s24 + $0x20] sm:$0xff] (%p66_p3), %v156_v4  ;;  %v164_v8 = vld [vmem:[%s1370_s23 + $0x100] sm:$0xff] (%p66_p3)  ;;  %v166_v9 = vld [vmem:[%s1370_s23 + $0x108] sm:$0xff] (%p66_p3) }
  0x15   : > { %159 = vst [vmem:[%s1378_s24 + $0x28] sm:$0xff] %v158_v5  ;;  %161 = vst [vmem:[%s1378_s24 + $0x30] sm:$0xff] %v160_v6  ;;  %v168_v10 = vld [vmem:[%s1370_s23 + $0x110] sm:$0xff]  ;;  %v170_v11 = vld [vmem:[%s1370_s23 + $0x118] sm:$0xff] }
  0x16   : > { %163 = vst [vmem:[%s1378_s24 + $0x38] sm:$0xff] %v162_v7  ;;  %165 = vst [vmem:[%s1378_s24 + $0x40] sm:$0xff] %v164_v8  ;;  %v172_v12 = vld [vmem:[%s1370_s23 + $0x120] sm:$0xff]  ;;  %v174_v13 = vld [vmem:[%s1370_s23 + $0x128] sm:$0xff] }
  0x17   : > { %167 = vst [vmem:[%s1378_s24 + $0x48] sm:$0xff] %v166_v9  ;;  %169 = vst [vmem:[%s1378_s24 + $0x50] sm:$0xff] %v168_v10  ;;  %v176_v14 = vld [vmem:[%s1370_s23 + $0x130] sm:$0xff]  ;;  %v178_v15 = vld [vmem:[%s1370_s23 + $0x138] sm:$0xff] }
  0x18   : > { %171 = vst [vmem:[%s1378_s24 + $0x58] sm:$0xff] %v170_v11  ;;  %173 = vst [vmem:[%s1378_s24 + $0x60] sm:$0xff] %v172_v12  ;;  %v180_v16 = vld [vmem:[%s1370_s23 + $0x200] sm:$0xff]  ;;  %v182_v17 = vld [vmem:[%s1370_s23 + $0x208] sm:$0xff] }
  0x19   : > { %175 = vst [vmem:[%s1378_s24 + $0x68] sm:$0xff] %v174_v13  ;;  %177 = vst [vmem:[%s1378_s24 + $0x70] sm:$0xff] %v176_v14  ;;  %v184_v18 = vld [vmem:[%s1370_s23 + $0x210] sm:$0xff]  ;;  %v186_v19 = vld [vmem:[%s1370_s23 + $0x218] sm:$0xff] }
  0x1a   : > { %179 = vst [vmem:[%s1378_s24 + $0x78] sm:$0xff] %v178_v15  ;;  %181 = vst [vmem:[%s1378_s24 + $0x80] sm:$0xff] %v180_v16  ;;  %v188_v20 = vld [vmem:[%s1370_s23 + $0x220] sm:$0xff]  ;;  %v190_v21 = vld [vmem:[%s1370_s23 + $0x228] sm:$0xff] }
  0x1b   : > { %183 = vst [vmem:[%s1378_s24 + $0x88] sm:$0xff] %v182_v17  ;;  %185 = vst [vmem:[%s1378_s24 + $0x90] sm:$0xff] %v184_v18  ;;  %v192_v22 = vld [vmem:[%s1370_s23 + $0x230] sm:$0xff]  ;;  %v194_v23 = vld [vmem:[%s1370_s23 + $0x238] sm:$0xff] }
  0x1c   : > { %187 = vst [vmem:[%s1378_s24 + $0x98] sm:$0xff] %v186_v19  ;;  %189 = vst [vmem:[%s1378_s24 + $0xa0] sm:$0xff] %v188_v20  ;;  %v196_v24 = vld [vmem:[%s1370_s23 + $0x300] sm:$0xff]  ;;  %v198_v25 = vld [vmem:[%s1370_s23 + $0x308] sm:$0xff] }
  0x1d   : > { %191 = vst [vmem:[%s1378_s24 + $0xa8] sm:$0xff] %v190_v21  ;;  %193 = vst [vmem:[%s1378_s24 + $0xb0] sm:$0xff] %v192_v22  ;;  %v200_v26 = vld [vmem:[%s1370_s23 + $0x310] sm:$0xff]  ;;  %v202_v27 = vld [vmem:[%s1370_s23 + $0x318] sm:$0xff] }
  0x1e   : > { %195 = vst [vmem:[%s1378_s24 + $0xb8] sm:$0xff] %v194_v23  ;;  %197 = vst [vmem:[%s1378_s24 + $0xc0] sm:$0xff] %v196_v24  ;;  %v204_v28 = vld [vmem:[%s1370_s23 + $0x320] sm:$0xff]  ;;  %v206_v29 = vld [vmem:[%s1370_s23 + $0x328] sm:$0xff] }
  0x1f   : > { %199 = vst [vmem:[%s1378_s24 + $0xc8] sm:$0xff] %v198_v25  ;;  %201 = vst [vmem:[%s1378_s24 + $0xd0] sm:$0xff] %v200_v26  ;;  %v208_v30 = vld [vmem:[%s1370_s23 + $0x330] sm:$0xff]  ;;  %v210_v31 = vld [vmem:[%s1370_s23 + $0x338] sm:$0xff] }
  0x20   : > { %203 = vst [vmem:[%s1378_s24 + $0xd8] sm:$0xff] %v202_v27  ;;  %205 = vst [vmem:[%s1378_s24 + $0xe0] sm:$0xff] %v204_v28  ;;  %v212_v32 = vld [vmem:[%s1370_s23 + $0x400] sm:$0xff]  ;;  %v214_v33 = vld [vmem:[%s1370_s23 + $0x408] sm:$0xff] }
  0x21   : > { %207 = vst [vmem:[%s1378_s24 + $0xe8] sm:$0xff] %v206_v29  ;;  %209 = vst [vmem:[%s1378_s24 + $0xf0] sm:$0xff] %v208_v30  ;;  %v216_v34 = vld [vmem:[%s1370_s23 + $0x410] sm:$0xff]  ;;  %v218_v35 = vld [vmem:[%s1370_s23 + $0x418] sm:$0xff] }
  0x22   : > { %211 = vst [vmem:[%s1378_s24 + $0xf8] sm:$0xff] %v210_v31  ;;  %213 = vst [vmem:[%s1378_s24 + $0x100] sm:$0xff] %v212_v32  ;;  %v220_v36 = vld [vmem:[%s1370_s23 + $0x420] sm:$0xff]  ;;  %v222_v37 = vld [vmem:[%s1370_s23 + $0x428] sm:$0xff] }
  0x23   : > { %215 = vst [vmem:[%s1378_s24 + $0x108] sm:$0xff] %v214_v33  ;;  %217 = vst [vmem:[%s1378_s24 + $0x110] sm:$0xff] %v216_v34  ;;  %v224_v38 = vld [vmem:[%s1370_s23 + $0x430] sm:$0xff]  ;;  %v226_v39 = vld [vmem:[%s1370_s23 + $0x438] sm:$0xff] }
  0x24   : > { %219 = vst [vmem:[%s1378_s24 + $0x118] sm:$0xff] %v218_v35  ;;  %221 = vst [vmem:[%s1378_s24 + $0x120] sm:$0xff] %v220_v36  ;;  %v228_v40 = vld [vmem:[%s1370_s23 + $0x500] sm:$0xff]  ;;  %v230_v41 = vld [vmem:[%s1370_s23 + $0x508] sm:$0xff] }
  0x25   : > { %223 = vst [vmem:[%s1378_s24 + $0x128] sm:$0xff] %v222_v37  ;;  %225 = vst [vmem:[%s1378_s24 + $0x130] sm:$0xff] %v224_v38  ;;  %v232_v42 = vld [vmem:[%s1370_s23 + $0x510] sm:$0xff]  ;;  %v234_v43 = vld [vmem:[%s1370_s23 + $0x518] sm:$0xff] }
  0x26   : > { %227 = vst [vmem:[%s1378_s24 + $0x138] sm:$0xff] %v226_v39  ;;  %229 = vst [vmem:[%s1378_s24 + $0x140] sm:$0xff] %v228_v40  ;;  %v236_v44 = vld [vmem:[%s1370_s23 + $0x520] sm:$0xff]  ;;  %v238_v45 = vld [vmem:[%s1370_s23 + $0x528] sm:$0xff] }
  0x27   : > { %231 = vst [vmem:[%s1378_s24 + $0x148] sm:$0xff] %v230_v41  ;;  %233 = vst [vmem:[%s1378_s24 + $0x150] sm:$0xff] %v232_v42  ;;  %v240_v46 = vld [vmem:[%s1370_s23 + $0x530] sm:$0xff]  ;;  %v242_v47 = vld [vmem:[%s1370_s23 + $0x538] sm:$0xff] }
  0x28   : > { %235 = vst [vmem:[%s1378_s24 + $0x158] sm:$0xff] %v234_v43  ;;  %237 = vst [vmem:[%s1378_s24 + $0x160] sm:$0xff] %v236_v44 }
  0x29   : > { %239 = vst [vmem:[%s1378_s24 + $0x168] sm:$0xff] %v238_v45  ;;  %241 = vst [vmem:[%s1378_s24 + $0x170] sm:$0xff] %v240_v46 }
  0x2a   : > { %243 = vst [vmem:[%s1378_s24 + $0x178] sm:$0xff] %v242_v47 }
  0x2b PF: > { %p1150_p6 = scmp.ge.s32.totalorder %s1309_s13, 1  ;;  %p248_p7 = scmp.lt.s32.totalorder %s1309_s13, 5 }
  0x2d   : > { %p249_p8 = pnand %p1150_p6, %p248_p7 }
  0x2e   : > { %s255_s25 = sand.u32 (!%p249_p8), 1, %s1293_s9   ;;  %v1311_v48 = vmov (!%p249_p8), 0   ;;  %v1500_v19 = vld [vmem:[%s1581_s0] sm:$0xf] (!%p249_p8)  ;;  %vm589_vm0 = vcmask (!%p249_p8), 392192   ;;  %s1151_s30 = sshll.u32 (!%p249_p8), %s1301_s11, 4 }
  0x2f   : > { %252 = sbr.rel (%p249_p8) target bundleno = 323 (0x143), region = 47  ;;  %625 = vmatprep.mubr.bf16.mxu0 (!%p249_p8), %v1311_v48  ;;  %666 = vmatprep.mubr.bf16.mxu1 (!%p249_p8), %v1311_v48  ;;  %p292_p9 = scmp.lt.s32.totalorder (!%p249_p8), %s1151_s30, 63 }
  0x30   : > { %s1229_s26 = smul.u32 (!%p249_p8), 384, %s255_s25 }
  0x32   : > { %s1475_s27 = scalar_lea.vmem (!%p249_p8), [#allocation2], %s1229_s26 }
  0x33   : > { %v301_v49 = vld [vmem:[%s1475_s27] sm:$0xff] (!%p249_p8)  ;;  %v302_v51 = vld [vmem:[%s1475_s27 + $0x8] sm:$0xff] (!%p249_p8)  ;;  %v303_v7 = vld [vmem:[%s1475_s27 + $0x10] sm:$0xff] (!%p249_p8) }
  0x34   : > { %v309_v50 = vld [vmem:[%s1475_s27 + $0x40] sm:$0xff] (!%p249_p8)  ;;  %v310_v53 = vld [vmem:[%s1475_s27 + $0x48] sm:$0xff] (!%p249_p8)  ;;  %v311_v8 = vld [vmem:[%s1475_s27 + $0x50] sm:$0xff] (!%p249_p8) }
  0x35   : > { %v1154_v52 = vcombine.high (!%p249_p8), %v301_v49, %v309_v50  ;;  %v1153_v54 = vcombine.low (!%p249_p8), %v301_v49, %v309_v50  ;;  %v317_v55 = vld [vmem:[%s1475_s27 + $0x80] sm:$0xff] (!%p249_p8)  ;;  %v1156_v57 = vcombine.high (!%p249_p8), %v302_v51, %v310_v53  ;;  %v1155_v58 = vcombine.low (!%p249_p8), %v302_v51, %v310_v53  ;;  %v318_v60 = vld [vmem:[%s1475_s27 + $0x88] sm:$0xff] (!%p249_p8)  ;;  %v304_v9 = vld [vmem:[%s1475_s27 + $0x18] sm:$0xff] (!%p249_p8) }
  0x36   : > { %v325_v56 = vld [vmem:[%s1475_s27 + $0xc0] sm:$0xff]  ;;  %v326_v61 = vld [vmem:[%s1475_s27 + $0xc8] sm:$0xff]  ;;  %v312_v10 = vld [vmem:[%s1475_s27 + $0x58] sm:$0xff]  ;;  %v1158_v13 = vcombine.high %v303_v7, %v311_v8  ;;  %v1157_v20 = vcombine.low %v303_v7, %v311_v8  ;;  %s1591_s30 = smov (!%p292_p9, %s1151_s30), 63 }
  0x37   : > { %v1170_v59 = vcombine.high %v317_v55, %v325_v56  ;;  %v333_v62 = vld [vmem:[%s1475_s27 + $0x100] sm:$0xff]  ;;  %593 = vmatprep.subr.bf16.mxu0 %v1154_v52  ;;  %v1172_v63 = vcombine.high %v318_v60, %v326_v61  ;;  %v334_v1 = vld [vmem:[%s1475_s27 + $0x108] sm:$0xff]  ;;  %634 = vmatprep.subr.bf16.mxu1 %v1156_v57  ;;  %v1169_v3 = vcombine.low %v317_v55, %v325_v56  ;;  %v319_v15 = vld [vmem:[%s1475_s27 + $0x90] sm:$0xff]  ;;  %s1152_s3 = sshll.u32 %s1591_s30, 2 }
  0x38   : > { %v341_v0 = vld [vmem:[%s1475_s27 + $0x140] sm:$0xff]  ;;  %v342_v2 = vld [vmem:[%s1475_s27 + $0x148] sm:$0xff]  ;;  %594 = vmatpush1.bf16.msra.mxu0 %v1153_v54  ;;  %635 = vmatpush1.bf16.msra.mxu1 %v1155_v58  ;;  %v1171_v4 = vcombine.low %v318_v60, %v326_v61  ;;  %v1160_v14 = vcombine.high %v304_v9, %v312_v10  ;;  %v327_v16 = vld [vmem:[%s1475_s27 + $0xd0] sm:$0xff]  ;;  %v1159_v21 = vcombine.low %v304_v9, %v312_v10  ;;  %s1556_s6 = scalar_lea.vmem %s1583_s2, %s1152_s3 }
  0x39   : > { %595 = vmatprep.subr.bf16.mxu0 %v1170_v59  ;;  %v1186_v5 = vcombine.high %v333_v62, %v341_v0  ;;  %636 = vmatprep.subr.bf16.mxu1 %v1172_v63  ;;  %v1188_v6 = vcombine.high %v334_v1, %v342_v2  ;;  %v1185_v11 = vcombine.low %v333_v62, %v341_v0  ;;  %v320_v17 = vld [vmem:[%s1475_s27 + $0x98] sm:$0xff]  ;;  %v335_v24 = vld [vmem:[%s1475_s27 + $0x110] sm:$0xff]  ;;  %v305_v32 = vld [vmem:[%s1475_s27 + $0x20] sm:$0xff] }
  0x3a   : > { %v1187_v12 = vcombine.low %v334_v1, %v342_v2  ;;  %v328_v18 = vld [vmem:[%s1475_s27 + $0xd8] sm:$0xff]  ;;  %v1174_v22 = vcombine.high %v319_v15, %v327_v16  ;;  %v343_v25 = vld [vmem:[%s1475_s27 + $0x150] sm:$0xff]  ;;  %v1173_v28 = vcombine.low %v319_v15, %v327_v16  ;;  %v313_v33 = vld [vmem:[%s1475_s27 + $0x60] sm:$0xff] }
  0x3b   : > { %v1176_v23 = vcombine.high %v320_v17, %v328_v18  ;;  %v336_v26 = vld [vmem:[%s1475_s27 + $0x118] sm:$0xff]  ;;  %v1175_v29 = vcombine.low %v320_v17, %v328_v18  ;;  %v1190_v30 = vcombine.high %v335_v24, %v343_v25  ;;  %v306_v34 = vld [vmem:[%s1475_s27 + $0x28] sm:$0xff]  ;;  %v1189_v36 = vcombine.low %v335_v24, %v343_v25  ;;  %v321_v40 = vld [vmem:[%s1475_s27 + $0xa0] sm:$0xff] }
  0x3c   : > { %596 = vmatpush1.bf16.msra.mxu0 %v1169_v3  ;;  %637 = vmatpush1.bf16.msra.mxu1 %v1171_v4  ;;  %v344_v27 = vld [vmem:[%s1475_s27 + $0x158] sm:$0xff]  ;;  %v314_v35 = vld [vmem:[%s1475_s27 + $0x68] sm:$0xff]  ;;  %v1162_v38 = vcombine.high %v305_v32, %v313_v33  ;;  %v329_v41 = vld [vmem:[%s1475_s27 + $0xe0] sm:$0xff]  ;;  %v1161_v44 = vcombine.low %v305_v32, %v313_v33 }
  0x3d   : > { %597 = vmatprep.subr.bf16.mxu0 %v1186_v5  ;;  %638 = vmatprep.subr.bf16.mxu1 %v1188_v6  ;;  %v1192_v31 = vcombine.high %v336_v26, %v344_v27  ;;  %v1191_v37 = vcombine.low %v336_v26, %v344_v27  ;;  %v1164_v39 = vcombine.high %v306_v34, %v314_v35  ;;  %v322_v42 = vld [vmem:[%s1475_s27 + $0xa8] sm:$0xff]  ;;  %v337_v49 = vld [vmem:[%s1475_s27 + $0x120] sm:$0xff]  ;;  %v307_v57 = vld [vmem:[%s1475_s27 + $0x30] sm:$0xff] }
  0x3e   : > { %v330_v43 = vld [vmem:[%s1475_s27 + $0xe8] sm:$0xff]  ;;  %v1163_v45 = vcombine.low %v306_v34, %v314_v35  ;;  %v1178_v46 = vcombine.high %v321_v40, %v329_v41  ;;  %v345_v50 = vld [vmem:[%s1475_s27 + $0x160] sm:$0xff]  ;;  %v1177_v53 = vcombine.low %v321_v40, %v329_v41  ;;  %v315_v58 = vld [vmem:[%s1475_s27 + $0x70] sm:$0xff] }
  0x3f   : > { %v1180_v47 = vcombine.high %v322_v42, %v330_v43  ;;  %v338_v51 = vld [vmem:[%s1475_s27 + $0x128] sm:$0xff]  ;;  %v1179_v54 = vcombine.low %v322_v42, %v330_v43  ;;  %v1194_v55 = vcombine.high %v337_v49, %v345_v50  ;;  %v308_v59 = vld [vmem:[%s1475_s27 + $0x38] sm:$0xff]  ;;  %v1193_v61 = vcombine.low %v337_v49, %v345_v50  ;;  %v323_v1 = vld [vmem:[%s1475_s27 + $0xb0] sm:$0xff] }
  0x40   : > { %598 = vmatpush1.bf16.msra.mxu0 %v1185_v11  ;;  %639 = vmatpush1.bf16.msra.mxu1 %v1187_v12  ;;  %v346_v52 = vld [vmem:[%s1475_s27 + $0x168] sm:$0xff]  ;;  %v316_v60 = vld [vmem:[%s1475_s27 + $0x78] sm:$0xff]  ;;  %v1166_v63 = vcombine.high %v307_v57, %v315_v58  ;;  %v331_v2 = vld [vmem:[%s1475_s27 + $0xf0] sm:$0xff]  ;;  %v1165_v5 = vcombine.low %v307_v57, %v315_v58 }
  0x41   : > { %675 = vmatprep.subr.bf16.mxu0 %v1158_v13  ;;  %716 = vmatprep.subr.bf16.mxu1 %v1160_v14  ;;  %v1196_v56 = vcombine.high %v338_v51, %v346_v52  ;;  %v1195_v62 = vcombine.low %v338_v51, %v346_v52  ;;  %v1168_v0 = vcombine.high %v308_v59, %v316_v60  ;;  %v324_v3 = vld [vmem:[%s1475_s27 + $0xb8] sm:$0xff]  ;;  %v339_v9 = vld [vmem:[%s1475_s27 + $0x130] sm:$0xff] }
  0x42   : > { %v332_v4 = vld [vmem:[%s1475_s27 + $0xf8] sm:$0xff]  ;;  %v1167_v6 = vcombine.low %v308_v59, %v316_v60  ;;  %v1182_v7 = vcombine.high %v323_v1, %v331_v2  ;;  %v347_v10 = vld [vmem:[%s1475_s27 + $0x170] sm:$0xff]  ;;  %v1181_v13 = vcombine.low %v323_v1, %v331_v2 }
  0x43   : > { %1201 = vmatmul.mubr.msk.bf16.vlgmr.msra.gmra.mrb[0].mxu0 %vm589_vm0, %v1500_v19  ;;  %1202 = vmatmul.mubr.msk.bf16.vlgmr.msra.gmra.mrb[0].mxu1 %vm589_vm0, %v1500_v19  ;;  %v1184_v8 = vcombine.high %v324_v3, %v332_v4  ;;  %v340_v11 = vld [vmem:[%s1475_s27 + $0x138] sm:$0xff]  ;;  %v1183_v14 = vcombine.low %v324_v3, %v332_v4  ;;  %v1198_v15 = vcombine.high %v339_v9, %v347_v10 }
  0x44   : > { %676 = vmatpush1.bf16.msra.mxu0 %v1157_v20  ;;  %717 = vmatpush1.bf16.msra.mxu1 %v1159_v21  ;;  %v348_v12 = vld [vmem:[%s1475_s27 + $0x178] sm:$0xff]  ;;  %v1197_v17 = vcombine.low %v339_v9, %v347_v10 }
  0x45   : > { %677 = vmatprep.subr.bf16.mxu0 %v1174_v22  ;;  %718 = vmatprep.subr.bf16.mxu1 %v1176_v23  ;;  %v1200_v16 = vcombine.high %v340_v11, %v348_v12  ;;  %v1199_v18 = vcombine.low %v340_v11, %v348_v12 }
  0x46   : > { %707 = vmatprep.mubr.bf16.mxu0 %v1311_v48  ;;  %748 = vmatprep.mubr.bf16.mxu1 %v1311_v48 }
  0x48   : > { %678 = vmatpush1.bf16.msra.mxu0 %v1173_v28  ;;  %719 = vmatpush1.bf16.msra.mxu1 %v1175_v29 }
  0x49   : > { %679 = vmatprep.subr.bf16.mxu0 %v1190_v30  ;;  %720 = vmatprep.subr.bf16.mxu1 %v1192_v31 }
  0x4c   : > { %680 = vmatpush1.bf16.msra.mxu0 %v1189_v36  ;;  %721 = vmatpush1.bf16.msra.mxu1 %v1191_v37 }
  0x4d   : > { %757 = vmatprep.subr.bf16.mxu0 %v1162_v38  ;;  %798 = vmatprep.subr.bf16.mxu1 %v1164_v39 }
  0x4f   : > { %1203 = vmatmul.mubr.msk.bf16.vlgmr.msra.gmra.mrb[4].mxu0 %vm589_vm0, %v1500_v19  ;;  %1204 = vmatmul.mubr.msk.bf16.vlgmr.msra.gmra.mrb[4].mxu1 %vm589_vm0, %v1500_v19 }
  0x50   : > { %758 = vmatpush1.bf16.msra.mxu0 %v1161_v44  ;;  %799 = vmatpush1.bf16.msra.mxu1 %v1163_v45 }
  0x51   : > { %759 = vmatprep.subr.bf16.mxu0 %v1178_v46  ;;  %800 = vmatprep.subr.bf16.mxu1 %v1180_v47 }
  0x52   : > { %789 = vmatprep.mubr.bf16.mxu0 %v1311_v48  ;;  %830 = vmatprep.mubr.bf16.mxu1 %v1311_v48 }
  0x54   : > { %760 = vmatpush1.bf16.msra.mxu0 %v1177_v53  ;;  %801 = vmatpush1.bf16.msra.mxu1 %v1179_v54 }
  0x55   : > { %761 = vmatprep.subr.bf16.mxu0 %v1194_v55  ;;  %802 = vmatprep.subr.bf16.mxu1 %v1196_v56 }
  0x58   : > { %762 = vmatpush1.bf16.msra.mxu0 %v1193_v61  ;;  %803 = vmatpush1.bf16.msra.mxu1 %v1195_v62 }
  0x59   : > { %839 = vmatprep.subr.bf16.mxu0 %v1166_v63  ;;  %880 = vmatprep.subr.bf16.mxu1 %v1168_v0 }
  0x5b   : > { %1205 = vmatmul.mubr.msk.bf16.vlgmr.msra.gmra.mrb[8].mxu0 %vm589_vm0, %v1500_v19  ;;  %1206 = vmatmul.mubr.msk.bf16.vlgmr.msra.gmra.mrb[8].mxu1 %vm589_vm0, %v1500_v19 }
  0x5c   : > { %840 = vmatpush1.bf16.msra.mxu0 %v1165_v5  ;;  %881 = vmatpush1.bf16.msra.mxu1 %v1167_v6 }
  0x5d   : > { %841 = vmatprep.subr.bf16.mxu0 %v1182_v7  ;;  %882 = vmatprep.subr.bf16.mxu1 %v1184_v8 }
  0x5e   : > { %871 = vmatprep.mubr.bf16.mxu0 %v1311_v48  ;;  %912 = vmatprep.mubr.bf16.mxu1 %v1311_v48 }
  0x60   : > { %842 = vmatpush1.bf16.msra.mxu0 %v1181_v13  ;;  %883 = vmatpush1.bf16.msra.mxu1 %v1183_v14 }
  0x61   : > { %843 = vmatprep.subr.bf16.mxu0 %v1198_v15  ;;  %884 = vmatprep.subr.bf16.mxu1 %v1200_v16 }
  0x64   : > { %844 = vmatpush1.bf16.msra.mxu0 %v1197_v17  ;;  %885 = vmatpush1.bf16.msra.mxu1 %v1199_v18 }
  0x67   : > { %1207 = vmatmul.mubr.msk.bf16.vlgmr.msra.gmra.mrb[12].mxu0 %vm589_vm0, %v1500_v19  ;;  %1208 = vmatmul.mubr.msk.bf16.vlgmr.msra.gmra.mrb[12].mxu1 %vm589_vm0, %v1500_v19 }
 0x116   : > { %v627_v20 = vpop.f32.mrb[0].mxu0  ;;  %v668_v21 = vpop.f32.mrb[0].mxu1 }
 0x117   : > { %vm921_vm1 = vcmp.ge.f32.partialorder %v627_v20, 0.0  ;;  %v937_v48 = vmul.f32 0.2, %v627_v20  ;;  %v629_v22 = vpop.f32.mrb[1].mxu0  ;;  %vm923_vm2 = vcmp.ge.f32.partialorder %v668_v21, 0.0  ;;  %v670_v26 = vpop.f32.mrb[1].mxu1 }
 0x118   : > { %v939_v23 = vmul.f32 0.2, %v668_v21  ;;  %vm922_vm3 = vcmp.ge.f32.partialorder %v629_v22, 0.0  ;;  %v938_v24 = vmul.f32 0.2, %v629_v22  ;;  %v631_v27 = vpop.f32.mrb[2].mxu0 }
 0x119   : > { %v953_v25 = vsel %vm921_vm1, %v627_v20, %v937_v48  ;;  %vm924_vm4 = vcmp.ge.f32.partialorder %v670_v26, 0.0  ;;  %v940_v29 = vmul.f32 0.2, %v670_v26  ;;  %v672_v30 = vpop.f32.mrb[2].mxu1  ;;  %v632_v31 = vpop.f32.mrb[3].mxu0 }
 0x11a   : > { %v955_v28 = vsel %vm923_vm2, %v668_v21, %v939_v23  ;;  %v954_v19 = vsel %vm922_vm3, %v629_v22, %v938_v24  ;;  %v673_v33 = vpop.f32.mrb[3].mxu1 }
 0x11b   : > { %v1220_v32 = vpack.c.bf16 %v954_v19, %v953_v25  ;;  %v956_v34 = vsel %vm924_vm4, %v670_v26, %v940_v29 }
 0x11c   : > { %v1221_v35 = vpack.c.bf16 %v956_v34, %v955_v28 }
 0x11d   : > { %1033 = vst [vmem:[%s1556_s6] sm:$0xff] %v1220_v32 }
 0x11e   : > { %1034 = vst [vmem:[%s1556_s6 + $0x8] sm:$0xff] %v1221_v35 }
 0x122   : > { %v709_v36 = vpop.f32.mrb[4].mxu0  ;;  %v750_v38 = vpop.f32.mrb[4].mxu1 }
 0x123   : > { %vm925_vm5 = vcmp.ge.f32.partialorder %v709_v36, 0.0  ;;  %v941_v37 = vmul.f32 0.2, %v709_v36  ;;  %v711_v39 = vpop.f32.mrb[5].mxu0  ;;  %vm927_vm6 = vcmp.ge.f32.partialorder %v750_v38, 0.0  ;;  %v752_v43 = vpop.f32.mrb[5].mxu1 }
 0x124   : > { %v943_v40 = vmul.f32 0.2, %v750_v38  ;;  %vm926_vm7 = vcmp.ge.f32.partialorder %v711_v39, 0.0  ;;  %v942_v41 = vmul.f32 0.2, %v711_v39  ;;  %v713_v44 = vpop.f32.mrb[6].mxu0 }
 0x125   : > { %v957_v42 = vsel %vm925_vm5, %v709_v36, %v941_v37  ;;  %vm928_vm8 = vcmp.ge.f32.partialorder %v752_v43, 0.0  ;;  %v944_v47 = vmul.f32 0.2, %v752_v43  ;;  %v754_v49 = vpop.f32.mrb[6].mxu1  ;;  %v714_v50 = vpop.f32.mrb[7].mxu0 }
 0x126   : > { %v959_v45 = vsel %vm927_vm6, %v750_v38, %v943_v40  ;;  %v958_v46 = vsel %vm926_vm7, %v711_v39, %v942_v41  ;;  %v755_v52 = vpop.f32.mrb[7].mxu1 }
 0x127   : > { %v1222_v51 = vpack.c.bf16 %v958_v46, %v957_v42  ;;  %v960_v53 = vsel %vm928_vm8, %v752_v43, %v944_v47 }
 0x128   : > { %v1223_v54 = vpack.c.bf16 %v960_v53, %v959_v45 }
 0x129   : > { %1035 = vst [vmem:[%s1556_s6 + $0x10] sm:$0xff] %v1222_v51 }
 0x12a   : > { %1036 = vst [vmem:[%s1556_s6 + $0x18] sm:$0xff] %v1223_v54 }
 0x12e   : > { %v791_v55 = vpop.f32.mrb[8].mxu0  ;;  %v832_v57 = vpop.f32.mrb[8].mxu1 }
 0x12f   : > { %vm929_vm9 = vcmp.ge.f32.partialorder %v791_v55, 0.0  ;;  %v945_v56 = vmul.f32 0.2, %v791_v55  ;;  %v793_v58 = vpop.f32.mrb[9].mxu0  ;;  %vm931_vm10 = vcmp.ge.f32.partialorder %v832_v57, 0.0  ;;  %v834_v62 = vpop.f32.mrb[9].mxu1 }
 0x130   : > { %v947_v59 = vmul.f32 0.2, %v832_v57  ;;  %vm930_vm11 = vcmp.ge.f32.partialorder %v793_v58, 0.0  ;;  %v946_v60 = vmul.f32 0.2, %v793_v58  ;;  %v795_v63 = vpop.f32.mrb[10].mxu0 }
 0x131   : > { %v961_v61 = vsel %vm929_vm9, %v791_v55, %v945_v56  ;;  %vm932_vm12 = vcmp.ge.f32.partialorder %v834_v62, 0.0  ;;  %v948_v2 = vmul.f32 0.2, %v834_v62  ;;  %v836_v3 = vpop.f32.mrb[10].mxu1  ;;  %v796_v4 = vpop.f32.mrb[11].mxu0 }
 0x132   : > { %v963_v0 = vsel %vm931_vm10, %v832_v57, %v947_v59  ;;  %v962_v1 = vsel %vm930_vm11, %v793_v58, %v946_v60  ;;  %v837_v6 = vpop.f32.mrb[11].mxu1 }
 0x133   : > { %v1224_v5 = vpack.c.bf16 %v962_v1, %v961_v61  ;;  %v964_v7 = vsel %vm932_vm12, %v834_v62, %v948_v2 }
 0x134   : > { %v1225_v8 = vpack.c.bf16 %v964_v7, %v963_v0 }
 0x135   : > { %1037 = vst [vmem:[%s1556_s6 + $0x20] sm:$0xff] %v1224_v5 }
 0x136   : > { %1038 = vst [vmem:[%s1556_s6 + $0x28] sm:$0xff] %v1225_v8 }
 0x13a   : > { %v873_v9 = vpop.f32.mrb[12].mxu0  ;;  %v914_v11 = vpop.f32.mrb[12].mxu1 }
 0x13b   : > { %vm933_vm13 = vcmp.ge.f32.partialorder %v873_v9, 0.0  ;;  %v949_v10 = vmul.f32 0.2, %v873_v9  ;;  %v875_v12 = vpop.f32.mrb[13].mxu0  ;;  %vm935_vm14 = vcmp.ge.f32.partialorder %v914_v11, 0.0  ;;  %v916_v16 = vpop.f32.mrb[13].mxu1 }
 0x13c   : > { %v951_v13 = vmul.f32 0.2, %v914_v11  ;;  %vm934_vm15 = vcmp.ge.f32.partialorder %v875_v12, 0.0  ;;  %v950_v14 = vmul.f32 0.2, %v875_v12  ;;  %v877_v17 = vpop.f32.mrb[14].mxu0 }
 0x13d   : > { %v965_v15 = vsel %vm933_vm13, %v873_v9, %v949_v10  ;;  %vm936_vm0 = vcmp.ge.f32.partialorder %v916_v16, 0.0  ;;  %v952_v48 = vmul.f32 0.2, %v916_v16  ;;  %v918_v21 = vpop.f32.mrb[14].mxu1  ;;  %v878_v22 = vpop.f32.mrb[15].mxu0 }
 0x13e   : > { %v967_v18 = vsel %vm935_vm14, %v914_v11, %v951_v13  ;;  %v966_v20 = vsel %vm934_vm15, %v875_v12, %v950_v14  ;;  %v919_v24 = vpop.f32.mrb[15].mxu1 }
 0x13f   : > { %v1226_v23 = vpack.c.bf16 %v966_v20, %v965_v15  ;;  %v968_v25 = vsel %vm936_vm0, %v916_v16, %v952_v48 }
 0x140   : > { %v1227_v26 = vpack.c.bf16 %v968_v25, %v967_v18 }
 0x141   : > { %1039 = vst [vmem:[%s1556_s6 + $0x30] sm:$0xff] %v1226_v23 }
 0x142   : > { %1040 = vst [vmem:[%s1556_s6 + $0x38] sm:$0xff] %v1227_v26 }
 0x143 PF: > { %s12_s13 = sadd.s32 1, %s1309_s13   ;;  %s1584_s9 = smov %s1297_s10 }
 0x144   : > { %p9_p10 = scmp.ge.s32.totalorder %s12_s13, 6   ;;  %s1585_s10 = smov %s1362_s17 }
 0x145   : > { %s1586_s11 = smov %s1305_s12  ;;  %s1587_s12 = smov %s1589_s14 }
 0x146   :  { %11 = sbr.rel (!%p9_p10) target bundleno = 3 (0x3), region = 89 }

// kernel: discriminator_forward.8
= control target key start
LH: loop header
LB: loop body
LE: loop exit
PB: predicated region body
PF: predicated region fallthrough
CT: control target
= control target key end

     0   :  { %s1316_s9 = smov 0   ;;  %s1318_s10 = smov 0   ;;  %s1621_s0 = inlined_call_operand.vmem [shape: bf16[16,128], index: 0, kind: input, shape index: {}]   ;;  %s1622_s1 = inlined_call_operand.vmem [shape: bf16[128,2048], index: 1, kind: input, shape index: {}]   ;;  %s1623_s2 = inlined_call_operand.vmem [shape: bf16[16,2048], index: 2, kind: output, shape index: {}]  }
   0x1   :  { %s1320_s11 = smov 0   ;;  %s1322_s12 = smov 0  }
   0x2   :  { %s1324_s13 = smov 0  }
   0x3 LB: > { %s21_s14 = sadd.s32 1, %s1294_s12  ;;  %s1119_s15 = sadd.s32 4294967295, %s1298_s13   ;;  %s1298_s13 = sphi %s1324_s13, %s12_s13   ;;  %s1294_s12 = sphi %s1322_s12, %s1628_s12   ;;  %s1290_s11 = sphi %s1320_s11, %s1627_s11   ;;  %s1286_s10 = sphi %s1318_s10, %s1626_s10   ;;  %s1282_s9 = sphi %s1316_s9, %s1625_s9  }
   0x4   : > { %p22_p0 = scmp.ge.s32.totalorder %s21_s14, 2  ;;  %p64_p1 = scmp.ne.s32.totalorder %s1286_s10, %s1282_s9 }
   0x5   : > { %p65_p2 = scmp.eq.s32.totalorder %s1298_s13, 0  ;;  %p96_p4 = scmp.eq.s32.totalorder %s1119_s15, 1 }
   0x6   : > { %s1630_s14 = smov (%p22_p0, %s21_s14), 0  ;;  %s57_s17 = sadd.s32 1, %s1286_s10 }
   0x7   : > { %p66_p3 = por %p65_p2, %p64_p1  ;;  %s54_s16 = ssub.s32 %s1294_s12, %s1630_s14 }
   0x8   : > { %p55_p5 = scmp.eq.s32.totalorder %s54_s16, 0  ;;  %p1351_p6 = por %p96_p4, %p64_p1 }
   0x9   : > { %p1123_p7 = scmp.ge.s32.totalorder %s1298_s13, 2 }
   0xa   : > { %s1356_s19 = scalar_select %p55_p5, %s1286_s10, %s57_s17  }
   0xb   : > { %127 = sbr.rel (%p1123_p7) target bundleno = 54 (0x36), region = 20 }
  0x12   : > { %130 = sbr.rel (!%p66_p3) target bundleno = 54 (0x36), region = 24  ;;  %s132_s20 = sand.u32 (%p66_p3), 1, %s1286_s10  }
  0x13   : > { %s1208_s21 = sshll.u32 (%p66_p3), %s1294_s12, 5  ;;  %s1124_s22 = sshll.u32 (%p66_p3), %s132_s20, 9 }
  0x14   : > { %s1364_s25 = scalar_lea.vmem (%p66_p3), %s1622_s1, %s1208_s21  ;;  %s1369_s26 = scalar_lea.vmem (%p66_p3), [#allocation2], %s1124_s22 }
  0x15   : > { %v150_v0 = vld [vmem:[%s1364_s25] sm:$0xff] (%p66_p3)  ;;  %v152_v1 = vld [vmem:[%s1364_s25 + $0x8] sm:$0xff] (%p66_p3)  ;;  %v154_v2 = vld [vmem:[%s1364_s25 + $0x10] sm:$0xff] (%p66_p3) }
  0x16   : > { %151 = vst [vmem:[%s1369_s26] sm:$0xff] (%p66_p3), %v150_v0  ;;  %153 = vst [vmem:[%s1369_s26 + $0x8] sm:$0xff] (%p66_p3), %v152_v1  ;;  %v156_v3 = vld [vmem:[%s1364_s25 + $0x18] sm:$0xff] (%p66_p3)  ;;  %v158_v4 = vld [vmem:[%s1364_s25 + $0x40] sm:$0xff] (%p66_p3) }
  0x17   : > { %155 = vst [vmem:[%s1369_s26 + $0x10] sm:$0xff] (%p66_p3), %v154_v2  ;;  %v160_v5 = vld [vmem:[%s1364_s25 + $0x48] sm:$0xff] (%p66_p3)  ;;  %157 = vst [vmem:[%s1369_s26 + $0x18] sm:$0xff] (%p66_p3), %v156_v3  ;;  %v162_v6 = vld [vmem:[%s1364_s25 + $0x50] sm:$0xff] (%p66_p3) }
  0x18   : > { %159 = vst [vmem:[%s1369_s26 + $0x20] sm:$0xff] (%p66_p3), %v158_v4  ;;  %161 = vst [vmem:[%s1369_s26 + $0x28] sm:$0xff] (%p66_p3), %v160_v5  ;;  %v164_v7 = vld [vmem:[%s1364_s25 + $0x58] sm:$0xff] (%p66_p3)  ;;  %v166_v8 = vld [vmem:[%s1364_s25 + $0x80] sm:$0xff] (%p66_p3) }
  0x19   : > { %163 = vst [vmem:[%s1369_s26 + $0x30] sm:$0xff] %v162_v6  ;;  %165 = vst [vmem:[%s1369_s26 + $0x38] sm:$0xff] %v164_v7  ;;  %v168_v9 = vld [vmem:[%s1364_s25 + $0x88] sm:$0xff]  ;;  %v170_v10 = vld [vmem:[%s1364_s25 + $0x90] sm:$0xff] }
  0x1a   : > { %167 = vst [vmem:[%s1369_s26 + $0x40] sm:$0xff] %v166_v8  ;;  %v172_v11 = vld [vmem:[%s1364_s25 + $0x98] sm:$0xff]  ;;  %169 = vst [vmem:[%s1369_s26 + $0x48] sm:$0xff] %v168_v9  ;;  %v174_v12 = vld [vmem:[%s1364_s25 + $0xc0] sm:$0xff] }
  0x1b   : > { %171 = vst [vmem:[%s1369_s26 + $0x50] sm:$0xff] %v170_v10  ;;  %173 = vst [vmem:[%s1369_s26 + $0x58] sm:$0xff] %v172_v11  ;;  %v176_v13 = vld [vmem:[%s1364_s25 + $0xc8] sm:$0xff]  ;;  %v178_v14 = vld [vmem:[%s1364_s25 + $0xd0] sm:$0xff] }
  0x1c   : > { %175 = vst [vmem:[%s1369_s26 + $0x60] sm:$0xff] %v174_v12  ;;  %177 = vst [vmem:[%s1369_s26 + $0x68] sm:$0xff] %v176_v13  ;;  %v180_v15 = vld [vmem:[%s1364_s25 + $0xd8] sm:$0xff]  ;;  %v182_v16 = vld [vmem:[%s1364_s25 + $0x100] sm:$0xff] }
  0x1d   : > { %179 = vst [vmem:[%s1369_s26 + $0x70] sm:$0xff] %v178_v14  ;;  %v184_v17 = vld [vmem:[%s1364_s25 + $0x108] sm:$0xff]  ;;  %181 = vst [vmem:[%s1369_s26 + $0x78] sm:$0xff] %v180_v15  ;;  %v186_v18 = vld [vmem:[%s1364_s25 + $0x110] sm:$0xff] }
  0x1e   : > { %183 = vst [vmem:[%s1369_s26 + $0x80] sm:$0xff] %v182_v16  ;;  %185 = vst [vmem:[%s1369_s26 + $0x88] sm:$0xff] %v184_v17  ;;  %v188_v19 = vld [vmem:[%s1364_s25 + $0x118] sm:$0xff]  ;;  %v190_v20 = vld [vmem:[%s1364_s25 + $0x140] sm:$0xff] }
  0x1f   : > { %187 = vst [vmem:[%s1369_s26 + $0x90] sm:$0xff] %v186_v18  ;;  %189 = vst [vmem:[%s1369_s26 + $0x98] sm:$0xff] %v188_v19  ;;  %v192_v21 = vld [vmem:[%s1364_s25 + $0x148] sm:$0xff]  ;;  %v194_v22 = vld [vmem:[%s1364_s25 + $0x150] sm:$0xff] }
  0x20   : > { %191 = vst [vmem:[%s1369_s26 + $0xa0] sm:$0xff] %v190_v20  ;;  %v196_v23 = vld [vmem:[%s1364_s25 + $0x158] sm:$0xff]  ;;  %193 = vst [vmem:[%s1369_s26 + $0xa8] sm:$0xff] %v192_v21  ;;  %v198_v24 = vld [vmem:[%s1364_s25 + $0x180] sm:$0xff] }
  0x21   : > { %195 = vst [vmem:[%s1369_s26 + $0xb0] sm:$0xff] %v194_v22  ;;  %197 = vst [vmem:[%s1369_s26 + $0xb8] sm:$0xff] %v196_v23  ;;  %v200_v25 = vld [vmem:[%s1364_s25 + $0x188] sm:$0xff]  ;;  %v202_v26 = vld [vmem:[%s1364_s25 + $0x190] sm:$0xff] }
  0x22   : > { %199 = vst [vmem:[%s1369_s26 + $0xc0] sm:$0xff] %v198_v24  ;;  %201 = vst [vmem:[%s1369_s26 + $0xc8] sm:$0xff] %v200_v25  ;;  %v204_v27 = vld [vmem:[%s1364_s25 + $0x198] sm:$0xff]  ;;  %v206_v28 = vld [vmem:[%s1364_s25 + $0x1c0] sm:$0xff] }
  0x23   : > { %203 = vst [vmem:[%s1369_s26 + $0xd0] sm:$0xff] %v202_v26  ;;  %v208_v29 = vld [vmem:[%s1364_s25 + $0x1c8] sm:$0xff]  ;;  %205 = vst [vmem:[%s1369_s26 + $0xd8] sm:$0xff] %v204_v27  ;;  %v210_v30 = vld [vmem:[%s1364_s25 + $0x1d0] sm:$0xff] }
  0x24   : > { %207 = vst [vmem:[%s1369_s26 + $0xe0] sm:$0xff] %v206_v28  ;;  %209 = vst [vmem:[%s1369_s26 + $0xe8] sm:$0xff] %v208_v29  ;;  %v212_v31 = vld [vmem:[%s1364_s25 + $0x1d8] sm:$0xff]  ;;  %v214_v32 = vld [vmem:[%s1364_s25 + $0x200] sm:$0xff] }
  0x25   : > { %211 = vst [vmem:[%s1369_s26 + $0xf0] sm:$0xff] %v210_v30  ;;  %213 = vst [vmem:[%s1369_s26 + $0xf8] sm:$0xff] %v212_v31  ;;  %v216_v33 = vld [vmem:[%s1364_s25 + $0x208] sm:$0xff]  ;;  %v218_v34 = vld [vmem:[%s1364_s25 + $0x210] sm:$0xff] }
  0x26   : > { %215 = vst [vmem:[%s1369_s26 + $0x100] sm:$0xff] %v214_v32  ;;  %v220_v35 = vld [vmem:[%s1364_s25 + $0x218] sm:$0xff]  ;;  %217 = vst [vmem:[%s1369_s26 + $0x108] sm:$0xff] %v216_v33  ;;  %v222_v36 = vld [vmem:[%s1364_s25 + $0x240] sm:$0xff] }
  0x27   : > { %219 = vst [vmem:[%s1369_s26 + $0x110] sm:$0xff] %v218_v34  ;;  %221 = vst [vmem:[%s1369_s26 + $0x118] sm:$0xff] %v220_v35  ;;  %v224_v37 = vld [vmem:[%s1364_s25 + $0x248] sm:$0xff]  ;;  %v226_v38 = vld [vmem:[%s1364_s25 + $0x250] sm:$0xff] }
  0x28   : > { %223 = vst [vmem:[%s1369_s26 + $0x120] sm:$0xff] %v222_v36  ;;  %225 = vst [vmem:[%s1369_s26 + $0x128] sm:$0xff] %v224_v37  ;;  %v228_v39 = vld [vmem:[%s1364_s25 + $0x258] sm:$0xff]  ;;  %v230_v40 = vld [vmem:[%s1364_s25 + $0x280] sm:$0xff] }
  0x29   : > { %227 = vst [vmem:[%s1369_s26 + $0x130] sm:$0xff] %v226_v38  ;;  %v232_v41 = vld [vmem:[%s1364_s25 + $0x288] sm:$0xff]  ;;  %229 = vst [vmem:[%s1369_s26 + $0x138] sm:$0xff] %v228_v39  ;;  %v234_v42 = vld [vmem:[%s1364_s25 + $0x290] sm:$0xff] }
  0x2a   : > { %231 = vst [vmem:[%s1369_s26 + $0x140] sm:$0xff] %v230_v40  ;;  %233 = vst [vmem:[%s1369_s26 + $0x148] sm:$0xff] %v232_v41  ;;  %v236_v43 = vld [vmem:[%s1364_s25 + $0x298] sm:$0xff]  ;;  %v238_v44 = vld [vmem:[%s1364_s25 + $0x2c0] sm:$0xff] }
  0x2b   : > { %235 = vst [vmem:[%s1369_s26 + $0x150] sm:$0xff] %v234_v42  ;;  %237 = vst [vmem:[%s1369_s26 + $0x158] sm:$0xff] %v236_v43  ;;  %v240_v45 = vld [vmem:[%s1364_s25 + $0x2c8] sm:$0xff]  ;;  %v242_v46 = vld [vmem:[%s1364_s25 + $0x2d0] sm:$0xff] }
  0x2c   : > { %239 = vst [vmem:[%s1369_s26 + $0x160] sm:$0xff] %v238_v44  ;;  %v244_v47 = vld [vmem:[%s1364_s25 + $0x2d8] sm:$0xff]  ;;  %241 = vst [vmem:[%s1369_s26 + $0x168] sm:$0xff] %v240_v45  ;;  %v246_v48 = vld [vmem:[%s1364_s25 + $0x300] sm:$0xff] }
  0x2d   : > { %243 = vst [vmem:[%s1369_s26 + $0x170] sm:$0xff] %v242_v46  ;;  %245 = vst [vmem:[%s1369_s26 + $0x178] sm:$0xff] %v244_v47  ;;  %v248_v49 = vld [vmem:[%s1364_s25 + $0x308] sm:$0xff]  ;;  %v250_v50 = vld [vmem:[%s1364_s25 + $0x310] sm:$0xff] }
  0x2e   : > { %247 = vst [vmem:[%s1369_s26 + $0x180] sm:$0xff] %v246_v48  ;;  %249 = vst [vmem:[%s1369_s26 + $0x188] sm:$0xff] %v248_v49  ;;  %v252_v51 = vld [vmem:[%s1364_s25 + $0x318] sm:$0xff]  ;;  %v254_v52 = vld [vmem:[%s1364_s25 + $0x340] sm:$0xff] }
  0x2f   : > { %251 = vst [vmem:[%s1369_s26 + $0x190] sm:$0xff] %v250_v50  ;;  %v256_v53 = vld [vmem:[%s1364_s25 + $0x348] sm:$0xff]  ;;  %253 = vst [vmem:[%s1369_s26 + $0x198] sm:$0xff] %v252_v51  ;;  %v258_v54 = vld [vmem:[%s1364_s25 + $0x350] sm:$0xff] }
  0x30   : > { %255 = vst [vmem:[%s1369_s26 + $0x1a0] sm:$0xff] %v254_v52  ;;  %257 = vst [vmem:[%s1369_s26 + $0x1a8] sm:$0xff] %v256_v53  ;;  %v260_v55 = vld [vmem:[%s1364_s25 + $0x358] sm:$0xff]  ;;  %v262_v56 = vld [vmem:[%s1364_s25 + $0x380] sm:$0xff] }
  0x31   : > { %259 = vst [vmem:[%s1369_s26 + $0x1b0] sm:$0xff] %v258_v54  ;;  %261 = vst [vmem:[%s1369_s26 + $0x1b8] sm:$0xff] %v260_v55  ;;  %v264_v57 = vld [vmem:[%s1364_s25 + $0x388] sm:$0xff]  ;;  %v266_v58 = vld [vmem:[%s1364_s25 + $0x390] sm:$0xff] }
  0x32   : > { %263 = vst [vmem:[%s1369_s26 + $0x1c0] sm:$0xff] %v262_v56  ;;  %v268_v59 = vld [vmem:[%s1364_s25 + $0x398] sm:$0xff]  ;;  %265 = vst [vmem:[%s1369_s26 + $0x1c8] sm:$0xff] %v264_v57  ;;  %v270_v60 = vld [vmem:[%s1364_s25 + $0x3c0] sm:$0xff] }
  0x33   : > { %267 = vst [vmem:[%s1369_s26 + $0x1d0] sm:$0xff] %v266_v58  ;;  %269 = vst [vmem:[%s1369_s26 + $0x1d8] sm:$0xff] %v268_v59  ;;  %v272_v61 = vld [vmem:[%s1364_s25 + $0x3c8] sm:$0xff]  ;;  %v274_v62 = vld [vmem:[%s1364_s25 + $0x3d0] sm:$0xff] }
  0x34   : > { %271 = vst [vmem:[%s1369_s26 + $0x1e0] sm:$0xff] %v270_v60  ;;  %273 = vst [vmem:[%s1369_s26 + $0x1e8] sm:$0xff] %v272_v61  ;;  %v276_v63 = vld [vmem:[%s1364_s25 + $0x3d8] sm:$0xff] }
  0x35   : > { %275 = vst [vmem:[%s1369_s26 + $0x1f0] sm:$0xff] %v274_v62  ;;  %277 = vst [vmem:[%s1369_s26 + $0x1f8] sm:$0xff] %v276_v63 }
  0x36 PF: > { %p1127_p8 = scmp.ge.s32.totalorder %s1298_s13, 1  ;;  %p282_p9 = scmp.lt.s32.totalorder %s1298_s13, 3 }
  0x38   : > { %p283_p10 = pnand %p1127_p8, %p282_p9 }
  0x39   : > { %s289_s27 = sand.u32 (!%p283_p10), 1, %s1282_s9   ;;  %v1300_v0 = vmov (!%p283_p10), 0  }
  0x3a   : > { %286 = sbr.rel (%p283_p10) target bundleno = 360 (0x168), region = 47  ;;  %s1128_s28 = sshll.u32 (!%p283_p10), %s289_s27, 9  ;;  %748 = vmatprep.mubr.bf16.mxu0 (!%p283_p10), %v1300_v0  ;;  %791 = vmatprep.mubr.bf16.mxu1 (!%p283_p10), %v1300_v0 }
  0x3b   : > { %s1503_s29 = scalar_lea.vmem (!%p283_p10), [#allocation2], %s1128_s28  ;;  %s1129_s4 = sshll.u32 (!%p283_p10), %s289_s27, 6 }
  0x3c   : > { %v326_v1 = vld [vmem:[%s1503_s29] sm:$0xff] (!%p283_p10)  ;;  %v327_v3 = vld [vmem:[%s1503_s29 + $0x8] sm:$0xff] (!%p283_p10)  ;;  %v328_v63 = vld [vmem:[%s1503_s29 + $0x10] sm:$0xff] (!%p283_p10)  ;;  %s1582_s5 = scalar_lea.vmem (!%p283_p10), [#allocation3], %s1129_s4 }
  0x3d   : > { %v330_v2 = vld [vmem:[%s1503_s29 + $0x20] sm:$0xff] (!%p283_p10)  ;;  %v331_v5 = vld [vmem:[%s1503_s29 + $0x28] sm:$0xff] (!%p283_p10) }
  0x3e   : > { %v1132_v4 = vcombine.high (!%p283_p10), %v326_v1, %v330_v2  ;;  %v1131_v6 = vcombine.low (!%p283_p10), %v326_v1, %v330_v2  ;;  %v334_v7 = vld [vmem:[%s1503_s29 + $0x40] sm:$0xff] (!%p283_p10)  ;;  %v1134_v9 = vcombine.high (!%p283_p10), %v327_v3, %v331_v5  ;;  %v1133_v10 = vcombine.low (!%p283_p10), %v327_v3, %v331_v5  ;;  %v335_v12 = vld [vmem:[%s1503_s29 + $0x48] sm:$0xff] (!%p283_p10)  ;;  %v332_v1 = vld [vmem:[%s1503_s29 + $0x30] sm:$0xff] (!%p283_p10) }
  0x3f   : > { %v338_v8 = vld [vmem:[%s1503_s29 + $0x60] sm:$0xff] (!%p283_p10)  ;;  %v339_v13 = vld [vmem:[%s1503_s29 + $0x68] sm:$0xff] (!%p283_p10)  ;;  %v329_v2 = vld [vmem:[%s1503_s29 + $0x18] sm:$0xff] (!%p283_p10) }
  0x40   : > { %v1140_v11 = vcombine.high (!%p283_p10), %v334_v7, %v338_v8  ;;  %v342_v14 = vld [vmem:[%s1503_s29 + $0x80] sm:$0xff] (!%p283_p10)  ;;  %716 = vmatprep.subr.bf16.mxu0 (!%p283_p10), %v1132_v4  ;;  %v1142_v15 = vcombine.high (!%p283_p10), %v335_v12, %v339_v13  ;;  %v343_v17 = vld [vmem:[%s1503_s29 + $0x88] sm:$0xff] (!%p283_p10)  ;;  %759 = vmatprep.subr.bf16.mxu1 (!%p283_p10), %v1134_v9  ;;  %v1139_v19 = vcombine.low (!%p283_p10), %v334_v7, %v338_v8  ;;  %v333_v3 = vld [vmem:[%s1503_s29 + $0x38] sm:$0xff] (!%p283_p10) }
  0x41   : > { %v346_v16 = vld [vmem:[%s1503_s29 + $0xa0] sm:$0xff]  ;;  %v347_v18 = vld [vmem:[%s1503_s29 + $0xa8] sm:$0xff]  ;;  %717 = vmatpush1.bf16.msra.mxu0 %v1131_v6  ;;  %760 = vmatpush1.bf16.msra.mxu1 %v1133_v10  ;;  %v1141_v20 = vcombine.low %v335_v12, %v339_v13  ;;  %v1136_v6 = vcombine.high %v328_v63, %v332_v1  ;;  %v1138_v7 = vcombine.high %v329_v2, %v333_v3  ;;  %v336_v8 = vld [vmem:[%s1503_s29 + $0x50] sm:$0xff]  ;;  %s1217_s6 = sshll.u32 (%p1351_p6), %s1290_s11, 5 }
  0x42   : > { %718 = vmatprep.subr.bf16.mxu0 %v1140_v11  ;;  %v1148_v21 = vcombine.high %v342_v14, %v346_v16  ;;  %761 = vmatprep.subr.bf16.mxu1 %v1142_v15  ;;  %v1150_v22 = vcombine.high %v343_v17, %v347_v18  ;;  %v350_v23 = vld [vmem:[%s1503_s29 + $0xc0] sm:$0xff]  ;;  %v351_v25 = vld [vmem:[%s1503_s29 + $0xc8] sm:$0xff]  ;;  %v1147_v27 = vcombine.low %v342_v14, %v346_v16  ;;  %v340_v9 = vld [vmem:[%s1503_s29 + $0x70] sm:$0xff]  ;;  %s1004_s9 = scalar_lea.vmem (%p1351_p6), %s1623_s2, %s1217_s6 }
  0x43   : > { %v354_v24 = vld [vmem:[%s1503_s29 + $0xe0] sm:$0xff]  ;;  %v355_v26 = vld [vmem:[%s1503_s29 + $0xe8] sm:$0xff]  ;;  %v1149_v28 = vcombine.low %v343_v17, %v347_v18  ;;  %v337_v11 = vld [vmem:[%s1503_s29 + $0x58] sm:$0xff]  ;;  %v1135_v13 = vcombine.low %v328_v63, %v332_v1  ;;  %v1137_v14 = vcombine.low %v329_v2, %v333_v3  ;;  %v1144_v15 = vcombine.high %v336_v8, %v340_v9 }
  0x44   : > { %v1156_v29 = vcombine.high %v350_v23, %v354_v24  ;;  %v1158_v30 = vcombine.high %v351_v25, %v355_v26  ;;  %v358_v31 = vld [vmem:[%s1503_s29 + $0x100] sm:$0xff]  ;;  %v359_v33 = vld [vmem:[%s1503_s29 + $0x108] sm:$0xff]  ;;  %v1155_v35 = vcombine.low %v350_v23, %v354_v24  ;;  %v1157_v36 = vcombine.low %v351_v25, %v355_v26  ;;  %v341_v12 = vld [vmem:[%s1503_s29 + $0x78] sm:$0xff] }
  0x45   : > { %719 = vmatpush1.bf16.msra.mxu0 %v1139_v19  ;;  %762 = vmatpush1.bf16.msra.mxu1 %v1141_v20  ;;  %v362_v32 = vld [vmem:[%s1503_s29 + $0x120] sm:$0xff]  ;;  %v363_v34 = vld [vmem:[%s1503_s29 + $0x128] sm:$0xff]  ;;  %v1146_v16 = vcombine.high %v337_v11, %v341_v12  ;;  %v344_v17 = vld [vmem:[%s1503_s29 + $0x90] sm:$0xff] }
  0x46   : > { %720 = vmatprep.subr.bf16.mxu0 %v1148_v21  ;;  %763 = vmatprep.subr.bf16.mxu1 %v1150_v22  ;;  %v1164_v37 = vcombine.high %v358_v31, %v362_v32  ;;  %v1166_v38 = vcombine.high %v359_v33, %v363_v34  ;;  %v366_v39 = vld [vmem:[%s1503_s29 + $0x140] sm:$0xff]  ;;  %v367_v41 = vld [vmem:[%s1503_s29 + $0x148] sm:$0xff]  ;;  %v1163_v43 = vcombine.low %v358_v31, %v362_v32  ;;  %v348_v18 = vld [vmem:[%s1503_s29 + $0xb0] sm:$0xff] }
  0x47   : > { %v370_v40 = vld [vmem:[%s1503_s29 + $0x160] sm:$0xff]  ;;  %v371_v42 = vld [vmem:[%s1503_s29 + $0x168] sm:$0xff]  ;;  %v1165_v44 = vcombine.low %v359_v33, %v363_v34  ;;  %v345_v19 = vld [vmem:[%s1503_s29 + $0x98] sm:$0xff]  ;;  %v1143_v21 = vcombine.low %v336_v8, %v340_v9  ;;  %v1145_v22 = vcombine.low %v337_v11, %v341_v12  ;;  %v1152_v23 = vcombine.high %v344_v17, %v348_v18 }
  0x48   : > { %v1172_v45 = vcombine.high %v366_v39, %v370_v40  ;;  %v1174_v46 = vcombine.high %v367_v41, %v371_v42  ;;  %v374_v47 = vld [vmem:[%s1503_s29 + $0x180] sm:$0xff]  ;;  %v375_v49 = vld [vmem:[%s1503_s29 + $0x188] sm:$0xff]  ;;  %v1171_v51 = vcombine.low %v366_v39, %v370_v40  ;;  %v1173_v52 = vcombine.low %v367_v41, %v371_v42  ;;  %v349_v20 = vld [vmem:[%s1503_s29 + $0xb8] sm:$0xff] }
  0x49   : > { %721 = vmatpush1.bf16.msra.mxu0 %v1147_v27  ;;  %764 = vmatpush1.bf16.msra.mxu1 %v1149_v28  ;;  %v378_v48 = vld [vmem:[%s1503_s29 + $0x1a0] sm:$0xff]  ;;  %v379_v50 = vld [vmem:[%s1503_s29 + $0x1a8] sm:$0xff]  ;;  %v1154_v24 = vcombine.high %v345_v19, %v349_v20  ;;  %v352_v25 = vld [vmem:[%s1503_s29 + $0xd0] sm:$0xff] }
  0x4a   : > { %722 = vmatprep.subr.bf16.mxu0 %v1156_v29  ;;  %765 = vmatprep.subr.bf16.mxu1 %v1158_v30  ;;  %v1180_v53 = vcombine.high %v374_v47, %v378_v48  ;;  %v1182_v54 = vcombine.high %v375_v49, %v379_v50  ;;  %v382_v55 = vld [vmem:[%s1503_s29 + $0x1c0] sm:$0xff]  ;;  %v383_v57 = vld [vmem:[%s1503_s29 + $0x1c8] sm:$0xff]  ;;  %v1179_v59 = vcombine.low %v374_v47, %v378_v48  ;;  %v356_v26 = vld [vmem:[%s1503_s29 + $0xf0] sm:$0xff] }
  0x4b   : > { %v386_v56 = vld [vmem:[%s1503_s29 + $0x1e0] sm:$0xff]  ;;  %v387_v58 = vld [vmem:[%s1503_s29 + $0x1e8] sm:$0xff]  ;;  %v1181_v60 = vcombine.low %v375_v49, %v379_v50  ;;  %v353_v27 = vld [vmem:[%s1503_s29 + $0xd8] sm:$0xff]  ;;  %v1151_v29 = vcombine.low %v344_v17, %v348_v18  ;;  %v1153_v30 = vcombine.low %v345_v19, %v349_v20  ;;  %v1160_v31 = vcombine.high %v352_v25, %v356_v26 }
  0x4c   : > { %v1188_v61 = vcombine.high %v382_v55, %v386_v56  ;;  %v1190_v62 = vcombine.high %v383_v57, %v387_v58  ;;  %v1187_v4 = vcombine.low %v382_v55, %v386_v56  ;;  %v1189_v5 = vcombine.low %v383_v57, %v387_v58  ;;  %v1546_v10 = vld [vmem:[%s1621_s0] sm:$0xff]   ;;  %v357_v28 = vld [vmem:[%s1503_s29 + $0xf8] sm:$0xff]  ;;  %v360_v33 = vld [vmem:[%s1503_s29 + $0x110] sm:$0xff] }
  0x4d   : > { %723 = vmatpush1.bf16.msra.mxu0 %v1155_v35  ;;  %766 = vmatpush1.bf16.msra.mxu1 %v1157_v36  ;;  %v1162_v32 = vcombine.high %v353_v27, %v357_v28  ;;  %v364_v34 = vld [vmem:[%s1503_s29 + $0x130] sm:$0xff]  ;;  %v361_v35 = vld [vmem:[%s1503_s29 + $0x118] sm:$0xff] }
  0x4e   : > { %724 = vmatprep.subr.bf16.mxu0 %v1164_v37  ;;  %767 = vmatprep.subr.bf16.mxu1 %v1166_v38  ;;  %v365_v36 = vld [vmem:[%s1503_s29 + $0x138] sm:$0xff]  ;;  %v1159_v37 = vcombine.low %v352_v25, %v356_v26  ;;  %v1168_v38 = vcombine.high %v360_v33, %v364_v34  ;;  %v368_v40 = vld [vmem:[%s1503_s29 + $0x150] sm:$0xff] }
  0x4f   : > { %v1170_v39 = vcombine.high %v361_v35, %v365_v36  ;;  %v372_v41 = vld [vmem:[%s1503_s29 + $0x170] sm:$0xff]  ;;  %v369_v42 = vld [vmem:[%s1503_s29 + $0x158] sm:$0xff] }
  0x50   : > { %v376_v48 = vld [vmem:[%s1503_s29 + $0x190] sm:$0xff]  ;;  %v377_v50 = vld [vmem:[%s1503_s29 + $0x198] sm:$0xff] }
  0x51   : > { %725 = vmatpush1.bf16.msra.mxu0 %v1163_v43  ;;  %768 = vmatpush1.bf16.msra.mxu1 %v1165_v44  ;;  %v373_v43 = vld [vmem:[%s1503_s29 + $0x178] sm:$0xff]  ;;  %v1167_v44 = vcombine.low %v360_v33, %v364_v34  ;;  %v380_v49 = vld [vmem:[%s1503_s29 + $0x1b0] sm:$0xff] }
  0x52   : > { %726 = vmatprep.subr.bf16.mxu0 %v1172_v45  ;;  %769 = vmatprep.subr.bf16.mxu1 %v1174_v46  ;;  %v1169_v45 = vcombine.low %v361_v35, %v365_v36  ;;  %v1176_v46 = vcombine.high %v368_v40, %v372_v41  ;;  %v1178_v47 = vcombine.high %v369_v42, %v373_v43  ;;  %v384_v56 = vld [vmem:[%s1503_s29 + $0x1d0] sm:$0xff]  ;;  %v385_v58 = vld [vmem:[%s1503_s29 + $0x1d8] sm:$0xff] }
  0x53   : > { %v388_v57 = vld [vmem:[%s1503_s29 + $0x1f0] sm:$0xff] }
  0x54   : > { %v1191_v1 = vcombine.low %v384_v56, %v388_v57 }
  0x55   : > { %727 = vmatpush1.bf16.msra.mxu0 %v1171_v51  ;;  %770 = vmatpush1.bf16.msra.mxu1 %v1173_v52  ;;  %v381_v51 = vld [vmem:[%s1503_s29 + $0x1b8] sm:$0xff]  ;;  %v1175_v52 = vcombine.low %v368_v40, %v372_v41 }
  0x56   : > { %728 = vmatprep.subr.bf16.mxu0 %v1180_v53  ;;  %771 = vmatprep.subr.bf16.mxu1 %v1182_v54  ;;  %v1177_v53 = vcombine.low %v369_v42, %v373_v43  ;;  %v1184_v54 = vcombine.high %v376_v48, %v380_v49  ;;  %v1186_v55 = vcombine.high %v377_v50, %v381_v51 }
  0x59   : > { %729 = vmatpush1.bf16.msra.mxu0 %v1179_v59  ;;  %772 = vmatpush1.bf16.msra.mxu1 %v1181_v60  ;;  %v389_v59 = vld [vmem:[%s1503_s29 + $0x1f8] sm:$0xff]  ;;  %v1183_v60 = vcombine.low %v376_v48, %v380_v49 }
  0x5a   : > { %730 = vmatprep.subr.bf16.mxu0 %v1188_v61  ;;  %773 = vmatprep.subr.bf16.mxu1 %v1190_v62  ;;  %v1185_v61 = vcombine.low %v377_v50, %v381_v51  ;;  %v1192_v62 = vcombine.high %v384_v56, %v388_v57  ;;  %v1194_v63 = vcombine.high %v385_v58, %v389_v59 }
  0x5b   : > { %v1193_v2 = vcombine.low %v385_v58, %v389_v59 }
  0x5d   : > { %731 = vmatpush1.bf16.msra.mxu0 %v1187_v4  ;;  %774 = vmatpush1.bf16.msra.mxu1 %v1189_v5 }
  0x5e   : > { %802 = vmatprep.subr.bf16.mxu0 %v1136_v6  ;;  %845 = vmatprep.subr.bf16.mxu1 %v1138_v7 }
  0x60   : > { %749 = vmatmul.mubr.bf16.vlgmr.msra.gmra.mrb[0].mxu0 %v1546_v10  ;;  %792 = vmatmul.mubr.bf16.vlgmr.msra.gmra.mrb[0].mxu1 %v1546_v10 }
  0x61   : > { %803 = vmatpush1.bf16.msra.mxu0 %v1135_v13  ;;  %846 = vmatpush1.bf16.msra.mxu1 %v1137_v14 }
  0x62   : > { %804 = vmatprep.subr.bf16.mxu0 %v1144_v15  ;;  %847 = vmatprep.subr.bf16.mxu1 %v1146_v16 }
  0x63   : > { %834 = vmatprep.mubr.bf16.mxu0 %v1300_v0  ;;  %877 = vmatprep.mubr.bf16.mxu1 %v1300_v0  ;;  %v1161_v0 = vcombine.low %v353_v27, %v357_v28 }
  0x65   : > { %805 = vmatpush1.bf16.msra.mxu0 %v1143_v21  ;;  %848 = vmatpush1.bf16.msra.mxu1 %v1145_v22 }
  0x66   : > { %806 = vmatprep.subr.bf16.mxu0 %v1152_v23  ;;  %849 = vmatprep.subr.bf16.mxu1 %v1154_v24 }
  0x69   : > { %807 = vmatpush1.bf16.msra.mxu0 %v1151_v29  ;;  %850 = vmatpush1.bf16.msra.mxu1 %v1153_v30 }
  0x6a   : > { %808 = vmatprep.subr.bf16.mxu0 %v1160_v31  ;;  %851 = vmatprep.subr.bf16.mxu1 %v1162_v32 }
  0x6d   : > { %809 = vmatpush1.bf16.msra.mxu0 %v1159_v37  ;;  %852 = vmatpush1.bf16.msra.mxu1 %v1161_v0 }
  0x6e   : > { %810 = vmatprep.subr.bf16.mxu0 %v1168_v38  ;;  %853 = vmatprep.subr.bf16.mxu1 %v1170_v39 }
  0x71   : > { %811 = vmatpush1.bf16.msra.mxu0 %v1167_v44  ;;  %854 = vmatpush1.bf16.msra.mxu1 %v1169_v45 }
  0x72   : > { %812 = vmatprep.subr.bf16.mxu0 %v1176_v46  ;;  %855 = vmatprep.subr.bf16.mxu1 %v1178_v47 }
  0x75   : > { %813 = vmatpush1.bf16.msra.mxu0 %v1175_v52  ;;  %856 = vmatpush1.bf16.msra.mxu1 %v1177_v53 }
  0x76   : > { %814 = vmatprep.subr.bf16.mxu0 %v1184_v54  ;;  %857 = vmatprep.subr.bf16.mxu1 %v1186_v55 }
  0x79   : > { %815 = vmatpush1.bf16.msra.mxu0 %v1183_v60  ;;  %858 = vmatpush1.bf16.msra.mxu1 %v1185_v61 }
  0x7a   : > { %816 = vmatprep.subr.bf16.mxu0 %v1192_v62  ;;  %859 = vmatprep.subr.bf16.mxu1 %v1194_v63 }
  0x7d   : > { %817 = vmatpush1.bf16.msra.mxu0 %v1191_v1  ;;  %860 = vmatpush1.bf16.msra.mxu1 %v1193_v2 }
  0x80   : > { %835 = vmatmul.mubr.bf16.vlgmr.msra.gmra.mrb[4].mxu0 %v1546_v10  ;;  %878 = vmatmul.mubr.bf16.vlgmr.msra.gmra.mrb[4].mxu1 %v1546_v10 }
 0x133   : > { %v750_v3 = vpop.f32.mrb[0].mxu0  ;;  %v793_v5 = vpop.f32.mrb[0].mxu1 }
 0x134   : > { %vm888_vm0 = vcmp.ge.f32.partialorder %v750_v3, 0.0  ;;  %v904_v4 = vmul.f32 0.2, %v750_v3  ;;  %v752_v6 = vpop.f32.mrb[1].mxu0  ;;  %vm890_vm1 = vcmp.ge.f32.partialorder %v793_v5, 0.0  ;;  %v795_v11 = vpop.f32.mrb[1].mxu1 }
 0x135   : > { %v906_v7 = vmul.f32 0.2, %v793_v5  ;;  %vm889_vm2 = vcmp.ge.f32.partialorder %v752_v6, 0.0  ;;  %v905_v8 = vmul.f32 0.2, %v752_v6  ;;  %v754_v12 = vpop.f32.mrb[2].mxu0 }
 0x136   : > { %v920_v9 = vsel %vm888_vm0, %v750_v3, %v904_v4  ;;  %vm891_vm3 = vcmp.ge.f32.partialorder %v795_v11, 0.0  ;;  %v907_v15 = vmul.f32 0.2, %v795_v11  ;;  %v797_v16 = vpop.f32.mrb[2].mxu1  ;;  %v756_v10 = vpop.f32.mrb[3].mxu0  ;;  %vm896_vm4 = vcmp.ge.f32.partialorder %v754_v12, 0.0 }
 0x137   : > { %v922_v13 = vsel %vm890_vm1, %v793_v5, %v906_v7  ;;  %v921_v14 = vsel %vm889_vm2, %v752_v6, %v905_v8  ;;  %v912_v18 = vmul.f32 0.2, %v754_v12  ;;  %vm898_vm5 = vcmp.ge.f32.partialorder %v797_v16, 0.0  ;;  %v799_v19 = vpop.f32.mrb[3].mxu1 }
 0x138   : > { %v1209_v17 = vpack.c.bf16 %v921_v14, %v920_v9  ;;  %v923_v20 = vsel %vm891_vm3, %v795_v11, %v907_v15  ;;  %v914_v21 = vmul.f32 0.2, %v797_v16  ;;  %vm897_vm6 = vcmp.ge.f32.partialorder %v756_v10, 0.0 }
 0x139   : > { %v913_v22 = vmul.f32 0.2, %v756_v10  ;;  %v1210_v23 = vpack.c.bf16 %v923_v20, %v922_v13  ;;  %v928_v24 = vsel %vm896_vm4, %v754_v12, %v912_v18  ;;  %vm899_vm7 = vcmp.ge.f32.partialorder %v799_v19, 0.0 }
 0x13a   : > { %984 = vst [vmem:[%s1582_s5] sm:$0xff] %v1209_v17  ;;  %v915_v25 = vmul.f32 0.2, %v799_v19  ;;  %v930_v26 = vsel %vm898_vm5, %v797_v16, %v914_v21 }
 0x13b   : > { %v929_v27 = vsel %vm897_vm6, %v756_v10, %v913_v22  ;;  %985 = vst [vmem:[%s1582_s5 + $0x8] sm:$0xff] %v1210_v23 }
 0x13c   : > { %v1213_v28 = vpack.c.bf16 %v929_v27, %v928_v24  ;;  %v931_v29 = vsel %vm899_vm7, %v799_v19, %v915_v25 }
 0x13d   : > { %v1214_v30 = vpack.c.bf16 %v931_v29, %v930_v26 }
 0x13e   : > { %988 = vst [vmem:[%s1582_s5 + $0x20] sm:$0xff] %v1213_v28 }
 0x13f   : > { %989 = vst [vmem:[%s1582_s5 + $0x28] sm:$0xff] %v1214_v30 }
 0x141   : > { %v1017_v58 = vld [vmem:[%s1582_s5] sm:$0xff] (%p1351_p6) }
 0x142   : > { %v1019_v59 = vld [vmem:[%s1582_s5 + $0x8] sm:$0xff] (%p1351_p6)  ;;  %1018 = vst [vmem:[%s1004_s9] sm:$0xff] (%p1351_p6), %v1017_v58 }
 0x143   : > { %1020 = vst [vmem:[%s1004_s9 + $0x8] sm:$0xff] (%p1351_p6), %v1019_v59 }
 0x145   : > { %v1025_v62 = vld [vmem:[%s1582_s5 + $0x20] sm:$0xff] (%p1351_p6) }
 0x146   : > { %v1027_v63 = vld [vmem:[%s1582_s5 + $0x28] sm:$0xff] (%p1351_p6)  ;;  %1026 = vst [vmem:[%s1004_s9 + $0x40] sm:$0xff] (%p1351_p6), %v1025_v62 }
 0x147   : > { %1028 = vst [vmem:[%s1004_s9 + $0x48] sm:$0xff] (%p1351_p6), %v1027_v63 }
 0x153   : > { %v836_v31 = vpop.f32.mrb[4].mxu0  ;;  %v879_v33 = vpop.f32.mrb[4].mxu1 }
 0x154   : > { %vm892_vm8 = vcmp.ge.f32.partialorder %v836_v31, 0.0  ;;  %v908_v32 = vmul.f32 0.2, %v836_v31  ;;  %v838_v34 = vpop.f32.mrb[5].mxu0  ;;  %vm894_vm9 = vcmp.ge.f32.partialorder %v879_v33, 0.0  ;;  %v881_v0 = vpop.f32.mrb[5].mxu1 }
 0x155   : > { %v910_v35 = vmul.f32 0.2, %v879_v33  ;;  %vm893_vm10 = vcmp.ge.f32.partialorder %v838_v34, 0.0  ;;  %v909_v36 = vmul.f32 0.2, %v838_v34  ;;  %v840_v38 = vpop.f32.mrb[6].mxu0 }
 0x156   : > { %v924_v37 = vsel %vm892_vm8, %v836_v31, %v908_v32  ;;  %vm895_vm11 = vcmp.ge.f32.partialorder %v881_v0, 0.0  ;;  %v911_v41 = vmul.f32 0.2, %v881_v0  ;;  %v883_v42 = vpop.f32.mrb[6].mxu1  ;;  %v842_v43 = vpop.f32.mrb[7].mxu0  ;;  %vm900_vm12 = vcmp.ge.f32.partialorder %v840_v38, 0.0 }
 0x157   : > { %v926_v39 = vsel %vm894_vm9, %v879_v33, %v910_v35  ;;  %v925_v40 = vsel %vm893_vm10, %v838_v34, %v909_v36  ;;  %v916_v45 = vmul.f32 0.2, %v840_v38  ;;  %vm902_vm13 = vcmp.ge.f32.partialorder %v883_v42, 0.0  ;;  %v885_v46 = vpop.f32.mrb[7].mxu1 }
 0x158   : > { %v1211_v44 = vpack.c.bf16 %v925_v40, %v924_v37  ;;  %v927_v47 = vsel %vm895_vm11, %v881_v0, %v911_v41  ;;  %v918_v48 = vmul.f32 0.2, %v883_v42  ;;  %vm901_vm14 = vcmp.ge.f32.partialorder %v842_v43, 0.0 }
 0x159   : > { %v917_v49 = vmul.f32 0.2, %v842_v43  ;;  %v1212_v50 = vpack.c.bf16 %v927_v47, %v926_v39  ;;  %v932_v51 = vsel %vm900_vm12, %v840_v38, %v916_v45  ;;  %vm903_vm15 = vcmp.ge.f32.partialorder %v885_v46, 0.0  ;;  %998 = sbr.rel (!%p1351_p6) target bundleno = 360 (0x168), region = 55 }
 0x15a   : > { %986 = vst [vmem:[%s1582_s5 + $0x10] sm:$0xff] %v1211_v44  ;;  %v919_v52 = vmul.f32 0.2, %v885_v46  ;;  %v934_v53 = vsel %vm902_vm13, %v883_v42, %v918_v48 }
 0x15b   : > { %v933_v54 = vsel %vm901_vm14, %v842_v43, %v917_v49  ;;  %987 = vst [vmem:[%s1582_s5 + $0x18] sm:$0xff] %v1212_v50 }
 0x15c   : > { %v1215_v55 = vpack.c.bf16 %v933_v54, %v932_v51  ;;  %v935_v56 = vsel %vm903_vm15, %v885_v46, %v919_v52 }
 0x15d   : > { %v1216_v57 = vpack.c.bf16 %v935_v56, %v934_v53 }
 0x15e   : > { %990 = vst [vmem:[%s1582_s5 + $0x30] sm:$0xff] %v1215_v55 }
 0x15f   : > { %991 = vst [vmem:[%s1582_s5 + $0x38] sm:$0xff] %v1216_v57 }
 0x161   : > { %v1021_v60 = vld [vmem:[%s1582_s5 + $0x10] sm:$0xff] }
 0x162   : > { %v1023_v61 = vld [vmem:[%s1582_s5 + $0x18] sm:$0xff]  ;;  %1022 = vst [vmem:[%s1004_s9 + $0x10] sm:$0xff] %v1021_v60 }
 0x163   : > { %1024 = vst [vmem:[%s1004_s9 + $0x18] sm:$0xff] %v1023_v61 }
 0x165   : > { %v1029_v1 = vld [vmem:[%s1582_s5 + $0x30] sm:$0xff] }
 0x166   : > { %v1031_v2 = vld [vmem:[%s1582_s5 + $0x38] sm:$0xff]  ;;  %1030 = vst [vmem:[%s1004_s9 + $0x50] sm:$0xff] %v1029_v1 }
 0x167   : > { %1032 = vst [vmem:[%s1004_s9 + $0x58] sm:$0xff] %v1031_v2 }
 0x168 PF: > { %s12_s13 = sadd.s32 1, %s1298_s13   ;;  %s1625_s9 = smov %s1286_s10 }
 0x169   : > { %p9_p11 = scmp.ge.s32.totalorder %s12_s13, 4   ;;  %s1626_s10 = smov %s1356_s19 }
 0x16a   : > { %s1627_s11 = smov %s1294_s12  ;;  %s1628_s12 = smov %s1630_s14 }
 0x16b   :  { %11 = sbr.rel (!%p9_p11) target bundleno = 3 (0x3), region = 112 }

// kernel: discriminator_forward.9
= control target key start
LH: loop header
LB: loop body
LE: loop exit
PB: predicated region body
PF: predicated region fallthrough
CT: control target
= control target key end

     0   :  { %s1043_s9 = smov 0   ;;  %s1045_s10 = smov 0   ;;  %s1233_s0 = inlined_call_operand.vmem [shape: bf16[32,256], index: 0, kind: input, shape index: {}]   ;;  %s1234_s1 = inlined_call_operand.vmem [shape: bf16[256,512], index: 1, kind: input, shape index: {}]   ;;  %s1235_s2 = inlined_call_operand.vmem [shape: bf16[32,512], index: 2, kind: output, shape index: {}]  }
   0x1   :  { %s1047_s11 = smov 0   ;;  %s1049_s12 = smov 0  }
   0x2   :  { %s1051_s13 = smov 0  }
   0x3 LB: > { %s21_s14 = sadd.s32 1, %s1022_s12  ;;  %s800_s15 = sadd.s32 4294967295, %s1026_s13   ;;  %s1026_s13 = sphi %s1051_s13, %s12_s13   ;;  %s1022_s12 = sphi %s1049_s12, %s1240_s12   ;;  %s1018_s11 = sphi %s1047_s11, %s1239_s11   ;;  %s1014_s10 = sphi %s1045_s10, %s1238_s10   ;;  %s1010_s9 = sphi %s1043_s9, %s1237_s9  }
   0x4   : > { %p22_p0 = scmp.ge.s32.totalorder %s21_s14, 2  ;;  %p64_p1 = scmp.ne.s32.totalorder %s1014_s10, %s1010_s9 }
   0x5   : > { %p65_p2 = scmp.eq.s32.totalorder %s1026_s13, 0  ;;  %p96_p4 = scmp.eq.s32.totalorder %s800_s15, 1 }
   0x6   : > { %s1242_s14 = smov (%p22_p0, %s21_s14), 0  ;;  %s57_s17 = sadd.s32 1, %s1014_s10 }
   0x7   : > { %p66_p3 = por %p65_p2, %p64_p1  ;;  %s54_s16 = ssub.s32 %s1022_s12, %s1242_s14 }
   0x8   : > { %p55_p5 = scmp.eq.s32.totalorder %s54_s16, 0  ;;  %p1078_p6 = por %p96_p4, %p64_p1 }
   0x9   : > { %p804_p7 = scmp.ge.s32.totalorder %s1026_s13, 2 }
   0xa   : > { %s1083_s19 = scalar_select %p55_p5, %s1014_s10, %s57_s17  }
   0xb   : > { %128 = sbr.rel (%p804_p7) target bundleno = 38 (0x26), region = 20 }
  0x12   : > { %131 = sbr.rel (!%p66_p3) target bundleno = 38 (0x26), region = 24  ;;  %s133_s20 = sand.u32 (%p66_p3), 1, %s1014_s10  }
  0x13   : > { %s856_s21 = sshll.u32 (%p66_p3), %s1022_s12, 3  ;;  %s805_s22 = sshll.u32 (%p66_p3), %s133_s20, 8 }
  0x14   : > { %s1091_s25 = scalar_lea.vmem (%p66_p3), %s1234_s1, %s856_s21  ;;  %s1096_s26 = scalar_lea.vmem (%p66_p3), [#allocation2], %s805_s22 }
  0x15   : > { %v228_v0 = vld [vmem:[%s1091_s25] sm:$0xff] (%p66_p3)  ;;  %v230_v1 = vld [vmem:[%s1091_s25 + $0x10] sm:$0xff] (%p66_p3) }
  0x16   : > { %v232_v2 = vld [vmem:[%s1091_s25 + $0x20] sm:$0xff] (%p66_p3)  ;;  %229 = vst [vmem:[%s1096_s26] sm:$0xff] (%p66_p3), %v228_v0  ;;  %231 = vst [vmem:[%s1096_s26 + $0x8] sm:$0xff] (%p66_p3), %v230_v1  ;;  %v234_v3 = vld [vmem:[%s1091_s25 + $0x30] sm:$0xff] (%p66_p3) }
  0x17   : > { %233 = vst [vmem:[%s1096_s26 + $0x10] sm:$0xff] (%p66_p3), %v232_v2  ;;  %v236_v4 = vld [vmem:[%s1091_s25 + $0x40] sm:$0xff] (%p66_p3)  ;;  %v238_v5 = vld [vmem:[%s1091_s25 + $0x50] sm:$0xff] (%p66_p3)  ;;  %235 = vst [vmem:[%s1096_s26 + $0x18] sm:$0xff] (%p66_p3), %v234_v3 }
  0x18   : > { %237 = vst [vmem:[%s1096_s26 + $0x20] sm:$0xff] (%p66_p3), %v236_v4  ;;  %239 = vst [vmem:[%s1096_s26 + $0x28] sm:$0xff] (%p66_p3), %v238_v5  ;;  %v240_v6 = vld [vmem:[%s1091_s25 + $0x60] sm:$0xff] (%p66_p3)  ;;  %v242_v7 = vld [vmem:[%s1091_s25 + $0x70] sm:$0xff] (%p66_p3) }
  0x19   : > { %v244_v8 = vld [vmem:[%s1091_s25 + $0x80] sm:$0xff]  ;;  %241 = vst [vmem:[%s1096_s26 + $0x30] sm:$0xff] %v240_v6  ;;  %243 = vst [vmem:[%s1096_s26 + $0x38] sm:$0xff] %v242_v7  ;;  %v246_v9 = vld [vmem:[%s1091_s25 + $0x90] sm:$0xff] }
  0x1a   : > { %245 = vst [vmem:[%s1096_s26 + $0x40] sm:$0xff] %v244_v8  ;;  %v248_v10 = vld [vmem:[%s1091_s25 + $0xa0] sm:$0xff]  ;;  %v250_v11 = vld [vmem:[%s1091_s25 + $0xb0] sm:$0xff]  ;;  %247 = vst [vmem:[%s1096_s26 + $0x48] sm:$0xff] %v246_v9 }
  0x1b   : > { %249 = vst [vmem:[%s1096_s26 + $0x50] sm:$0xff] %v248_v10  ;;  %251 = vst [vmem:[%s1096_s26 + $0x58] sm:$0xff] %v250_v11  ;;  %v252_v12 = vld [vmem:[%s1091_s25 + $0xc0] sm:$0xff]  ;;  %v254_v13 = vld [vmem:[%s1091_s25 + $0xd0] sm:$0xff] }
  0x1c   : > { %v256_v14 = vld [vmem:[%s1091_s25 + $0xe0] sm:$0xff]  ;;  %253 = vst [vmem:[%s1096_s26 + $0x60] sm:$0xff] %v252_v12  ;;  %255 = vst [vmem:[%s1096_s26 + $0x68] sm:$0xff] %v254_v13  ;;  %v258_v15 = vld [vmem:[%s1091_s25 + $0xf0] sm:$0xff] }
  0x1d   : > { %257 = vst [vmem:[%s1096_s26 + $0x70] sm:$0xff] %v256_v14  ;;  %v260_v16 = vld [vmem:[%s1091_s25 + $0x100] sm:$0xff]  ;;  %v262_v17 = vld [vmem:[%s1091_s25 + $0x110] sm:$0xff]  ;;  %259 = vst [vmem:[%s1096_s26 + $0x78] sm:$0xff] %v258_v15 }
  0x1e   : > { %261 = vst [vmem:[%s1096_s26 + $0x80] sm:$0xff] %v260_v16  ;;  %263 = vst [vmem:[%s1096_s26 + $0x88] sm:$0xff] %v262_v17  ;;  %v264_v18 = vld [vmem:[%s1091_s25 + $0x120] sm:$0xff]  ;;  %v266_v19 = vld [vmem:[%s1091_s25 + $0x130] sm:$0xff] }
  0x1f   : > { %v268_v20 = vld [vmem:[%s1091_s25 + $0x140] sm:$0xff]  ;;  %265 = vst [vmem:[%s1096_s26 + $0x90] sm:$0xff] %v264_v18  ;;  %267 = vst [vmem:[%s1096_s26 + $0x98] sm:$0xff] %v266_v19  ;;  %v270_v21 = vld [vmem:[%s1091_s25 + $0x150] sm:$0xff] }
  0x20   : > { %269 = vst [vmem:[%s1096_s26 + $0xa0] sm:$0xff] %v268_v20  ;;  %v272_v22 = vld [vmem:[%s1091_s25 + $0x160] sm:$0xff]  ;;  %v274_v23 = vld [vmem:[%s1091_s25 + $0x170] sm:$0xff]  ;;  %271 = vst [vmem:[%s1096_s26 + $0xa8] sm:$0xff] %v270_v21 }
  0x21   : > { %273 = vst [vmem:[%s1096_s26 + $0xb0] sm:$0xff] %v272_v22  ;;  %275 = vst [vmem:[%s1096_s26 + $0xb8] sm:$0xff] %v274_v23  ;;  %v276_v24 = vld [vmem:[%s1091_s25 + $0x180] sm:$0xff]  ;;  %v278_v25 = vld [vmem:[%s1091_s25 + $0x190] sm:$0xff] }
  0x22   : > { %v280_v26 = vld [vmem:[%s1091_s25 + $0x1a0] sm:$0xff]  ;;  %277 = vst [vmem:[%s1096_s26 + $0xc0] sm:$0xff] %v276_v24  ;;  %279 = vst [vmem:[%s1096_s26 + $0xc8] sm:$0xff] %v278_v25  ;;  %v282_v27 = vld [vmem:[%s1091_s25 + $0x1b0] sm:$0xff] }
  0x23   : > { %281 = vst [vmem:[%s1096_s26 + $0xd0] sm:$0xff] %v280_v26  ;;  %v284_v28 = vld [vmem:[%s1091_s25 + $0x1c0] sm:$0xff]  ;;  %v286_v29 = vld [vmem:[%s1091_s25 + $0x1d0] sm:$0xff]  ;;  %283 = vst [vmem:[%s1096_s26 + $0xd8] sm:$0xff] %v282_v27 }
  0x24   : > { %285 = vst [vmem:[%s1096_s26 + $0xe0] sm:$0xff] %v284_v28  ;;  %287 = vst [vmem:[%s1096_s26 + $0xe8] sm:$0xff] %v286_v29  ;;  %v288_v30 = vld [vmem:[%s1091_s25 + $0x1e0] sm:$0xff]  ;;  %v290_v31 = vld [vmem:[%s1091_s25 + $0x1f0] sm:$0xff] }
  0x25   : > { %289 = vst [vmem:[%s1096_s26 + $0xf0] sm:$0xff] %v288_v30  ;;  %291 = vst [vmem:[%s1096_s26 + $0xf8] sm:$0xff] %v290_v31 }
  0x26 PF: > { %p808_p8 = scmp.ge.s32.totalorder %s1026_s13, 1  ;;  %p296_p9 = scmp.lt.s32.totalorder %s1026_s13, 3 }
  0x28   : > { %p297_p10 = pnand %p808_p8, %p296_p9 }
  0x29   : > { %s303_s27 = sand.u32 (!%p297_p10), 1, %s1010_s9   ;;  %v984_v32 = vld [vmem:[%s1233_s0 + $0x4] ss:$8 sps:$4 sm:$0xff] (!%p297_p10)   ;;  %v987_v33 = vld [vmem:[%s1233_s0 + $0x14] ss:$8 sps:$4 sm:$0xff] (!%p297_p10)  }
  0x2a   : > { %300 = sbr.rel (%p297_p10) target bundleno = 342 (0x156), region = 62  ;;  %s809_s28 = sshll.u32 (!%p297_p10), %s303_s27, 8  ;;  %587 = vmatprep.mubr.bf16.mxu0 (!%p297_p10), %v984_v32  ;;  %597 = vmatprep.mubr.bf16.mxu1 (!%p297_p10), %v987_v33  ;;  %v982_v2 = vld [vmem:[%s1233_s0] ss:$8 sps:$4 sm:$0xff] (!%p297_p10)   ;;  %v985_v3 = vld [vmem:[%s1233_s0 + $0x10] ss:$8 sps:$4 sm:$0xff] (!%p297_p10)  }
  0x2b   : > { %s1170_s5 = scalar_lea.vmem (!%p297_p10), [#allocation2], %s809_s28  ;;  %s810_s16 = sshll.u32 (!%p297_p10), %s303_s27, 5 }
  0x2c   : > { %v934_v34 = vld [vmem:[%s1170_s5 + $0x4] ss:$8 sps:$4 sm:$0xff] (!%p297_p10)   ;;  %v936_v35 = vld [vmem:[%s1170_s5] ss:$8 sps:$4 sm:$0xff] (!%p297_p10)   ;;  %v937_v36 = vld [vmem:[%s1170_s5 + $0x14] ss:$8 sps:$4 sm:$0xff] (!%p297_p10)  }
  0x2d   : > { %555 = vmatprep.subr.bf16.mxu0 (!%p297_p10), %v934_v34  ;;  %862 = vmatprep.subr.bf16.mxu1 (!%p297_p10), %v934_v34  ;;  %v939_v37 = vld [vmem:[%s1170_s5 + $0x10] ss:$8 sps:$4 sm:$0xff] (!%p297_p10)   ;;  %v940_v38 = vld [vmem:[%s1170_s5 + $0x24] ss:$8 sps:$4 sm:$0xff] (!%p297_p10)   ;;  %v942_v39 = vld [vmem:[%s1170_s5 + $0x20] ss:$8 sps:$4 sm:$0xff] (!%p297_p10)  }
  0x2e   : > { %556 = vmatpush1.bf16.msra.mxu0 (!%p297_p10), %v936_v35  ;;  %878 = vmatpush1.bf16.msra.mxu1 (!%p297_p10), %v936_v35  ;;  %v943_v40 = vld [vmem:[%s1170_s5 + $0x34] ss:$8 sps:$4 sm:$0xff] (!%p297_p10)   ;;  %v945_v41 = vld [vmem:[%s1170_s5 + $0x30] ss:$8 sps:$4 sm:$0xff] (!%p297_p10)   ;;  %v946_v42 = vld [vmem:[%s1170_s5 + $0x44] ss:$8 sps:$4 sm:$0xff] (!%p297_p10)  }
  0x2f   : > { %557 = vmatprep.subr.bf16.mxu0 (!%p297_p10), %v937_v36  ;;  %863 = vmatprep.subr.bf16.mxu1 (!%p297_p10), %v937_v36  ;;  %v948_v43 = vld [vmem:[%s1170_s5 + $0x40] ss:$8 sps:$4 sm:$0xff] (!%p297_p10)   ;;  %v949_v44 = vld [vmem:[%s1170_s5 + $0x54] ss:$8 sps:$4 sm:$0xff] (!%p297_p10)   ;;  %v951_v45 = vld [vmem:[%s1170_s5 + $0x50] ss:$8 sps:$4 sm:$0xff] (!%p297_p10)  }
  0x30   : > { %v952_v46 = vld [vmem:[%s1170_s5 + $0x64] ss:$8 sps:$4 sm:$0xff] (!%p297_p10)   ;;  %v954_v47 = vld [vmem:[%s1170_s5 + $0x60] ss:$8 sps:$4 sm:$0xff] (!%p297_p10)   ;;  %v955_v48 = vld [vmem:[%s1170_s5 + $0x74] ss:$8 sps:$4 sm:$0xff] (!%p297_p10)  }
  0x31   : > { %v957_v49 = vld [vmem:[%s1170_s5 + $0x70] ss:$8 sps:$4 sm:$0xff]   ;;  %v958_v50 = vld [vmem:[%s1170_s5 + $0x84] ss:$8 sps:$4 sm:$0xff]   ;;  %v960_v51 = vld [vmem:[%s1170_s5 + $0x80] ss:$8 sps:$4 sm:$0xff]  }
  0x32   : > { %558 = vmatpush1.bf16.msra.mxu0 %v939_v37  ;;  %879 = vmatpush1.bf16.msra.mxu1 %v939_v37  ;;  %v961_v52 = vld [vmem:[%s1170_s5 + $0x94] ss:$8 sps:$4 sm:$0xff]   ;;  %v963_v53 = vld [vmem:[%s1170_s5 + $0x90] ss:$8 sps:$4 sm:$0xff]   ;;  %v964_v54 = vld [vmem:[%s1170_s5 + $0xa4] ss:$8 sps:$4 sm:$0xff]  }
  0x33   : > { %559 = vmatprep.subr.bf16.mxu0 %v940_v38  ;;  %864 = vmatprep.subr.bf16.mxu1 %v940_v38  ;;  %v966_v55 = vld [vmem:[%s1170_s5 + $0xa0] ss:$8 sps:$4 sm:$0xff]   ;;  %v967_v56 = vld [vmem:[%s1170_s5 + $0xb4] ss:$8 sps:$4 sm:$0xff]   ;;  %v969_v57 = vld [vmem:[%s1170_s5 + $0xb0] ss:$8 sps:$4 sm:$0xff]  }
  0x34   : > { %v970_v58 = vld [vmem:[%s1170_s5 + $0xc4] ss:$8 sps:$4 sm:$0xff]   ;;  %v972_v59 = vld [vmem:[%s1170_s5 + $0xc0] ss:$8 sps:$4 sm:$0xff]   ;;  %v973_v60 = vld [vmem:[%s1170_s5 + $0xd4] ss:$8 sps:$4 sm:$0xff]  }
  0x35   : > { %v975_v61 = vld [vmem:[%s1170_s5 + $0xd0] ss:$8 sps:$4 sm:$0xff]   ;;  %v976_v62 = vld [vmem:[%s1170_s5 + $0xe4] ss:$8 sps:$4 sm:$0xff]   ;;  %v978_v63 = vld [vmem:[%s1170_s5 + $0xe0] ss:$8 sps:$4 sm:$0xff]  }
  0x36   : > { %560 = vmatpush1.bf16.msra.mxu0 %v942_v39  ;;  %880 = vmatpush1.bf16.msra.mxu1 %v942_v39  ;;  %v979_v0 = vld [vmem:[%s1170_s5 + $0xf4] ss:$8 sps:$4 sm:$0xff]   ;;  %v981_v1 = vld [vmem:[%s1170_s5 + $0xf0] ss:$8 sps:$4 sm:$0xff]   ;;  %s328_s9 = scalar_lea.vmem [#allocation3], %s810_s16  ;;  %s861_s17 = sshll.u32 (%p1078_p6), %s1018_s11, 3 }
  0x37   : > { %561 = vmatprep.subr.bf16.mxu0 %v943_v40  ;;  %865 = vmatprep.subr.bf16.mxu1 %v943_v40  ;;  %s672_s22 = scalar_lea.vmem (%p1078_p6), %s1235_s2, %s861_s17 }
  0x3a   : > { %562 = vmatpush1.bf16.msra.mxu0 %v945_v41  ;;  %881 = vmatpush1.bf16.msra.mxu1 %v945_v41 }
  0x3b   : > { %563 = vmatprep.subr.bf16.mxu0 %v946_v42  ;;  %866 = vmatprep.subr.bf16.mxu1 %v946_v42 }
  0x3e   : > { %564 = vmatpush1.bf16.msra.mxu0 %v948_v43  ;;  %882 = vmatpush1.bf16.msra.mxu1 %v948_v43 }
  0x3f   : > { %565 = vmatprep.subr.bf16.mxu0 %v949_v44  ;;  %867 = vmatprep.subr.bf16.mxu1 %v949_v44 }
  0x42   : > { %566 = vmatpush1.bf16.msra.mxu0 %v951_v45  ;;  %883 = vmatpush1.bf16.msra.mxu1 %v951_v45 }
  0x43   : > { %567 = vmatprep.subr.bf16.mxu0 %v952_v46  ;;  %868 = vmatprep.subr.bf16.mxu1 %v952_v46 }
  0x46   : > { %568 = vmatpush1.bf16.msra.mxu0 %v954_v47  ;;  %884 = vmatpush1.bf16.msra.mxu1 %v954_v47 }
  0x47   : > { %569 = vmatprep.subr.bf16.mxu0 %v955_v48  ;;  %869 = vmatprep.subr.bf16.mxu1 %v955_v48 }
  0x4a   : > { %570 = vmatpush1.bf16.msra.mxu0 %v957_v49  ;;  %885 = vmatpush1.bf16.msra.mxu1 %v957_v49 }
  0x4b   : > { %571 = vmatprep.subr.bf16.mxu0 %v958_v50  ;;  %870 = vmatprep.subr.bf16.mxu1 %v958_v50 }
  0x4e   : > { %572 = vmatpush1.bf16.msra.mxu0 %v960_v51  ;;  %886 = vmatpush1.bf16.msra.mxu1 %v960_v51 }
  0x4f   : > { %573 = vmatprep.subr.bf16.mxu0 %v961_v52  ;;  %871 = vmatprep.subr.bf16.mxu1 %v961_v52 }
  0x52   : > { %574 = vmatpush1.bf16.msra.mxu0 %v963_v53  ;;  %887 = vmatpush1.bf16.msra.mxu1 %v963_v53 }
  0x53   : > { %575 = vmatprep.subr.bf16.mxu0 %v964_v54  ;;  %872 = vmatprep.subr.bf16.mxu1 %v964_v54 }
  0x56   : > { %576 = vmatpush1.bf16.msra.mxu0 %v966_v55  ;;  %888 = vmatpush1.bf16.msra.mxu1 %v966_v55 }
  0x57   : > { %577 = vmatprep.subr.bf16.mxu0 %v967_v56  ;;  %873 = vmatprep.subr.bf16.mxu1 %v967_v56 }
  0x5a   : > { %578 = vmatpush1.bf16.msra.mxu0 %v969_v57  ;;  %889 = vmatpush1.bf16.msra.mxu1 %v969_v57 }
  0x5b   : > { %579 = vmatprep.subr.bf16.mxu0 %v970_v58  ;;  %874 = vmatprep.subr.bf16.mxu1 %v970_v58 }
  0x5e   : > { %580 = vmatpush1.bf16.msra.mxu0 %v972_v59  ;;  %890 = vmatpush1.bf16.msra.mxu1 %v972_v59 }
  0x5f   : > { %581 = vmatprep.subr.bf16.mxu0 %v973_v60  ;;  %875 = vmatprep.subr.bf16.mxu1 %v973_v60 }
  0x62   : > { %582 = vmatpush1.bf16.msra.mxu0 %v975_v61  ;;  %891 = vmatpush1.bf16.msra.mxu1 %v975_v61 }
  0x63   : > { %583 = vmatprep.subr.bf16.mxu0 %v976_v62  ;;  %876 = vmatprep.subr.bf16.mxu1 %v976_v62 }
  0x66   : > { %584 = vmatpush1.bf16.msra.mxu0 %v978_v63  ;;  %892 = vmatpush1.bf16.msra.mxu1 %v978_v63 }
  0x67   : > { %585 = vmatprep.subr.bf16.mxu0 %v979_v0  ;;  %877 = vmatprep.subr.bf16.mxu1 %v979_v0 }
  0x6a   : > { %586 = vmatpush1.bf16.msra.mxu0 %v981_v1  ;;  %893 = vmatpush1.bf16.msra.mxu1 %v981_v1 }
  0x6d   : > { %588 = vmatmul.mubr.bf16.vlgmr.msra.gmra.mrb[0].mxu0 %v982_v2  ;;  %598 = vmatmul.mubr.bf16.vlgmr.msra.gmra.mrb[0].mxu1 %v985_v3 }
 0x140   : > { %v589_v4 = vpop.f32.mrb[0].mxu0  ;;  %v599_v5 = vpop.f32.mrb[0].mxu1 }
 0x141   : > { %vm608_vm0 = vcmp.ge.f32.partialorder %v589_v4, 0.0  ;;  %v616_v6 = vmul.f32 0.2, %v589_v4  ;;  %vm612_vm1 = vcmp.ge.f32.partialorder %v599_v5, 0.0  ;;  %v620_v7 = vmul.f32 0.2, %v599_v5 }
 0x142   : > { %v591_v8 = vpop.f32.mrb[1].mxu0  ;;  %v601_v9 = vpop.f32.mrb[1].mxu1 }
 0x143   : > { %v624_v10 = vsel %vm608_vm0, %v589_v4, %v616_v6  ;;  %v628_v11 = vsel %vm612_vm1, %v599_v5, %v620_v7  ;;  %vm609_vm2 = vcmp.ge.f32.partialorder %v591_v8, 0.0  ;;  %v617_v12 = vmul.f32 0.2, %v591_v8  ;;  %v593_v13 = vpop.f32.mrb[2].mxu0  ;;  %v603_v14 = vpop.f32.mrb[2].mxu1 }
 0x144   : > { %vm613_vm3 = vcmp.ge.f32.partialorder %v601_v9, 0.0  ;;  %v621_v15 = vmul.f32 0.2, %v601_v9  ;;  %vm610_vm4 = vcmp.ge.f32.partialorder %v593_v13, 0.0  ;;  %v618_v16 = vmul.f32 0.2, %v593_v13 }
 0x145   : > { %v625_v17 = vsel %vm609_vm2, %v591_v8, %v617_v12  ;;  %vm614_vm5 = vcmp.ge.f32.partialorder %v603_v14, 0.0  ;;  %v622_v18 = vmul.f32 0.2, %v603_v14  ;;  %v595_v19 = vpop.f32.mrb[3].mxu0  ;;  %v605_v20 = vpop.f32.mrb[3].mxu1 }
 0x146   : > { %v857_v21 = vpack.c.bf16 %v625_v17, %v624_v10  ;;  %v629_v22 = vsel %vm613_vm3, %v601_v9, %v621_v15  ;;  %vm611_vm6 = vcmp.ge.f32.partialorder %v595_v19, 0.0  ;;  %v626_v24 = vsel %vm610_vm4, %v593_v13, %v618_v16 }
 0x147   : > { %v859_v23 = vpack.c.bf16 %v629_v22, %v628_v11  ;;  %v619_v25 = vmul.f32 0.2, %v595_v19  ;;  %vm615_vm7 = vcmp.ge.f32.partialorder %v605_v20, 0.0  ;;  %v630_v26 = vsel %vm614_vm5, %v603_v14, %v622_v18  ;;  %666 = sbr.rel (!%p1078_p6) target bundleno = 342 (0x156), region = 70 }
 0x148   : > { %656 = vst [vmem:[%s328_s9] sm:$0xff] %v857_v21  ;;  %v623_v27 = vmul.f32 0.2, %v605_v20 }
 0x149   : > { %658 = vst [vmem:[%s328_s9 + $0x10] sm:$0xff] %v859_v23  ;;  %v627_v28 = vsel %vm611_vm6, %v595_v19, %v619_v25 }
 0x14a   : > { %v858_v29 = vpack.c.bf16 %v627_v28, %v626_v24  ;;  %v631_v30 = vsel %vm615_vm7, %v605_v20, %v623_v27 }
 0x14b   : > { %v860_v31 = vpack.c.bf16 %v631_v30, %v630_v26 }
 0x14c   : > { %657 = vst [vmem:[%s328_s9 + $0x8] sm:$0xff] %v858_v29 }
 0x14d   : > { %659 = vst [vmem:[%s328_s9 + $0x18] sm:$0xff] %v860_v31 }
 0x14f   : > { %v706_v32 = vld [vmem:[%s328_s9] sm:$0xff] }
 0x150   : > { %v710_v34 = vld [vmem:[%s328_s9 + $0x10] sm:$0xff]  ;;  %707 = vst [vmem:[%s672_s22] sm:$0xff] %v706_v32 }
 0x151   : > { %711 = vst [vmem:[%s672_s22 + $0x20] sm:$0xff] %v710_v34 }
 0x153   : > { %v708_v33 = vld [vmem:[%s328_s9 + $0x8] sm:$0xff] }
 0x154   : > { %v712_v35 = vld [vmem:[%s328_s9 + $0x18] sm:$0xff]  ;;  %709 = vst [vmem:[%s672_s22 + $0x10] sm:$0xff] %v708_v33 }
 0x155   : > { %713 = vst [vmem:[%s672_s22 + $0x30] sm:$0xff] %v712_v35 }
 0x156 PF: > { %s12_s13 = sadd.s32 1, %s1026_s13   ;;  %s1237_s9 = smov %s1014_s10 }
 0x157   : > { %p9_p11 = scmp.ge.s32.totalorder %s12_s13, 4   ;;  %s1238_s10 = smov %s1083_s19 }
 0x158   : > { %s1239_s11 = smov %s1022_s12  ;;  %s1240_s12 = smov %s1242_s14 }
 0x159   :  { %11 = sbr.rel (!%p9_p11) target bundleno = 3 (0x3), region = 142 }

// kernel: discriminator_forward.10
= control target key start
LH: loop header
LB: loop body
LE: loop exit
PB: predicated region body
PF: predicated region fallthrough
CT: control target
= control target key end

     0   :  { %s1639_s17 = smov 0   ;;  %s2282_s0 = inlined_call_operand.vmem [shape: bf16[2,32,256], index: 0, kind: input, shape index: {}]   ;;  %s2283_s1 = inlined_call_operand.vmem [shape: bf16[40,32], index: 1, kind: input, shape index: {}]   ;;  %s2284_s2 = inlined_call_operand.vmem [shape: f32[40,1], index: 2, kind: input, shape index: {}]   ;;  %s2285_s3 = inlined_call_operand.<no memory space> [shape: f32[1], index: 3, kind: input, shape index: {}]   ;;  %s2286_s4 = inlined_call_operand.vmem [shape: bf16[2,32,256], index: 4, kind: output, shape index: {}]  }
   0x1   :  { %9 = sst [smem:[#allocation2]] %s2285_s3 }
   0x2 LB: > { %s1308_s18 = sadd.s32 4294967295, %s1608_s17   ;;  %p1312_p0 = scmp.ge.s32.totalorder %s1608_s17, 1  ;;  %s1608_s17 = sphi %s1639_s17, %s15_s17  }
   0x3   : > { %p163_p1 = scmp.lt.s32.totalorder %s1608_s17, 3 }
   0x5   : > { %p164_p2 = pnand %p1312_p0, %p163_p1 }
   0x7   : > { %167 = sbr.rel (%p164_p2) target bundleno = 1283 (0x503), region = 36 }
   0xe   : > { %p189_p3 = scmp.lt.s32.totalorder %s1308_s18, 1  ;;  %v1610_v0 = vmov 0   ;;  %v209_v1 = vld [vmem:[%s2284_s2] sm:$0xff]  ;;  %vm272_vm0 = vcmask 261120   ;;  %vm434_vm1 = vcmask 1041408   ;;  %vm385_vm2 = vcmask 31744  }
   0xf   : > { %314 = vmatprep.mubr.bf16.mxu0 %v1610_v0  ;;  %1397 = vset.pattern.permute.xlu0 %v1610_v0  ;;  %v1403_v10 = vld [vmem:[%s2283_s1] sm:$0xff]   ;;  %s1199_s12 = sld [smem:[#allocation2]] }
  0x10   : > { %s2381_s18 = smov (!%p189_p3, %s1308_s18), 1  ;;  %216 = vperm.xlu0 %1397, %v209_v1   ;;  %473 = vmatprep.mubr.bf16.mxu1 %v1610_v0 }
  0x11   : > { %s1350_s20 = sshll.u32 %s2381_s18, 5 }
  0x12   : > { %s1661_s23 = scalar_lea.vmem %s2282_s0, %s1350_s20  ;;  %s198_s15 = scalar_lea.vmem %s2286_s4, %s1350_s20 }
  0x13   : > { %v200_v2 = vld [vmem:[%s1661_s23] sm:$0xff]  ;;  %v201_v3 = vld [vmem:[%s1661_s23 + $0x8] sm:$0xff]  ;;  %v202_v4 = vld [vmem:[%s1661_s23 + $0x10] sm:$0xff] }
  0x14   : > { %v1321_v5 = vcombine.high %v200_v2, %v201_v3  ;;  %v1320_v6 = vcombine.low %v200_v2, %v201_v3  ;;  %v203_v7 = vld [vmem:[%s1661_s23 + $0x18] sm:$0xff] }
  0x15   : > { %v1323_v8 = vcombine.high %v202_v4, %v203_v7  ;;  %v1322_v9 = vcombine.low %v202_v4, %v203_v7 }
  0x16   : > { %282 = vmatprep.subr.bf16.mxu0 %v1321_v5 }
  0x17   : > { %283 = vmatpush1.bf16.msra.mxu0 %v1320_v6 }
  0x18   : > { %284 = vmatprep.subr.bf16.mxu0 %v1323_v8 }
  0x1b   : > { %285 = vmatpush1.bf16.msra.mxu0 %v1322_v9 }
  0x1e   : > { %1324 = vmatmul.mubr.msk.bf16.vlgmr.msra.gmra.mrb[0].mxu0 %vm272_vm0, %v1403_v10 }
  0x1f   : > { %324 = vmatprep.mubr.bf16.mxu0 %v1610_v0 }
  0x8f   : > { %v217_v11 = vpop.permute.xlu0 %216 }
  0xf1   : > { %v316_v12 = vpop.f32.mrb[0].mxu0 }
  0xf2   : > { %v317_v13 = vadd.f32 %v316_v12, %v217_v11  ;;  %v318_v14 = vpop.f32.mrb[1].mxu0 }
  0xf3   : > { %v319_v15 = vadd.f32 %v318_v14, %v217_v11  ;;  %v1672_v16 = vpop.f32.mrb[2].mxu0 }
  0xf4   : > { %2315 = vst [vmem:[#allocation3_spill] sm:$0xff] %v1672_v16  ;;  %v343_v17 = vpack.c.bf16 %v317_v13, %v317_v13  ;;  %v1674_v18 = vpop.f32.mrb[3].mxu0 }
  0xf5   : > { %2316 = vst [vmem:[#allocation4_spill] sm:$0xff] %v1674_v18  ;;  %v344_v19 = vpack.c.bf16 %v319_v15, %v319_v15 }
  0xf6   : > { %349 = vxpose.xlu0.c.b16.start.end [1/1] (short) %v343_v17, 128  ;;  %v383_v20 = vrot.slane %v343_v17, 2 }
  0xf7   : > { %365 = vxpose.xlu1.c.b16.start.end [1/1] (short) %v344_v19, 128  ;;  %v384_v21 = vrot.slane %v344_v19, 2 }
  0xf8   : > { %v436_v22 = vsel %vm434_vm1, %v383_v20, 0 }
  0xf9   : > { %1327 = vmatprep.subr.msk.bf16.mxu1 %vm434_vm1, %v384_v21 }
  0xfa   : > { %442 = vmatpush1.bf16.msra.mxu1 %v436_v22 }
  0xfb   : > { %1398 = vset.pattern.permute.xlu1 %v1610_v0 }
 0x15c   : > { %v357_v23 = vpop.trf.xlu0 }
 0x15d   : > { %1328 = vmatmul.mubr.msk.bf16.vlgmr.msra.gmra.mrb[0].mxu1 %vm385_vm2, %v357_v23  ;;  %v373_v31 = vpop.trf.xlu1 }
 0x15e   : > { %483 = vmatprep.mubr.bf16.mxu1 %v1610_v0 }
 0x160   : > { %v358_v24 = vpop.trf.xlu0 }
 0x161   : > { %v374_v32 = vpop.trf.xlu1 }
 0x164   : > { %v359_v25 = vpop.trf.xlu0 }
 0x165   : > { %1329 = vmatmul.mubr.msk.bf16.gmra.mrb[4].mxu1 %vm385_vm2, %v358_v24  ;;  %v375_v33 = vpop.trf.xlu1 }
 0x166   : > { %493 = vmatprep.mubr.bf16.mxu1 %v1610_v0 }
 0x168   : > { %v360_v26 = vpop.trf.xlu0 }
 0x169   : > { %v376_v34 = vpop.trf.xlu1 }
 0x16c   : > { %v361_v27 = vpop.trf.xlu0 }
 0x16d   : > { %1330 = vmatmul.mubr.msk.bf16.gmra.mrb[8].mxu1 %vm385_vm2, %v359_v25  ;;  %v377_v35 = vpop.trf.xlu1 }
 0x16e   : > { %503 = vmatprep.mubr.bf16.mxu1 %v1610_v0 }
 0x170   : > { %v362_v28 = vpop.trf.xlu0 }
 0x171   : > { %v378_v36 = vpop.trf.xlu1 }
 0x174   : > { %v363_v29 = vpop.trf.xlu0 }
 0x175   : > { %1331 = vmatmul.mubr.msk.bf16.gmra.mrb[12].mxu1 %vm385_vm2, %v360_v26  ;;  %v379_v37 = vpop.trf.xlu1 }
 0x176   : > { %513 = vmatprep.mubr.bf16.mxu1 %v1610_v0 }
 0x178   : > { %v364_v30 = vpop.trf.xlu0 }
 0x179   : > { %v380_v38 = vpop.trf.xlu1 }
 0x17d   : > { %1332 = vmatmul.mubr.msk.bf16.gmra.mrb[16].mxu1 %vm385_vm2, %v361_v27 }
 0x17e   : > { %523 = vmatprep.mubr.bf16.mxu1 %v1610_v0 }
 0x185   : > { %1333 = vmatmul.mubr.msk.bf16.gmra.mrb[20].mxu1 %vm385_vm2, %v362_v28 }
 0x186   : > { %533 = vmatprep.mubr.bf16.mxu1 %v1610_v0 }
 0x18d   : > { %1334 = vmatmul.mubr.msk.bf16.gmra.mrb[24].mxu1 %vm385_vm2, %v363_v29 }
 0x18e   : > { %543 = vmatprep.mubr.bf16.mxu1 %v1610_v0 }
 0x195   : > { %1335 = vmatmul.mubr.msk.bf16.gmra.mrb[28].mxu1 %vm385_vm2, %v364_v30 }
 0x196   : > { %553 = vmatprep.mubr.bf16.mxu1 %v1610_v0 }
 0x19d   : > { %1336 = vmatmul.mubr.msk.bf16.gmra.mrb[32].mxu1 %vm385_vm2, %v373_v31 }
 0x19e   : > { %563 = vmatprep.mubr.bf16.mxu1 %v1610_v0 }
 0x1a5   : > { %1337 = vmatmul.mubr.msk.bf16.gmra.mrb[36].mxu1 %vm385_vm2, %v374_v32  ;;  %v1404_v32 = vld [vmem:[%s2283_s1 + $0x8] sm:$0xff]  }
 0x1a6   : > { %573 = vmatprep.mubr.bf16.mxu1 %v1610_v0  ;;  %1325 = vmatmul.mubr.msk.bf16.gmra.mrb[4].mxu0 %vm272_vm0, %v1404_v32 }
 0x1a7   : > { %334 = vmatprep.mubr.bf16.mxu0 %v1610_v0 }
 0x1ad   : > { %1338 = vmatmul.mubr.msk.bf16.gmra.mrb[40].mxu1 %vm385_vm2, %v375_v33 }
 0x1ae   : > { %583 = vmatprep.mubr.bf16.mxu1 %v1610_v0 }
 0x1b5   : > { %1339 = vmatmul.mubr.msk.bf16.gmra.mrb[44].mxu1 %vm385_vm2, %v376_v34 }
 0x1b6   : > { %593 = vmatprep.mubr.bf16.mxu1 %v1610_v0 }
 0x1bd   : > { %1340 = vmatmul.mubr.msk.bf16.gmra.mrb[48].mxu1 %vm385_vm2, %v377_v35 }
 0x1be   : > { %603 = vmatprep.mubr.bf16.mxu1 %v1610_v0 }
 0x1c5   : > { %1341 = vmatmul.mubr.msk.bf16.gmra.mrb[52].mxu1 %vm385_vm2, %v378_v36 }
 0x1c6   : > { %613 = vmatprep.mubr.bf16.mxu1 %v1610_v0 }
 0x1cd   : > { %1342 = vmatmul.mubr.msk.bf16.gmra.mrb[56].mxu1 %vm385_vm2, %v379_v37 }
 0x1ce   : > { %623 = vmatprep.mubr.bf16.mxu1 %v1610_v0 }
 0x1d5   : > { %1343 = vmatmul.mubr.msk.bf16.gmra.mrb[60].mxu1 %vm385_vm2, %v380_v38 }
 0x230   : > { %v1708_v39 = vpop.f32.mrb[0].mxu1 }
 0x231   : > { %v1710_v40 = vpop.f32.mrb[1].mxu1 }
 0x232   : > { %v1712_v41 = vpop.f32.mrb[2].mxu1  ;;  %v634_v42 = vmax.f32 %v1708_v39, %v1710_v40 }
 0x233   : > { %v1716_v43 = vpop.f32.mrb[3].mxu1 }
 0x234   : > { %635 = vmax.xlane.f32.xlu1 %v634_v42  ;;  %v637_v44 = vmax.f32 %v1712_v41, %v1716_v43 }
 0x236   : > { %638 = vmax.xlane.f32.xlu0 %v637_v44 }
 0x238   : > { %v1720_v45 = vpop.f32.mrb[4].mxu1 }
 0x239   : > { %v1722_v46 = vpop.f32.mrb[5].mxu1 }
 0x23a   : > { %v1724_v47 = vpop.f32.mrb[6].mxu1  ;;  %v640_v48 = vmax.f32 %v1720_v45, %v1722_v46 }
 0x23b   : > { %v1728_v49 = vpop.f32.mrb[7].mxu1 }
 0x23c   : > { %641 = vmax.xlane.f32.xlu1 %v640_v48  ;;  %v643_v50 = vmax.f32 %v1724_v47, %v1728_v49 }
 0x240   : > { %644 = vmax.xlane.f32.xlu1 %v643_v50  ;;  %v1732_v51 = vpop.f32.mrb[8].mxu1 }
 0x241   : > { %v1734_v52 = vpop.f32.mrb[9].mxu1 }
 0x242   : > { %v1736_v53 = vpop.f32.mrb[10].mxu1  ;;  %v646_v54 = vmax.f32 %v1732_v51, %v1734_v52 }
 0x243   : > { %v1740_v55 = vpop.f32.mrb[11].mxu1 }
 0x244   : > { %647 = vmax.xlane.f32.xlu1 %v646_v54  ;;  %v649_v56 = vmax.f32 %v1736_v53, %v1740_v55 }
 0x248   : > { %650 = vmax.xlane.f32.xlu1 %v649_v56  ;;  %v1744_v57 = vpop.f32.mrb[12].mxu1 }
 0x249   : > { %v1746_v58 = vpop.f32.mrb[13].mxu1 }
 0x24a   : > { %v1748_v59 = vpop.f32.mrb[14].mxu1  ;;  %v652_v60 = vmax.f32 %v1744_v57, %v1746_v58 }
 0x24b   : > { %v1752_v61 = vpop.f32.mrb[15].mxu1 }
 0x24c   : > { %653 = vmax.xlane.f32.xlu1 %v652_v60  ;;  %v655_v62 = vmax.f32 %v1748_v59, %v1752_v61 }
 0x250   : > { %656 = vmax.xlane.f32.xlu1 %v655_v62  ;;  %v1756_v63 = vpop.f32.mrb[16].mxu1 }
 0x251   : > { %v1758_v1 = vpop.f32.mrb[17].mxu1 }
 0x252   : > { %v1760_v2 = vpop.f32.mrb[18].mxu1  ;;  %v658_v3 = vmax.f32 %v1756_v63, %v1758_v1 }
 0x253   : > { %v1764_v4 = vpop.f32.mrb[19].mxu1 }
 0x254   : > { %659 = vmax.xlane.f32.xlu1 %v658_v3  ;;  %v661_v5 = vmax.f32 %v1760_v2, %v1764_v4 }
 0x258   : > { %662 = vmax.xlane.f32.xlu1 %v661_v5  ;;  %v1768_v6 = vpop.f32.mrb[20].mxu1 }
 0x259   : > { %v1770_v7 = vpop.f32.mrb[21].mxu1 }
 0x25a   : > { %v1772_v8 = vpop.f32.mrb[22].mxu1  ;;  %v664_v9 = vmax.f32 %v1768_v6, %v1770_v7 }
 0x25b   : > { %v1776_v10 = vpop.f32.mrb[23].mxu1 }
 0x25c   : > { %665 = vmax.xlane.f32.xlu0 %v664_v9  ;;  %v667_v11 = vmax.f32 %v1772_v8, %v1776_v10 }
 0x25e   : > { %668 = vmax.xlane.f32.xlu1 %v667_v11 }
 0x260   : > { %v1780_v12 = vpop.f32.mrb[24].mxu1 }
 0x261   : > { %v1782_v13 = vpop.f32.mrb[25].mxu1 }
 0x262   : > { %v1784_v14 = vpop.f32.mrb[26].mxu1  ;;  %v670_v15 = vmax.f32 %v1780_v12, %v1782_v13 }
 0x263   : > { %v1788_v17 = vpop.f32.mrb[27].mxu1 }
 0x264   : > { %671 = vmax.xlane.f32.xlu0 %v670_v15  ;;  %v673_v19 = vmax.f32 %v1784_v14, %v1788_v17 }
 0x266   : > { %674 = vmax.xlane.f32.xlu1 %v673_v19 }
 0x268   : > { %v1792_v20 = vpop.f32.mrb[28].mxu1 }
 0x269   : > { %v1794_v21 = vpop.f32.mrb[29].mxu1 }
 0x26a   : > { %v1796_v22 = vpop.f32.mrb[30].mxu1  ;;  %v676_v23 = vmax.f32 %v1792_v20, %v1794_v21 }
 0x26b   : > { %v1800_v24 = vpop.f32.mrb[31].mxu1 }
 0x26c   : > { %677 = vmax.xlane.f32.xlu0 %v676_v23  ;;  %v679_v25 = vmax.f32 %v1796_v22, %v1800_v24 }
 0x26e   : > { %680 = vmax.xlane.f32.xlu1 %v679_v25 }
 0x270   : > { %v1804_v26 = vpop.f32.mrb[32].mxu1 }
 0x271   : > { %v1806_v27 = vpop.f32.mrb[33].mxu1 }
 0x272   : > { %v1808_v28 = vpop.f32.mrb[34].mxu1  ;;  %v682_v29 = vmax.f32 %v1804_v26, %v1806_v27 }
 0x273   : > { %v1812_v30 = vpop.f32.mrb[35].mxu1 }
 0x274   : > { %683 = vmax.xlane.f32.xlu0 %v682_v29  ;;  %v685_v31 = vmax.f32 %v1808_v28, %v1812_v30 }
 0x276   : > { %686 = vmax.xlane.f32.xlu1 %v685_v31 }
 0x278   : > { %v1821_v33 = vpop.f32.mrb[36].mxu1 }
 0x279   : > { %v1823_v34 = vpop.f32.mrb[37].mxu1 }
 0x27a   : > { %v1825_v35 = vpop.f32.mrb[38].mxu1  ;;  %v688_v36 = vmax.f32 %v1821_v33, %v1823_v34 }
 0x27b   : > { %v1829_v37 = vpop.f32.mrb[39].mxu1 }
 0x27c   : > { %689 = vmax.xlane.f32.xlu0 %v688_v36  ;;  %v691_v38 = vmax.f32 %v1825_v35, %v1829_v37 }
 0x27e   : > { %692 = vmax.xlane.f32.xlu1 %v691_v38 }
 0x280   : > { %v1833_v42 = vpop.f32.mrb[40].mxu1 }
 0x281   : > { %v1835_v44 = vpop.f32.mrb[41].mxu1 }
 0x282   : > { %v1837_v0 = vpop.f32.mrb[42].mxu1  ;;  %v694_v48 = vmax.f32 %v1833_v42, %v1835_v44 }
 0x283   : > { %v1841_v50 = vpop.f32.mrb[43].mxu1 }
 0x284   : > { %695 = vmax.xlane.f32.xlu0 %v694_v48  ;;  %v697_v54 = vmax.f32 %v1837_v0, %v1841_v50 }
 0x286   : > { %698 = vmax.xlane.f32.xlu1 %v697_v54 }
 0x288   : > { %v1845_v56 = vpop.f32.mrb[44].mxu1 }
 0x289   : > { %v1847_v60 = vpop.f32.mrb[45].mxu1 }
 0x28a   : > { %v1849_v62 = vpop.f32.mrb[46].mxu1  ;;  %v700_v3 = vmax.f32 %v1845_v56, %v1847_v60 }
 0x28b   : > { %v1853_v5 = vpop.f32.mrb[47].mxu1 }
 0x28c   : > { %2317 = vst [vmem:[#allocation5_spill] sm:$0xff] %v1853_v5  ;;  %701 = vmax.xlane.f32.xlu0 %v700_v3  ;;  %v703_v9 = vmax.f32 %v1849_v62, %v1853_v5 }
 0x28e   : > { %704 = vmax.xlane.f32.xlu1 %v703_v9 }
 0x290   : > { %v1857_v11 = vpop.f32.mrb[48].mxu1 }
 0x291   : > { %2318 = vst [vmem:[#allocation6_spill] sm:$0xff] %v1857_v11  ;;  %v1859_v15 = vpop.f32.mrb[49].mxu1 }
 0x292   : > { %2319 = vst [vmem:[#allocation7_spill] sm:$0xff] %v1859_v15  ;;  %v1861_v19 = vpop.f32.mrb[50].mxu1  ;;  %v706_v23 = vmax.f32 %v1857_v11, %v1859_v15 }
 0x293   : > { %2320 = vst [vmem:[#allocation8_spill] sm:$0xff] %v1861_v19  ;;  %v1865_v25 = vpop.f32.mrb[51].mxu1 }
 0x294   : > { %2321 = vst [vmem:[#allocation9_spill] sm:$0xff] %v1865_v25  ;;  %707 = vmax.xlane.f32.xlu0 %v706_v23  ;;  %v709_v29 = vmax.f32 %v1861_v19, %v1865_v25 }
 0x296   : > { %710 = vmax.xlane.f32.xlu1 %v709_v29 }
 0x298   : > { %v1869_v31 = vpop.f32.mrb[52].mxu1 }
 0x299   : > { %2322 = vst [vmem:[#allocation10_spill] sm:$0xff] %v1869_v31  ;;  %v1871_v32 = vpop.f32.mrb[53].mxu1 }
 0x29a   : > { %2323 = vst [vmem:[#allocation11_spill] sm:$0xff] %v1871_v32  ;;  %v1873_v36 = vpop.f32.mrb[54].mxu1  ;;  %v712_v38 = vmax.f32 %v1869_v31, %v1871_v32 }
 0x29b   : > { %2324 = vst [vmem:[#allocation12_spill] sm:$0xff] %v1873_v36  ;;  %v1877_v48 = vpop.f32.mrb[55].mxu1 }
 0x29c   : > { %2325 = vst [vmem:[#allocation13_spill] sm:$0xff] %v1877_v48  ;;  %713 = vmax.xlane.f32.xlu0 %v712_v38  ;;  %v715_v54 = vmax.f32 %v1873_v36, %v1877_v48 }
 0x29e   : > { %716 = vmax.xlane.f32.xlu1 %v715_v54 }
 0x2a0   : > { %v1881_v3 = vpop.f32.mrb[56].mxu1 }
 0x2a1   : > { %2326 = vst [vmem:[#allocation14_spill] sm:$0xff] %v1881_v3  ;;  %v1883_v9 = vpop.f32.mrb[57].mxu1 }
 0x2a2   : > { %2327 = vst [vmem:[#allocation15_spill] sm:$0xff] %v1883_v9  ;;  %v1885_v23 = vpop.f32.mrb[58].mxu1  ;;  %v718_v29 = vmax.f32 %v1881_v3, %v1883_v9  ;;  %v1405_v3 = vld [vmem:[%s2283_s1 + $0x10] ss:$0 sps:$4 sm:$0xff]  }
 0x2a3   : > { %2328 = vst [vmem:[#allocation16_spill] sm:$0xff] %v1885_v23  ;;  %v1889_v18 = vpop.f32.mrb[59].mxu1  ;;  %1326 = vmatmul.mubr.msk.bf16.gmra.mrb[8].mxu0 %vm272_vm0, %v1405_v3 }
 0x2a4   : > { %2329 = vst [vmem:[#allocation17_spill] sm:$0xff] %v1889_v18  ;;  %v721_v16 = vmax.f32 %v1885_v23, %v1889_v18 }
 0x2a6   : > { %722 = vmax.xlane.f32.xlu1 %v721_v16 }
 0x2a8   : > { %v1893_v38 = vpop.f32.mrb[60].mxu1 }
 0x2a9   : > { %v1895_v32 = vpop.f32.mrb[61].mxu1 }
 0x2aa   : > { %v1897_v54 = vpop.f32.mrb[62].mxu1 }
 0x2ab   : > { %2330 = vst [vmem:[#allocation18_spill] sm:$0xff] %v1897_v54  ;;  %v1901_v36 = vpop.f32.mrb[63].mxu1 }
 0x2ac   : > { %2331 = vst [vmem:[#allocation19_spill] sm:$0xff] %v1901_v36  ;;  %v727_v9 = vmax.f32 %v1897_v54, %v1901_v36 }
 0x2c1   : > { %v636_v16 = vpop.xlane.xlu1 %635 }
 0x2c2   : > { %v730_v18 = vsub.f32 %v1708_v39, %v636_v16  ;;  %v731_v23 = vsub.f32 %v1710_v40, %v636_v16 }
 0x2c3   : > { %v639_v31 = vpop.xlane.xlu0 %638 }
 0x2c4   : > { %v794_v25 = vmul.f32 1.442695, %v730_v18  ;;  %v796_v19 = vmul.f32 1.442695, %v731_v23  ;;  %v732_v48 = vsub.f32 %v1712_v41, %v639_v31  ;;  %v733_v15 = vsub.f32 %v1716_v43, %v639_v31 }
 0x2c6   : > { %1406 = vpow2.f32 %v794_v25  ;;  %v798_v36 = vmul.f32 1.442695, %v732_v48  ;;  %v800_v54 = vmul.f32 1.442695, %v733_v15 }
 0x2c7   : > { %1408 = vpow2.f32 %v796_v19 }
 0x2c8   : > { %1410 = vpow2.f32 %v798_v36 }
 0x2c9   : > { %1412 = vpow2.f32 %v800_v54  ;;  %v642_v11 = vpop.xlane.xlu1 %641 }
 0x2ca   : > { %v734_v3 = vsub.f32 %v1720_v45, %v642_v11  ;;  %v735_v39 = vsub.f32 %v1722_v46, %v642_v11 }
 0x2cc   : > { %v802_v5 = vmul.f32 1.442695, %v734_v3  ;;  %v804_v40 = vmul.f32 1.442695, %v735_v39 }
 0x2cd   : > { %v645_v16 = vpop.xlane.xlu1 %644 }
 0x2ce   : > { %1414 = vpow2.f32 %v802_v5  ;;  %v736_v18 = vsub.f32 %v1724_v47, %v645_v16  ;;  %v737_v41 = vsub.f32 %v1728_v49, %v645_v16 }
 0x2cf   : > { %1416 = vpow2.f32 %v804_v40 }
 0x2d0   : > { %v1917_v43 = vpop.eup %1406  ;;  %v806_v15 = vmul.f32 1.442695, %v736_v18  ;;  %v808_v19 = vmul.f32 1.442695, %v737_v41 }
 0x2d1   : > { %v1919_v25 = vpop.eup %1408  ;;  %v648_v31 = vpop.xlane.xlu1 %647 }
 0x2d2   : > { %v1921_v36 = vpop.eup %1410  ;;  %1418 = vpow2.f32 %v806_v15  ;;  %v738_v45 = vsub.f32 %v1732_v51, %v648_v31  ;;  %v739_v46 = vsub.f32 %v1734_v52, %v648_v31  ;;  %v922_v47 = vadd.f32 %v1919_v25, %v1917_v43 }
 0x2d3   : > { %v1927_v5 = vpop.eup %1412  ;;  %1420 = vpow2.f32 %v808_v19 }
 0x2d4   : > { %v810_v49 = vmul.f32 1.442695, %v738_v45  ;;  %v812_v11 = vmul.f32 1.442695, %v739_v46  ;;  %923 = vadd.xlane.f32.xlu0 %v922_v47  ;;  %v925_v48 = vadd.f32 %v1927_v5, %v1921_v36 }
 0x2d5   : > { %v651_v23 = vpop.xlane.xlu1 %650 }
 0x2d6   : > { %1422 = vpow2.f32 %v810_v49  ;;  %v740_v54 = vsub.f32 %v1736_v53, %v651_v23  ;;  %v741_v51 = vsub.f32 %v1740_v55, %v651_v23  ;;  %926 = vadd.xlane.f32.xlu1 %v925_v48  ;;  %v2332_v49 = vmax.f32 %v1893_v38, %v1895_v32 }
 0x2d7   : > { %1424 = vpow2.f32 %v812_v11 }
 0x2d8   : > { %v1933_v52 = vpop.eup %1414  ;;  %v814_v3 = vmul.f32 1.442695, %v740_v54  ;;  %v816_v39 = vmul.f32 1.442695, %v741_v51  ;;  %719 = vmax.xlane.f32.xlu0 %v718_v29 }
 0x2d9   : > { %v1935_v40 = vpop.eup %1416  ;;  %v654_v16 = vpop.xlane.xlu1 %653 }
 0x2da   : > { %1426 = vpow2.f32 %v814_v3  ;;  %v742_v18 = vsub.f32 %v1744_v57, %v654_v16  ;;  %v743_v41 = vsub.f32 %v1746_v58, %v654_v16  ;;  %728 = vmax.xlane.f32.xlu1 %v727_v9  ;;  %v928_v53 = vadd.f32 %v1935_v40, %v1933_v52 }
 0x2db   : > { %1428 = vpow2.f32 %v816_v39 }
 0x2dc   : > { %v1941_v55 = vpop.eup %1418  ;;  %v818_v15 = vmul.f32 1.442695, %v742_v18  ;;  %v820_v19 = vmul.f32 1.442695, %v743_v41  ;;  %929 = vadd.xlane.f32.xlu0 %v928_v53 }
 0x2dd   : > { %v1943_v31 = vpop.eup %1420  ;;  %v657_v29 = vpop.xlane.xlu1 %656 }
 0x2de   : > { %1430 = vpow2.f32 %v818_v15  ;;  %v744_v45 = vsub.f32 %v1748_v59, %v657_v29  ;;  %v745_v57 = vsub.f32 %v1752_v61, %v657_v29  ;;  %v931_v58 = vadd.f32 %v1943_v31, %v1941_v55 }
 0x2df   : > { %1432 = vpow2.f32 %v820_v19 }
 0x2e0   : > { %v1949_v9 = vpop.eup %1422  ;;  %v822_v46 = vmul.f32 1.442695, %v744_v45  ;;  %v824_v47 = vmul.f32 1.442695, %v745_v57  ;;  %725 = vmax.xlane.f32.xlu0 %v2332_v49  ;;  %932 = vadd.xlane.f32.xlu1 %v931_v58 }
 0x2e1   : > { %v1954_v11 = vpop.eup %1424  ;;  %v660_v48 = vpop.xlane.xlu1 %659 }
 0x2e2   : > { %1434 = vpow2.f32 %v822_v46  ;;  %v746_v59 = vsub.f32 %v1756_v63, %v660_v48  ;;  %v747_v61 = vsub.f32 %v1758_v1, %v660_v48  ;;  %v934_v23 = vadd.f32 %v1954_v11, %v1949_v9 }
 0x2e3   : > { %1436 = vpow2.f32 %v824_v47 }
 0x2e4   : > { %v1960_v54 = vpop.eup %1426  ;;  %v826_v51 = vmul.f32 1.442695, %v746_v59  ;;  %v828_v3 = vmul.f32 1.442695, %v747_v61  ;;  %935 = vadd.xlane.f32.xlu0 %v934_v23 }
 0x2e5   : > { %v1962_v39 = vpop.eup %1428  ;;  %v663_v16 = vpop.xlane.xlu1 %662 }
 0x2e6   : > { %1438 = vpow2.f32 %v826_v51  ;;  %v748_v18 = vsub.f32 %v1760_v2, %v663_v16  ;;  %v749_v41 = vsub.f32 %v1764_v4, %v663_v16  ;;  %v937_v63 = vadd.f32 %v1962_v39, %v1960_v54 }
 0x2e7   : > { %1440 = vpow2.f32 %v828_v3 }
 0x2e8   : > { %v1968_v1 = vpop.eup %1430  ;;  %v830_v53 = vmul.f32 1.442695, %v748_v18  ;;  %v832_v15 = vmul.f32 1.442695, %v749_v41  ;;  %938 = vadd.xlane.f32.xlu1 %v937_v63 }
 0x2e9   : > { %v1970_v19 = vpop.eup %1432  ;;  %v666_v29 = vpop.xlane.xlu0 %665 }
 0x2ea   : > { %1442 = vpow2.f32 %v830_v53  ;;  %v750_v45 = vsub.f32 %v1768_v6, %v666_v29  ;;  %v751_v57 = vsub.f32 %v1770_v7, %v666_v29  ;;  %v940_v2 = vadd.f32 %v1970_v19, %v1968_v1 }
 0x2eb   : > { %1444 = vpow2.f32 %v832_v15  ;;  %v669_v4 = vpop.xlane.xlu1 %668 }
 0x2ec   : > { %v1976_v58 = vpop.eup %1434  ;;  %v834_v46 = vmul.f32 1.442695, %v750_v45  ;;  %v836_v47 = vmul.f32 1.442695, %v751_v57  ;;  %v752_v49 = vsub.f32 %v1772_v8, %v669_v4  ;;  %v753_v48 = vsub.f32 %v1776_v10, %v669_v4  ;;  %941 = vadd.xlane.f32.xlu0 %v940_v2 }
 0x2ed   : > { %v1980_v59 = vpop.eup %1436 }
 0x2ee   : > { %1446 = vpow2.f32 %v834_v46  ;;  %v838_v6 = vmul.f32 1.442695, %v752_v49  ;;  %v840_v61 = vmul.f32 1.442695, %v753_v48  ;;  %v943_v7 = vadd.f32 %v1980_v59, %v1976_v58 }
 0x2ef   : > { %1448 = vpow2.f32 %v836_v47 }
 0x2f0   : > { %v1984_v23 = vpop.eup %1438  ;;  %1450 = vpow2.f32 %v838_v6  ;;  %944 = vadd.xlane.f32.xlu1 %v943_v7 }
 0x2f1   : > { %v1986_v51 = vpop.eup %1440  ;;  %1452 = vpow2.f32 %v840_v61  ;;  %v672_v8 = vpop.xlane.xlu0 %671 }
 0x2f2   : > { %v754_v10 = vsub.f32 %v1780_v12, %v672_v8  ;;  %v755_v3 = vsub.f32 %v1782_v13, %v672_v8  ;;  %v946_v16 = vadd.f32 %v1986_v51, %v1984_v23 }
 0x2f3   : > { %v675_v18 = vpop.xlane.xlu1 %674 }
 0x2f4   : > { %v1992_v41 = vpop.eup %1442  ;;  %v842_v63 = vmul.f32 1.442695, %v754_v10  ;;  %v844_v53 = vmul.f32 1.442695, %v755_v3  ;;  %v756_v15 = vsub.f32 %v1784_v14, %v675_v18  ;;  %v757_v29 = vsub.f32 %v1788_v17, %v675_v18  ;;  %947 = vadd.xlane.f32.xlu0 %v946_v16 }
 0x2f5   : > { %v1996_v45 = vpop.eup %1444 }
 0x2f6   : > { %1454 = vpow2.f32 %v842_v63  ;;  %v846_v57 = vmul.f32 1.442695, %v756_v15  ;;  %v848_v12 = vmul.f32 1.442695, %v757_v29  ;;  %v949_v13 = vadd.f32 %v1996_v45, %v1992_v41 }
 0x2f7   : > { %1456 = vpow2.f32 %v844_v53 }
 0x2f8   : > { %v2000_v2 = vpop.eup %1446  ;;  %1458 = vpow2.f32 %v846_v57  ;;  %950 = vadd.xlane.f32.xlu1 %v949_v13 }
 0x2f9   : > { %v2002_v4 = vpop.eup %1448  ;;  %1460 = vpow2.f32 %v848_v12  ;;  %v678_v14 = vpop.xlane.xlu0 %677 }
 0x2fa   : > { %v2004_v46 = vpop.eup %1450  ;;  %v758_v17 = vsub.f32 %v1792_v20, %v678_v14  ;;  %v759_v47 = vsub.f32 %v1794_v21, %v678_v14  ;;  %v952_v49 = vadd.f32 %v2002_v4, %v2000_v2 }
 0x2fb   : > { %v2010_v48 = vpop.eup %1452  ;;  %v681_v6 = vpop.xlane.xlu1 %680 }
 0x2fc   : > { %v850_v61 = vmul.f32 1.442695, %v758_v17  ;;  %v852_v7 = vmul.f32 1.442695, %v759_v47  ;;  %v760_v8 = vsub.f32 %v1796_v22, %v681_v6  ;;  %v761_v10 = vsub.f32 %v1800_v24, %v681_v6  ;;  %953 = vadd.xlane.f32.xlu0 %v952_v49 }
 0x2fd   : > { %v955_v3 = vadd.f32 %v2010_v48, %v2004_v46 }
 0x2fe   : > { %1462 = vpow2.f32 %v850_v61  ;;  %v854_v20 = vmul.f32 1.442695, %v760_v8  ;;  %v856_v16 = vmul.f32 1.442695, %v761_v10 }
 0x2ff   : > { %1464 = vpow2.f32 %v852_v7  ;;  %956 = vadd.xlane.f32.xlu1 %v955_v3 }
 0x300   : > { %v2016_v21 = vpop.eup %1454  ;;  %1466 = vpow2.f32 %v854_v20 }
 0x301   : > { %v2018_v18 = vpop.eup %1456  ;;  %1468 = vpow2.f32 %v856_v16  ;;  %v684_v63 = vpop.xlane.xlu0 %683 }
 0x302   : > { %v2020_v53 = vpop.eup %1458  ;;  %v762_v22 = vsub.f32 %v1804_v26, %v684_v63  ;;  %v763_v24 = vsub.f32 %v1806_v27, %v684_v63  ;;  %v958_v15 = vadd.f32 %v2018_v18, %v2016_v21 }
 0x303   : > { %v2026_v29 = vpop.eup %1460  ;;  %v687_v57 = vpop.xlane.xlu1 %686 }
 0x304   : > { %v858_v12 = vmul.f32 1.442695, %v762_v22  ;;  %v860_v13 = vmul.f32 1.442695, %v763_v24  ;;  %v764_v14 = vsub.f32 %v1808_v28, %v687_v57  ;;  %v765_v17 = vsub.f32 %v1812_v30, %v687_v57  ;;  %959 = vadd.xlane.f32.xlu0 %v958_v15 }
 0x305   : > { %v961_v47 = vadd.f32 %v2026_v29, %v2020_v53 }
 0x306   : > { %1470 = vpow2.f32 %v858_v12  ;;  %v862_v26 = vmul.f32 1.442695, %v764_v14  ;;  %v864_v49 = vmul.f32 1.442695, %v765_v17 }
 0x307   : > { %1472 = vpow2.f32 %v860_v13  ;;  %962 = vadd.xlane.f32.xlu1 %v961_v47 }
 0x308   : > { %v2032_v27 = vpop.eup %1462  ;;  %1474 = vpow2.f32 %v862_v26 }
 0x309   : > { %v2034_v6 = vpop.eup %1464  ;;  %1476 = vpow2.f32 %v864_v49  ;;  %v690_v61 = vpop.xlane.xlu0 %689 }
 0x30a   : > { %v2036_v7 = vpop.eup %1466  ;;  %v766_v28 = vsub.f32 %v1821_v33, %v690_v61  ;;  %v767_v30 = vsub.f32 %v1823_v34, %v690_v61  ;;  %v964_v8 = vadd.f32 %v2034_v6, %v2032_v27 }
 0x30b   : > { %v2042_v10 = vpop.eup %1468  ;;  %v693_v3 = vpop.xlane.xlu1 %692 }
 0x30c   : > { %v866_v20 = vmul.f32 1.442695, %v766_v28  ;;  %v868_v16 = vmul.f32 1.442695, %v767_v30  ;;  %v768_v63 = vsub.f32 %v1825_v35, %v693_v3  ;;  %v769_v22 = vsub.f32 %v1829_v37, %v693_v3  ;;  %965 = vadd.xlane.f32.xlu0 %v964_v8 }
 0x30d   : > { %v967_v24 = vadd.f32 %v2042_v10, %v2036_v7 }
 0x30e   : > { %1478 = vpow2.f32 %v866_v20  ;;  %v870_v33 = vmul.f32 1.442695, %v768_v63  ;;  %v872_v15 = vmul.f32 1.442695, %v769_v22 }
 0x30f   : > { %1480 = vpow2.f32 %v868_v16  ;;  %968 = vadd.xlane.f32.xlu1 %v967_v24 }
 0x310   : > { %v2048_v34 = vpop.eup %1470  ;;  %1482 = vpow2.f32 %v870_v33 }
 0x311   : > { %v2050_v57 = vpop.eup %1472  ;;  %1484 = vpow2.f32 %v872_v15  ;;  %v696_v12 = vpop.xlane.xlu0 %695 }
 0x312   : > { %v2052_v13 = vpop.eup %1474  ;;  %v770_v35 = vsub.f32 %v1833_v42, %v696_v12  ;;  %v771_v37 = vsub.f32 %v1835_v44, %v696_v12  ;;  %v970_v14 = vadd.f32 %v2050_v57, %v2048_v34 }
 0x313   : > { %v2058_v17 = vpop.eup %1476  ;;  %v699_v47 = vpop.xlane.xlu1 %698 }
 0x314   : > { %v874_v26 = vmul.f32 1.442695, %v770_v35  ;;  %v876_v49 = vmul.f32 1.442695, %v771_v37  ;;  %v772_v61 = vsub.f32 %v1837_v0, %v699_v47  ;;  %v773_v28 = vsub.f32 %v1841_v50, %v699_v47  ;;  %971 = vadd.xlane.f32.xlu0 %v970_v14  ;;  %v2333_v35 = vld [vmem:[#allocation5_spill] sm:$0xff] }
 0x315   : > { %v973_v30 = vadd.f32 %v2058_v17, %v2052_v13 }
 0x316   : > { %1486 = vpow2.f32 %v874_v26  ;;  %v878_v42 = vmul.f32 1.442695, %v772_v61  ;;  %v880_v8 = vmul.f32 1.442695, %v773_v28 }
 0x317   : > { %1488 = vpow2.f32 %v876_v49  ;;  %974 = vadd.xlane.f32.xlu1 %v973_v30  ;;  %v2336_v30 = vld [vmem:[#allocation7_spill] sm:$0xff] }
 0x318   : > { %v2064_v44 = vpop.eup %1478  ;;  %1490 = vpow2.f32 %v878_v42 }
 0x319   : > { %v2066_v3 = vpop.eup %1480  ;;  %1492 = vpow2.f32 %v880_v8  ;;  %v702_v20 = vpop.xlane.xlu0 %701 }
 0x31a   : > { %v2068_v16 = vpop.eup %1482  ;;  %v774_v0 = vsub.f32 %v1845_v56, %v702_v20  ;;  %v775_v50 = vsub.f32 %v1847_v60, %v702_v20  ;;  %v976_v63 = vadd.f32 %v2066_v3, %v2064_v44 }
 0x31b   : > { %v2074_v22 = vpop.eup %1484  ;;  %v705_v24 = vpop.xlane.xlu1 %704 }
 0x31c   : > { %v882_v33 = vmul.f32 1.442695, %v774_v0  ;;  %v884_v15 = vmul.f32 1.442695, %v775_v50  ;;  %v776_v12 = vsub.f32 %v1849_v62, %v705_v24  ;;  %v777_v37 = vsub.f32 %v2333_v35, %v705_v24  ;;  %977 = vadd.xlane.f32.xlu0 %v976_v63  ;;  %v2335_v62 = vld [vmem:[#allocation6_spill] sm:$0xff]  ;;  %v2337_v24 = vld [vmem:[#allocation8_spill] sm:$0xff] }
 0x31d   : > { %v979_v14 = vadd.f32 %v2074_v22, %v2068_v16 }
 0x31e   : > { %1494 = vpow2.f32 %v882_v33  ;;  %v886_v56 = vmul.f32 1.442695, %v776_v12  ;;  %v888_v47 = vmul.f32 1.442695, %v777_v37 }
 0x31f   : > { %1496 = vpow2.f32 %v884_v15  ;;  %980 = vadd.xlane.f32.xlu1 %v979_v14  ;;  %v2338_v15 = vld [vmem:[#allocation9_spill] sm:$0xff] }
 0x320   : > { %v2080_v60 = vpop.eup %1486  ;;  %1498 = vpow2.f32 %v886_v56 }
 0x321   : > { %2334 = vst [vmem:[#allocation5_spill] sm:$0xff] %v2080_v60  ;;  %v2082_v26 = vpop.eup %1488  ;;  %1500 = vpow2.f32 %v888_v47  ;;  %v708_v49 = vpop.xlane.xlu0 %707 }
 0x322   : > { %v2084_v61 = vpop.eup %1490  ;;  %v778_v28 = vsub.f32 %v2335_v62, %v708_v49  ;;  %v779_v42 = vsub.f32 %v2336_v30, %v708_v49  ;;  %v982_v8 = vadd.f32 %v2082_v26, %v2080_v60 }
 0x323   : > { %v2090_v20 = vpop.eup %1492  ;;  %v711_v0 = vpop.xlane.xlu1 %710 }
 0x324   : > { %v890_v50 = vmul.f32 1.442695, %v778_v28  ;;  %v892_v63 = vmul.f32 1.442695, %v779_v42  ;;  %v780_v33 = vsub.f32 %v2337_v24, %v711_v0  ;;  %v781_v12 = vsub.f32 %v2338_v15, %v711_v0  ;;  %983 = vadd.xlane.f32.xlu0 %v982_v8  ;;  %v2342_v28 = vld [vmem:[#allocation10_spill] sm:$0xff]  ;;  %v2343_v42 = vld [vmem:[#allocation11_spill] sm:$0xff] }
 0x325   : > { %v985_v35 = vadd.f32 %v2090_v20, %v2084_v61 }
 0x326   : > { %1502 = vpow2.f32 %v890_v50  ;;  %v894_v37 = vmul.f32 1.442695, %v780_v33  ;;  %v896_v14 = vmul.f32 1.442695, %v781_v12 }
 0x327   : > { %1504 = vpow2.f32 %v892_v63  ;;  %986 = vadd.xlane.f32.xlu1 %v985_v35 }
 0x328   : > { %v2096_v56 = vpop.eup %1494  ;;  %1506 = vpow2.f32 %v894_v37 }
 0x329   : > { %2339 = vst [vmem:[#allocation6_spill] sm:$0xff] %v2096_v56  ;;  %v2098_v47 = vpop.eup %1496  ;;  %1508 = vpow2.f32 %v896_v14  ;;  %v714_v49 = vpop.xlane.xlu0 %713 }
 0x32a   : > { %2340 = vst [vmem:[#allocation7_spill] sm:$0xff] %v2098_v47  ;;  %v2100_v62 = vpop.eup %1498  ;;  %v782_v30 = vsub.f32 %v2342_v28, %v714_v49  ;;  %v783_v8 = vsub.f32 %v2343_v42, %v714_v49  ;;  %v988_v0 = vadd.f32 %v2098_v47, %v2096_v56 }
 0x32b   : > { %2341 = vst [vmem:[#allocation8_spill] sm:$0xff] %v2100_v62  ;;  %v2106_v50 = vpop.eup %1500 }
 0x32c   : > { %2344 = vst [vmem:[#allocation9_spill] sm:$0xff] %v2106_v50  ;;  %v898_v63 = vmul.f32 1.442695, %v782_v30  ;;  %v900_v24 = vmul.f32 1.442695, %v783_v8  ;;  %989 = vadd.xlane.f32.xlu0 %v988_v0  ;;  %v991_v33 = vadd.f32 %v2106_v50, %v2100_v62  ;;  %v211_v8 = vld [vmem:[%s2284_s2 + $0x10] sm:$0xff] }
 0x32d   : > { %v2131_v0 = vpop.f32.mrb[4].mxu0 }
 0x32e   : > { %1510 = vpow2.f32 %v898_v63  ;;  %992 = vadd.xlane.f32.xlu1 %v991_v33  ;;  %2351 = vst [vmem:[#allocation24_spill] sm:$0xff] %v2131_v0  ;;  %v2133_v63 = vpop.f32.mrb[5].mxu0  ;;  %v717_v33 = vpop.xlane.xlu1 %716 }
 0x32f   : > { %1512 = vpow2.f32 %v900_v24  ;;  %2352 = vst [vmem:[#allocation25_spill] sm:$0xff] %v2133_v63  ;;  %v210_v24 = vld [vmem:[%s2284_s2 + $0x8] sm:$0xff] }
 0x330   : > { %v2110_v15 = vpop.eup %1502 }
 0x331   : > { %2345 = vst [vmem:[#allocation10_spill] sm:$0xff] %v2110_v15  ;;  %v2112_v12 = vpop.eup %1504 }
 0x332   : > { %2346 = vst [vmem:[#allocation11_spill] sm:$0xff] %v2112_v12  ;;  %v2114_v35 = vpop.eup %1506  ;;  %v994_v37 = vadd.f32 %v2112_v12, %v2110_v15  ;;  %v2354_v15 = vld [vmem:[#allocation13_spill] sm:$0xff] }
 0x333   : > { %2347 = vst [vmem:[#allocation20_spill] sm:$0xff] %v2114_v35  ;;  %v2118_v14 = vpop.eup %1508 }
 0x334   : > { %2348 = vst [vmem:[#allocation21_spill] sm:$0xff] %v2118_v14  ;;  %995 = vadd.xlane.f32.xlu0 %v994_v37  ;;  %v997_v49 = vadd.f32 %v2118_v14, %v2114_v35  ;;  %v2353_v37 = vld [vmem:[#allocation12_spill] sm:$0xff] }
 0x335   : > { %v2355_v35 = vld [vmem:[#allocation16_spill] sm:$0xff] }
 0x336   : > { %998 = vadd.xlane.f32.xlu1 %v997_v49  ;;  %v784_v49 = vsub.f32 %v2353_v37, %v717_v33 }
 0x338   : > { %v2122_v28 = vpop.eup %1510 }
 0x339   : > { %2349 = vst [vmem:[#allocation22_spill] sm:$0xff] %v2122_v28  ;;  %v2124_v30 = vpop.eup %1512 }
 0x33a   : > { %2350 = vst [vmem:[#allocation23_spill] sm:$0xff] %v2124_v30  ;;  %v1000_v42 = vadd.f32 %v2124_v30, %v2122_v28  ;;  %v785_v28 = vsub.f32 %v2354_v15, %v717_v33  ;;  %v902_v30 = vmul.f32 1.442695, %v784_v49  ;;  %v2357_v49 = vld [vmem:[#allocation14_spill] sm:$0xff] }
 0x33c   : > { %1001 = vadd.xlane.f32.xlu0 %v1000_v42  ;;  %v723_v42 = vpop.xlane.xlu1 %722  ;;  %v904_v12 = vmul.f32 1.442695, %v785_v28  ;;  %1514 = vpow2.f32 %v902_v30  ;;  %v2358_v28 = vld [vmem:[#allocation15_spill] sm:$0xff] }
 0x33d   : > { %v788_v14 = vsub.f32 %v2355_v35, %v723_v42 }
 0x33e   : > { %1516 = vpow2.f32 %v904_v12  ;;  %v2359_v12 = vld [vmem:[#allocation18_spill] sm:$0xff] }
 0x33f   : > { %v910_v62 = vmul.f32 1.442695, %v788_v14 }
 0x341   : > { %1518 = vpow2.f32 %v910_v62  ;;  %v2360_v62 = vld [vmem:[#allocation19_spill] sm:$0xff] }
 0x346   : > { %v2142_v37 = vpop.eup %1514 }
 0x347   : > { %226 = vperm.xlu1 %1398, %v211_v8   ;;  %v2356_v8 = vld [vmem:[#allocation17_spill] sm:$0xff] }
 0x348   : > { %v789_v56 = vsub.f32 %v2356_v8, %v723_v42  ;;  %v2144_v33 = vpop.eup %1516 }
 0x34a   : > { %v912_v63 = vmul.f32 1.442695, %v789_v56 }
 0x34b   : > { %v2150_v8 = vpop.eup %1518 }
 0x34c   : > { %1520 = vpow2.f32 %v912_v63  ;;  %2361 = vst [vmem:[#allocation12_spill] sm:$0xff] %v2150_v8 }
 0x352   : > { %221 = vperm.xlu0 %1397, %v210_v24  }
 0x356   : > { %v2154_v0 = vpop.eup %1520 }
 0x357   : > { %2362 = vst [vmem:[#allocation13_spill] sm:$0xff] %v2154_v0 }
 0x361   : > { %v924_v50 = vpop.xlane.xlu0 %923 }
 0x362   : > { %1522 = vrcp.f32 %v924_v50 }
 0x363   : > { %v927_v24 = vpop.xlane.xlu1 %926 }
 0x364   : > { %1524 = vrcp.f32 %v927_v24  ;;  %v1003_v24 = vadd.f32 %v2144_v33, %v2142_v37 }
 0x365   : > { %v720_v15 = vpop.xlane.xlu0 %719 }
 0x366   : > { %v786_v35 = vsub.f32 %v2357_v49, %v720_v15  ;;  %v787_v47 = vsub.f32 %v2358_v28, %v720_v15  ;;  %v1009_v28 = vadd.f32 %v2154_v0, %v2150_v8 }
 0x367   : > { %v729_v42 = vpop.xlane.xlu1 %728 }
 0x368   : > { %v906_v30 = vmul.f32 1.442695, %v786_v35  ;;  %v908_v14 = vmul.f32 1.442695, %v787_v47  ;;  %v792_v56 = vsub.f32 %v2359_v12, %v729_v42  ;;  %v793_v63 = vsub.f32 %v2360_v62, %v729_v42 }
 0x369   : > { %v930_v50 = vpop.xlane.xlu0 %929 }
 0x36a   : > { %1526 = vpow2.f32 %v906_v30  ;;  %v918_v60 = vmul.f32 1.442695, %v792_v56  ;;  %v920_v49 = vmul.f32 1.442695, %v793_v63 }
 0x36b   : > { %1528 = vpow2.f32 %v908_v14  ;;  %1004 = vadd.xlane.f32.xlu1 %v1003_v24 }
 0x36c   : > { %v1523_v15 = vpop.eup %1522  ;;  %1530 = vpow2.f32 %v918_v60 }
 0x36d   : > { %1532 = vpow2.f32 %v920_v49  ;;  %v726_v47 = vpop.xlane.xlu0 %725  ;;  %v933_v35 = vpop.xlane.xlu1 %932  ;;  %v1020_v30 = vmul.f32 %v1523_v15, %v1919_v25  ;;  %v1019_v60 = vmul.f32 %v1523_v15, %v1917_v43 }
 0x36e   : > { %v1525_v42 = vpop.eup %1524  ;;  %1534 = vrcp.f32 %v930_v50  ;;  %v790_v12 = vsub.f32 %v1893_v38, %v726_v47  ;;  %v791_v62 = vsub.f32 %v1895_v32, %v726_v47 }
 0x36f   : > { %1536 = vrcp.f32 %v933_v35  ;;  %1010 = vadd.xlane.f32.xlu1 %v1009_v28  ;;  %v1023_v14 = vmul.f32 %v1525_v42, %v1927_v5  ;;  %v1022_v56 = vmul.f32 %v1525_v42, %v1921_v36 }
 0x370   : > { %v914_v63 = vmul.f32 1.442695, %v790_v12  ;;  %v916_v24 = vmul.f32 1.442695, %v791_v62 }
 0x371   : > { %v936_v49 = vpop.xlane.xlu0 %935  ;;  %v1115_v8 = vpack.c.bf16 %v1023_v14, %v1020_v30  ;;  %v1114_v0 = vpack.c.bf16 %v1022_v56, %v1019_v60 }
 0x372   : > { %1538 = vpow2.f32 %v914_v63 }
 0x373   : > { %1540 = vpow2.f32 %v916_v24  ;;  %1146 = vmatprep.subr.bf16.mxu0 %v1115_v8  ;;  %1356 = vmatprep.subr.bf16.mxu1 %v1115_v8 }
 0x374   : > { %v2164_v32 = vpop.eup %1526  ;;  %1542 = vrcp.f32 %v936_v49  ;;  %1147 = vmatpush1.bf16.xpose.msra.mxu0 %v1114_v0  ;;  %1372 = vmatpush1.bf16.xpose.msra.mxu1 %v1114_v0 }
 0x375   : > { %v2166_v38 = vpop.eup %1528  ;;  %v939_v25 = vpop.xlane.xlu1 %938 }
 0x376   : > { %v2168_v43 = vpop.eup %1530  ;;  %1544 = vrcp.f32 %v939_v25  ;;  %v1006_v36 = vadd.f32 %v2166_v38, %v2164_v32 }
 0x377   : > { %v2172_v5 = vpop.eup %1532 }
 0x378   : > { %v1535_v50 = vpop.eup %1534  ;;  %1007 = vadd.xlane.f32.xlu0 %v1006_v36  ;;  %v1015_v8 = vadd.f32 %v2172_v5, %v2168_v43 }
 0x379   : > { %v1537_v15 = vpop.eup %1536  ;;  %v942_v47 = vpop.xlane.xlu0 %941  ;;  %v1026_v0 = vmul.f32 %v1535_v50, %v1935_v40  ;;  %v1025_v28 = vmul.f32 %v1535_v50, %v1933_v52 }
 0x37a   : > { %1016 = vadd.xlane.f32.xlu1 %v1015_v8  ;;  %v1029_v35 = vmul.f32 %v1537_v15, %v1943_v31  ;;  %v1028_v42 = vmul.f32 %v1537_v15, %v1941_v55  ;;  %1546 = vrcp.f32 %v942_v47 }
 0x37c   : > { %v2180_v12 = vpop.eup %1538  ;;  %v1117_v62 = vpack.c.bf16 %v1029_v35, %v1026_v0  ;;  %v1116_v30 = vpack.c.bf16 %v1028_v42, %v1025_v28 }
 0x37d   : > { %v2182_v14 = vpop.eup %1540  ;;  %v945_v60 = vpop.xlane.xlu1 %944 }
 0x37e   : > { %v1543_v56 = vpop.eup %1542  ;;  %1148 = vmatprep.subr.bf16.mxu0 %v1117_v62  ;;  %1357 = vmatprep.subr.bf16.mxu1 %v1117_v62  ;;  %1548 = vrcp.f32 %v945_v60  ;;  %v1012_v40 = vadd.f32 %v2182_v14, %v2180_v12 }
 0x37f   : > { %1149 = vmatpush1.bf16.xpose.msra.mxu0 %v1116_v30  ;;  %1373 = vmatpush1.bf16.xpose.msra.mxu1 %v1116_v30  ;;  %v1032_v31 = vmul.f32 %v1543_v56, %v1954_v11  ;;  %v1031_v24 = vmul.f32 %v1543_v56, %v1949_v9  ;;  %v212_v11 = vld [vmem:[%s2284_s2 + $0x18] sm:$0xff] }
 0x380   : > { %v1545_v52 = vpop.eup %1544  ;;  %1013 = vadd.xlane.f32.xlu0 %v1012_v40 }
 0x381   : > { %v948_v55 = vpop.xlane.xlu0 %947  ;;  %v1035_v63 = vmul.f32 %v1545_v52, %v1962_v39  ;;  %v1034_v49 = vmul.f32 %v1545_v52, %v1960_v54  ;;  %v2193_v39 = vpop.f32.mrb[6].mxu0 }
 0x382   : > { %1550 = vrcp.f32 %v948_v55  ;;  %v2199_v28 = vpop.f32.mrb[7].mxu0 }
 0x383   : > { %v1119_v25 = vpack.c.bf16 %v1035_v63, %v1032_v31  ;;  %v1118_v36 = vpack.c.bf16 %v1034_v49, %v1031_v24  ;;  %v2205_v52 = vpop.f32.mrb[8].mxu0  ;;  %v213_v31 = vld [vmem:[%s2284_s2 + $0x20] sm:$0xff] }
 0x384   : > { %v1547_v8 = vpop.eup %1546  ;;  %v2207_v55 = vpop.f32.mrb[9].mxu0 }
 0x385   : > { %1150 = vmatprep.subr.bf16.mxu0 %v1119_v25  ;;  %1358 = vmatprep.subr.bf16.mxu1 %v1119_v25  ;;  %v951_v50 = vpop.xlane.xlu1 %950  ;;  %v1038_v54 = vmul.f32 %v1547_v8, %v1970_v19  ;;  %v1037_v0 = vmul.f32 %v1547_v8, %v1968_v1  ;;  %v340_v49 = vpop.f32.mrb[10].mxu0 }
 0x386   : > { %1552 = vrcp.f32 %v951_v50 }
 0x387   : > { %1151 = vmatpush1.bf16.xpose.msra.mxu0 %v1118_v36  ;;  %1374 = vmatpush1.bf16.xpose.msra.mxu1 %v1118_v36 }
 0x388   : > { %v1549_v15 = vpop.eup %1548 }
 0x389   : > { %v954_v9 = vpop.xlane.xlu0 %953  ;;  %v1041_v47 = vmul.f32 %v1549_v15, %v1980_v59  ;;  %v1040_v35 = vmul.f32 %v1549_v15, %v1976_v58 }
 0x38a   : > { %1554 = vrcp.f32 %v954_v9 }
 0x38b   : > { %231 = vperm.xlu1 %1398, %v212_v11   ;;  %v1121_v42 = vpack.c.bf16 %v1041_v47, %v1038_v54  ;;  %v1120_v62 = vpack.c.bf16 %v1040_v35, %v1037_v0 }
 0x38c   : > { %v957_v30 = vpop.xlane.xlu1 %956  ;;  %v1551_v60 = vpop.eup %1550 }
 0x38d   : > { %1556 = vrcp.f32 %v957_v30  ;;  %1152 = vmatprep.subr.bf16.mxu0 %v1121_v42  ;;  %1359 = vmatprep.subr.bf16.mxu1 %v1121_v42  ;;  %v1044_v59 = vmul.f32 %v1551_v60, %v1986_v51  ;;  %v1043_v58 = vmul.f32 %v1551_v60, %v1984_v23  ;;  %v341_v51 = vpop.f32.mrb[11].mxu0 }
 0x38f   : > { %1153 = vmatpush1.bf16.xpose.msra.mxu0 %v1120_v62  ;;  %1375 = vmatpush1.bf16.xpose.msra.mxu1 %v1120_v62 }
 0x390   : > { %v1553_v19 = vpop.eup %1552 }
 0x391   : > { %v960_v56 = vpop.xlane.xlu0 %959  ;;  %v1047_v1 = vmul.f32 %v1553_v19, %v1996_v45  ;;  %v1046_v40 = vmul.f32 %v1553_v19, %v1992_v41 }
 0x392   : > { %1558 = vrcp.f32 %v960_v56 }
 0x393   : > { %v1123_v63 = vpack.c.bf16 %v1047_v1, %v1044_v59  ;;  %v1122_v24 = vpack.c.bf16 %v1046_v40, %v1043_v58 }
 0x394   : > { %v963_v25 = vpop.xlane.xlu1 %962  ;;  %v1555_v36 = vpop.eup %1554 }
 0x395   : > { %1560 = vrcp.f32 %v963_v25  ;;  %1154 = vmatprep.subr.bf16.mxu0 %v1123_v63  ;;  %1360 = vmatprep.subr.bf16.mxu1 %v1123_v63  ;;  %v1050_v41 = vmul.f32 %v1555_v36, %v2002_v4  ;;  %v1049_v11 = vmul.f32 %v1555_v36, %v2000_v2 }
 0x396   : > { %236 = vperm.xlu0 %1397, %v213_v31  }
 0x397   : > { %v1557_v23 = vpop.eup %1556  ;;  %1155 = vmatpush1.bf16.xpose.msra.mxu0 %v1122_v24  ;;  %1376 = vmatpush1.bf16.xpose.msra.mxu1 %v1122_v24 }
 0x398   : > { %v1053_v45 = vmul.f32 %v1557_v23, %v2010_v48  ;;  %v1052_v8 = vmul.f32 %v1557_v23, %v2004_v46 }
 0x399   : > { %v966_v50 = vpop.xlane.xlu0 %965 }
 0x39a   : > { %v1125_v15 = vpack.c.bf16 %v1053_v45, %v1050_v41  ;;  %1562 = vrcp.f32 %v966_v50  ;;  %v1124_v47 = vpack.c.bf16 %v1052_v8, %v1049_v11 }
 0x39c   : > { %1156 = vmatprep.subr.bf16.mxu0 %v1125_v15  ;;  %1361 = vmatprep.subr.bf16.mxu1 %v1125_v15  ;;  %v969_v9 = vpop.xlane.xlu1 %968  ;;  %v1559_v54 = vpop.eup %1558 }
 0x39d   : > { %1564 = vrcp.f32 %v969_v9  ;;  %v1056_v4 = vmul.f32 %v1559_v54, %v2018_v18  ;;  %v1055_v2 = vmul.f32 %v1559_v54, %v2016_v21 }
 0x39f   : > { %v1561_v0 = vpop.eup %1560  ;;  %1157 = vmatpush1.bf16.xpose.msra.mxu0 %v1124_v47  ;;  %1377 = vmatpush1.bf16.xpose.msra.mxu1 %v1124_v47 }
 0x3a0   : > { %v1059_v48 = vmul.f32 %v1561_v0, %v2026_v29  ;;  %v1058_v46 = vmul.f32 %v1561_v0, %v2020_v53 }
 0x3a1   : > { %v972_v35 = vpop.xlane.xlu0 %971 }
 0x3a2   : > { %v1127_v42 = vpack.c.bf16 %v1059_v48, %v1056_v4  ;;  %1566 = vrcp.f32 %v972_v35  ;;  %v1126_v60 = vpack.c.bf16 %v1058_v46, %v1055_v2 }
 0x3a4   : > { %1158 = vmatprep.subr.bf16.mxu0 %v1127_v42  ;;  %1362 = vmatprep.subr.bf16.mxu1 %v1127_v42  ;;  %v975_v62 = vpop.xlane.xlu1 %974  ;;  %v1563_v30 = vpop.eup %1562 }
 0x3a5   : > { %1568 = vrcp.f32 %v975_v62  ;;  %v1062_v18 = vmul.f32 %v1563_v30, %v2034_v6  ;;  %v1061_v21 = vmul.f32 %v1563_v30, %v2032_v27  ;;  %v2367_v62 = vld [vmem:[#allocation8_spill] sm:$0xff] }
 0x3a7   : > { %v1565_v19 = vpop.eup %1564  ;;  %1159 = vmatpush1.bf16.xpose.msra.mxu0 %v1126_v60  ;;  %1378 = vmatpush1.bf16.xpose.msra.mxu1 %v1126_v60 }
 0x3a8   : > { %v1065_v29 = vmul.f32 %v1565_v19, %v2042_v10  ;;  %v1064_v53 = vmul.f32 %v1565_v19, %v2036_v7  ;;  %v2368_v19 = vld [vmem:[#allocation6_spill] sm:$0xff] }
 0x3a9   : > { %v978_v56 = vpop.xlane.xlu0 %977 }
 0x3aa   : > { %v1129_v59 = vpack.c.bf16 %v1065_v29, %v1062_v18  ;;  %1570 = vrcp.f32 %v978_v56  ;;  %v1128_v40 = vpack.c.bf16 %v1064_v53, %v1061_v21  ;;  %v2369_v21 = vld [vmem:[#allocation11_spill] sm:$0xff] }
 0x3ac   : > { %1160 = vmatprep.subr.bf16.mxu0 %v1129_v59  ;;  %1363 = vmatprep.subr.bf16.mxu1 %v1129_v59  ;;  %v981_v1 = vpop.xlane.xlu1 %980  ;;  %v1567_v58 = vpop.eup %1566 }
 0x3ad   : > { %1572 = vrcp.f32 %v981_v1  ;;  %v1068_v6 = vmul.f32 %v1567_v58, %v2050_v57  ;;  %v1067_v27 = vmul.f32 %v1567_v58, %v2048_v34  ;;  %v2370_v58 = vld [vmem:[#allocation21_spill] sm:$0xff] }
 0x3af   : > { %v1569_v31 = vpop.eup %1568  ;;  %1161 = vmatpush1.bf16.xpose.msra.mxu0 %v1128_v40  ;;  %1379 = vmatpush1.bf16.xpose.msra.mxu1 %v1128_v40 }
 0x3b0   : > { %v1071_v10 = vmul.f32 %v1569_v31, %v2058_v17  ;;  %v1070_v7 = vmul.f32 %v1569_v31, %v2052_v13 }
 0x3b1   : > { %v984_v63 = vpop.xlane.xlu0 %983 }
 0x3b2   : > { %v1131_v24 = vpack.c.bf16 %v1071_v10, %v1068_v6  ;;  %1574 = vrcp.f32 %v984_v63  ;;  %v1130_v51 = vpack.c.bf16 %v1070_v7, %v1067_v27  ;;  %v2371_v10 = vld [vmem:[#allocation20_spill] sm:$0xff]  ;;  %v2372_v7 = vld [vmem:[#allocation25_spill] sm:$0xff]  ;;  %v2373_v27 = vld [vmem:[#allocation3_spill] sm:$0xff] }
 0x3b4   : > { %1162 = vmatprep.subr.bf16.mxu0 %v1131_v24  ;;  %1364 = vmatprep.subr.bf16.mxu1 %v1131_v24  ;;  %v987_v49 = vpop.xlane.xlu1 %986  ;;  %v1571_v25 = vpop.eup %1570 }
 0x3b5   : > { %1576 = vrcp.f32 %v987_v49  ;;  %v1074_v57 = vmul.f32 %v1571_v25, %v2066_v3  ;;  %v1073_v34 = vmul.f32 %v1571_v25, %v2064_v44  ;;  %v2363_v44 = vld [vmem:[#allocation5_spill] sm:$0xff]  ;;  %v2374_v25 = vld [vmem:[#allocation4_spill] sm:$0xff] }
 0x3b7   : > { %v1573_v36 = vpop.eup %1572  ;;  %1163 = vmatpush1.bf16.xpose.msra.mxu0 %v1130_v51  ;;  %1380 = vmatpush1.bf16.xpose.msra.mxu1 %v1130_v51 }
 0x3b8   : > { %v1077_v17 = vmul.f32 %v1573_v36, %v2074_v22  ;;  %v1076_v13 = vmul.f32 %v1573_v36, %v2068_v16  ;;  %v2375_v36 = vld [vmem:[#allocation10_spill] sm:$0xff] }
 0x3b9   : > { %v990_v23 = vpop.xlane.xlu0 %989 }
 0x3ba   : > { %v1133_v41 = vpack.c.bf16 %v1077_v17, %v1074_v57  ;;  %1578 = vrcp.f32 %v990_v23  ;;  %v1132_v8 = vpack.c.bf16 %v1076_v13, %v1073_v34 }
 0x3bb   : > { %v993_v45 = vpop.xlane.xlu1 %992 }
 0x3bc   : > { %1164 = vmatprep.subr.bf16.mxu0 %v1133_v41  ;;  %1365 = vmatprep.subr.bf16.mxu1 %v1133_v41  ;;  %v1575_v50 = vpop.eup %1574  ;;  %1580 = vrcp.f32 %v993_v45 }
 0x3bd   : > { %v1080_v3 = vmul.f32 %v1575_v50, %v2082_v26  ;;  %v1079_v47 = vmul.f32 %v1575_v50, %v2363_v44  ;;  %v2364_v26 = vld [vmem:[#allocation24_spill] sm:$0xff] }
 0x3bf   : > { %v1577_v15 = vpop.eup %1576  ;;  %1165 = vmatpush1.bf16.xpose.msra.mxu0 %v1132_v8  ;;  %1381 = vmatpush1.bf16.xpose.msra.mxu1 %v1132_v8  ;;  %v2376_v8 = vld [vmem:[#allocation23_spill] sm:$0xff] }
 0x3c0   : > { %v1083_v22 = vmul.f32 %v1577_v15, %v2090_v20  ;;  %v1082_v16 = vmul.f32 %v1577_v15, %v2084_v61  ;;  %v2365_v20 = vld [vmem:[#allocation7_spill] sm:$0xff]  ;;  %v2366_v61 = vld [vmem:[#allocation9_spill] sm:$0xff] }
 0x3c1   : > { %v996_v11 = vpop.xlane.xlu0 %995 }
 0x3c2   : > { %1582 = vrcp.f32 %v996_v11  ;;  %v1135_v9 = vpack.c.bf16 %v1083_v22, %v1080_v3  ;;  %v1134_v4 = vpack.c.bf16 %v1082_v16, %v1079_v47  ;;  %v2377_v22 = vld [vmem:[#allocation22_spill] sm:$0xff] }
 0x3c3   : > { %v999_v54 = vpop.xlane.xlu1 %998 }
 0x3c4   : > { %1166 = vmatprep.subr.bf16.mxu0 %v1135_v9  ;;  %1366 = vmatprep.subr.bf16.mxu1 %v1135_v9  ;;  %1584 = vrcp.f32 %v999_v54  ;;  %v1579_v0 = vpop.eup %1578 }
 0x3c5   : > { %v1086_v42 = vmul.f32 %v1579_v0, %v2365_v20  ;;  %v1085_v18 = vmul.f32 %v1579_v0, %v2368_v19 }
 0x3c6   : > { %v1581_v48 = vpop.eup %1580 }
 0x3c7   : > { %1167 = vmatpush1.bf16.xpose.msra.mxu0 %v1134_v4  ;;  %1382 = vmatpush1.bf16.xpose.msra.mxu1 %v1134_v4  ;;  %v227_v35 = vpop.permute.xlu1 %226  ;;  %v1089_v2 = vmul.f32 %v1581_v48, %v2366_v61  ;;  %v1088_v30 = vmul.f32 %v1581_v48, %v2367_v62 }
 0x3c8   : > { %v2237_v46 = vadd.f32 %v2364_v26, %v227_v35  ;;  %v329_v24 = vadd.f32 %v2372_v7, %v227_v35  ;;  %v2378_v35 = vld [vmem:[#allocation13_spill] sm:$0xff] }
 0x3c9   : > { %v1137_v60 = vpack.c.bf16 %v1089_v2, %v1086_v42  ;;  %v1002_v56 = vpop.xlane.xlu0 %1001  ;;  %v1136_v53 = vpack.c.bf16 %v1088_v30, %v1085_v18 }
 0x3ca   : > { %1586 = vrcp.f32 %v1002_v56 }
 0x3cb   : > { %1168 = vmatprep.subr.bf16.mxu0 %v1137_v60  ;;  %1367 = vmatprep.subr.bf16.mxu1 %v1137_v60 }
 0x3cc   : > { %v1583_v29 = vpop.eup %1582 }
 0x3cd   : > { %v1092_v1 = vmul.f32 %v1583_v29, %v2369_v21  ;;  %v1091_v57 = vmul.f32 %v1583_v29, %v2375_v36 }
 0x3ce   : > { %v1585_v59 = vpop.eup %1584 }
 0x3cf   : > { %1169 = vmatpush1.bf16.xpose.msra.mxu0 %v1136_v53  ;;  %1383 = vmatpush1.bf16.xpose.msra.mxu1 %v1136_v53  ;;  %v1095_v40 = vmul.f32 %v1585_v59, %v2370_v58  ;;  %v1094_v63 = vmul.f32 %v1585_v59, %v2371_v10 }
 0x3d1   : > { %v222_v31 = vpop.permute.xlu0 %221  ;;  %v1139_v6 = vpack.c.bf16 %v1095_v40, %v1092_v1  ;;  %v1138_v13 = vpack.c.bf16 %v1094_v63, %v1091_v57  ;;  %v1599_v1 = vld [vmem:[%s1661_s23 + $0x10] sm:$0xff] }
 0x3d2   : > { %v2248_v49 = vadd.f32 %v2373_v27, %v222_v31  ;;  %v323_v51 = vadd.f32 %v2374_v25, %v222_v31  ;;  %v1213_v58 = vunpack.c.l.bf16 %v1599_v1  ;;  %v1214_v31 = vunpack.c.h.bf16 %v1599_v1 }
 0x3d3   : > { %1170 = vmatprep.subr.bf16.mxu0 %v1139_v6  ;;  %1368 = vmatprep.subr.bf16.mxu1 %v1139_v6 }
 0x3d4   : > { %v345_v17 = vpack.c.bf16 %v2237_v46, %v2248_v49  ;;  %v346_v23 = vpack.c.bf16 %v329_v24, %v323_v51  ;;  %v1587_v34 = vpop.eup %1586  ;;  %v2379_v46 = vld [vmem:[#allocation12_spill] sm:$0xff]  ;;  %v1601_v49 = vld [vmem:[%s1661_s23 + $0x18] sm:$0xff] }
 0x3d5   : > { %v1098_v15 = vmul.f32 %v1587_v34, %v2376_v8  ;;  %v1097_v11 = vmul.f32 %v1587_v34, %v2377_v22  ;;  %v1600_v24 = vld [vmem:[%s1661_s23 + $0x8] sm:$0xff]  ;;  %v1215_v25 = vunpack.c.l.bf16 %v1601_v49 }
 0x3d6   : > { %1178 = vmatprep.mubr.bf16.mxu0 %v346_v23  ;;  %v1211_v27 = vunpack.c.l.bf16 %v1600_v24  ;;  %v1212_v23 = vunpack.c.h.bf16 %v1600_v24 }
 0x3d7   : > { %1171 = vmatpush1.bf16.xpose.msra.mxu0 %v1138_v13  ;;  %1384 = vmatpush1.bf16.xpose.msra.mxu1 %v1138_v13  ;;  %v1216_v13 = vunpack.c.h.bf16 %v1601_v49 }
 0x3f8   : > { %v1005_v41 = vpop.xlane.xlu1 %1004 }
 0x3f9   : > { %1588 = vrcp.f32 %v1005_v41 }
 0x3fc   : > { %v1011_v45 = vpop.xlane.xlu1 %1010 }
 0x3fd   : > { %1590 = vrcp.f32 %v1011_v45 }
 0x403   : > { %v1589_v50 = vpop.eup %1588 }
 0x404   : > { %v1101_v3 = vmul.f32 %v1589_v50, %v2144_v33  ;;  %v1100_v16 = vmul.f32 %v1589_v50, %v2142_v37 }
 0x405   : > { %v1008_v9 = vpop.xlane.xlu0 %1007 }
 0x406   : > { %1592 = vrcp.f32 %v1008_v9  ;;  %v1141_v54 = vpack.c.bf16 %v1101_v3, %v1098_v15  ;;  %v1140_v44 = vpack.c.bf16 %v1100_v16, %v1097_v11 }
 0x407   : > { %v1017_v47 = vpop.xlane.xlu1 %1016  ;;  %v1591_v4 = vpop.eup %1590 }
 0x408   : > { %1172 = vmatprep.subr.bf16.mxu0 %v1141_v54  ;;  %1369 = vmatprep.subr.bf16.mxu1 %v1141_v54  ;;  %1594 = vrcp.f32 %v1017_v47  ;;  %v1107_v26 = vmul.f32 %v1591_v4, %v2378_v35  ;;  %v1106_v20 = vmul.f32 %v1591_v4, %v2379_v46 }
 0x409   : > { %1173 = vmatpush1.bf16.xpose.msra.mxu0 %v1140_v44  ;;  %1385 = vmatpush1.bf16.xpose.msra.mxu1 %v1140_v44 }
 0x40b   : > { %v232_v42 = vpop.permute.xlu1 %231 }
 0x40c   : > { %v331_v62 = vadd.f32 %v2193_v39, %v232_v42  ;;  %v333_v19 = vadd.f32 %v2199_v28, %v232_v42 }
 0x40d   : > { %v1014_v0 = vpop.xlane.xlu0 %1013 }
 0x40e   : > { %1596 = vrcp.f32 %v1014_v0 }
 0x410   : > { %v1593_v48 = vpop.eup %1592 }
 0x411   : > { %v1104_v33 = vmul.f32 %v1593_v48, %v2166_v38  ;;  %v1103_v37 = vmul.f32 %v1593_v48, %v2164_v32 }
 0x412   : > { %v1595_v60 = vpop.eup %1594 }
 0x413   : > { %v1143_v61 = vpack.c.bf16 %v1107_v26, %v1104_v33  ;;  %v1142_v2 = vpack.c.bf16 %v1106_v20, %v1103_v37  ;;  %v1113_v39 = vmul.f32 %v1595_v60, %v2172_v5  ;;  %v1112_v21 = vmul.f32 %v1595_v60, %v2168_v43 }
 0x415   : > { %v237_v30 = vpop.permute.xlu0 %236  ;;  %1174 = vmatprep.subr.bf16.mxu0 %v1143_v61  ;;  %1370 = vmatprep.subr.bf16.mxu1 %v1143_v61 }
 0x416   : > { %v337_v18 = vadd.f32 %v2205_v52, %v237_v30  ;;  %v339_v38 = vadd.f32 %v2207_v55, %v237_v30  ;;  %1175 = vmatpush1.bf16.xpose.msra.mxu0 %v1142_v2  ;;  %1386 = vmatpush1.bf16.xpose.msra.mxu1 %v1142_v2  ;;  %v1598_v55 = vld [vmem:[%s1661_s23] sm:$0xff] }
 0x417   : > { %v1209_v5 = vunpack.c.l.bf16 %v1598_v55  ;;  %v1210_v43 = vunpack.c.h.bf16 %v1598_v55 }
 0x418   : > { %v1597_v32 = vpop.eup %1596  ;;  %v347_v29 = vpack.c.bf16 %v337_v18, %v331_v62  ;;  %v348_v56 = vpack.c.bf16 %v339_v38, %v333_v19 }
 0x419   : > { %v1110_v53 = vmul.f32 %v1597_v32, %v2182_v14  ;;  %v1109_v59 = vmul.f32 %v1597_v32, %v2180_v12  ;;  %v1200_v14 = vstv %s1199_s12 }
 0x41a   : > { %1188 = vmatprep.mubr.bf16.mxu1 %v348_v56 }
 0x41b   : > { %v1145_v28 = vpack.c.bf16 %v1113_v39, %v1110_v53  ;;  %v1144_v52 = vpack.c.bf16 %v1112_v21, %v1109_v59 }
 0x41d   : > { %1176 = vmatprep.subr.bf16.mxu0 %v1145_v28  ;;  %1371 = vmatprep.subr.bf16.mxu1 %v1145_v28 }
 0x41e   : > { %1177 = vmatpush1.bf16.xpose.msra.mxu0 %v1144_v52  ;;  %1387 = vmatpush1.bf16.xpose.msra.mxu1 %v1144_v52 }
 0x425   : > { %1179 = vmatmul.mubr.bf16.vlgmr.msra.gmra.mrb[12].mxu0 %v345_v17  ;;  %1189 = vmatmul.mubr.bf16.vlgmr.msra.gmra.mrb[64].mxu1 %v347_v29 }
 0x4f8   : > { %v1180_v12 = vpop.f32.mrb[12].mxu0  ;;  %v1190_v40 = vpop.f32.mrb[64].mxu1 }
 0x4f9   : > { %v1201_v6 = vmul.f32 %v1200_v14, %v1180_v12  ;;  %v1205_v10 = vmul.f32 %v1200_v14, %v1190_v40  ;;  %v1182_v63 = vpop.f32.mrb[13].mxu0  ;;  %v1192_v7 = vpop.f32.mrb[65].mxu1 }
 0x4fa   : > { %v1202_v51 = vmul.f32 %v1200_v14, %v1182_v63  ;;  %v1206_v36 = vmul.f32 %v1200_v14, %v1192_v7  ;;  %v1184_v57 = vpop.f32.mrb[14].mxu0  ;;  %v1194_v17 = vpop.f32.mrb[66].mxu1 }
 0x4fb   : > { %v1217_v41 = vadd.f32 %v1209_v5, %v1201_v6  ;;  %v1221_v34 = vadd.f32 %v1213_v58, %v1205_v10  ;;  %v1203_v45 = vmul.f32 %v1200_v14, %v1184_v57  ;;  %v1207_v50 = vmul.f32 %v1200_v14, %v1194_v17  ;;  %v1186_v8 = vpop.f32.mrb[15].mxu0  ;;  %v1196_v15 = vpop.f32.mrb[67].mxu1 }
 0x4fc   : > { %v1218_v3 = vadd.f32 %v1210_v43, %v1202_v51  ;;  %v1222_v22 = vadd.f32 %v1214_v31, %v1206_v36  ;;  %v1204_v11 = vmul.f32 %v1200_v14, %v1186_v8  ;;  %v1208_v16 = vmul.f32 %v1200_v14, %v1196_v15 }
 0x4fd   : > { %v1219_v9 = vadd.f32 %v1211_v27, %v1203_v45  ;;  %v1223_v54 = vadd.f32 %v1215_v25, %v1207_v50 }
 0x4fe   : > { %v1352_v44 = vpack.c.bf16 %v1218_v3, %v1217_v41  ;;  %v1354_v47 = vpack.c.bf16 %v1222_v22, %v1221_v34  ;;  %v1220_v0 = vadd.f32 %v1212_v23, %v1204_v11  ;;  %v1224_v4 = vadd.f32 %v1216_v13, %v1208_v16 }
 0x500   : > { %1249 = vst [vmem:[%s198_s15] sm:$0xff] %v1352_v44  ;;  %1251 = vst [vmem:[%s198_s15 + $0x10] sm:$0xff] %v1354_v47  ;;  %v1353_v48 = vpack.c.bf16 %v1220_v0, %v1219_v9  ;;  %v1355_v33 = vpack.c.bf16 %v1224_v4, %v1223_v54 }
 0x502   : > { %1250 = vst [vmem:[%s198_s15 + $0x8] sm:$0xff] %v1353_v48  ;;  %1252 = vst [vmem:[%s198_s15 + $0x18] sm:$0xff] %v1355_v33 }
 0x503 PF: > { %s15_s17 = sadd.s32 1, %s1608_s17  }
 0x504   : > { %p12_p4 = scmp.ge.s32.totalorder %s15_s17, 4  }
 0x506   :  { %14 = sbr.rel (!%p12_p4) target bundleno = 2 (0x2), region = 66 }

// kernel: discriminator_forward.11
= control target key start
LH: loop header
LB: loop body
LE: loop exit
PB: predicated region body
PF: predicated region fallthrough
CT: control target
= control target key end

     0   :  { %s948_s9 = smov 0   ;;  %s950_s10 = smov 0   ;;  %s1084_s0 = inlined_call_operand.vmem [shape: bf16[64,512], index: 0, kind: input, shape index: {}]   ;;  %s1085_s1 = inlined_call_operand.vmem [shape: bf16[512,128], index: 1, kind: input, shape index: {}]   ;;  %s1086_s2 = inlined_call_operand.vmem [shape: bf16[64,128], index: 2, kind: output, shape index: {}]  }
   0x1   :  { %s952_s11 = smov 0  }
   0x2 LB: > { %s24_s12 = sadd.s32 1, %s927_s10  ;;  %p717_p0 = scmp.ge.s32.totalorder %s931_s11, 1  ;;  %s931_s11 = sphi %s952_s11, %s12_s11   ;;  %s927_s10 = sphi %s950_s10, %s1088_s10   ;;  %s923_s9 = sphi %s948_s9, %s1087_s9  }
   0x3   : > { %p26_p1 = scmp.ge.s32.totalorder %s24_s12, 2  ;;  %p137_p2 = scmp.lt.s32.totalorder %s931_s11, 3 }
   0x5   : > { %s1090_s12 = smov (%p26_p1, %s24_s12), 0  ;;  %p138_p3 = pnand %p717_p0, %p137_p2 }
   0x6   : > { %v865_v0 = vld [vmem:[%s1085_s1 + $0x40] sm:$0xff] (!%p138_p3)   ;;  %v869_v4 = vld [vmem:[%s1085_s1 + $0x48] sm:$0xff] (!%p138_p3)   ;;  %v873_v8 = vld [vmem:[%s1085_s1 + $0x50] sm:$0xff] (!%p138_p3)   ;;  %s718_s21 = sshll.u32 (!%p138_p3), %s923_s9, 2 }
   0x7   : > { %141 = sbr.rel (%p138_p3) target bundleno = 274 (0x112), region = 28  ;;  %v866_v1 = vld [vmem:[%s1085_s1 + $0xc0] sm:$0xff] (!%p138_p3)   ;;  %785 = vmatprep.subr.bf16.mxu0 (!%p138_p3), %v865_v0  ;;  %v870_v5 = vld [vmem:[%s1085_s1 + $0xc8] sm:$0xff] (!%p138_p3)   ;;  %v874_v9 = vld [vmem:[%s1085_s1 + $0xd0] sm:$0xff] (!%p138_p3)   ;;  %p168_p4 = scmp.lt.s32.totalorder (!%p138_p3), %s718_s21, 7 }
   0x8   : > { %v867_v2 = vld [vmem:[%s1085_s1] sm:$0xff] (!%p138_p3)   ;;  %813 = vmatprep.subr.bf16.mxu1 (!%p138_p3), %v866_v1  ;;  %v871_v6 = vld [vmem:[%s1085_s1 + $0x8] sm:$0xff] (!%p138_p3)   ;;  %v875_v10 = vld [vmem:[%s1085_s1 + $0x10] sm:$0xff] (!%p138_p3)  }
   0x9   : > { %v868_v3 = vld [vmem:[%s1085_s1 + $0x80] sm:$0xff] (!%p138_p3)   ;;  %786 = vmatpush3.bf16.msra.mxu0 (!%p138_p3), %v867_v2  ;;  %v872_v7 = vld [vmem:[%s1085_s1 + $0x88] sm:$0xff] (!%p138_p3)   ;;  %v876_v11 = vld [vmem:[%s1085_s1 + $0x90] sm:$0xff] (!%p138_p3)  }
   0xa   : > { %814 = vmatpush3.bf16.msra.mxu1 (!%p138_p3), %v868_v3  ;;  %787 = vmatprep.subr.bf16.mxu0 (!%p138_p3), %v869_v4  ;;  %v877_v12 = vld [vmem:[%s1085_s1 + $0x58] sm:$0xff] (!%p138_p3)   ;;  %v881_v16 = vld [vmem:[%s1085_s1 + $0x60] sm:$0xff] (!%p138_p3)   ;;  %v885_v20 = vld [vmem:[%s1085_s1 + $0x68] sm:$0xff] (!%p138_p3)  }
   0xb   : > { %815 = vmatprep.subr.bf16.mxu1 (!%p138_p3), %v870_v5  ;;  %v878_v13 = vld [vmem:[%s1085_s1 + $0xd8] sm:$0xff] (!%p138_p3)   ;;  %v882_v17 = vld [vmem:[%s1085_s1 + $0xe0] sm:$0xff] (!%p138_p3)   ;;  %v886_v21 = vld [vmem:[%s1085_s1 + $0xe8] sm:$0xff] (!%p138_p3)  }
   0xc   : > { %v879_v14 = vld [vmem:[%s1085_s1 + $0x18] sm:$0xff] (!%p138_p3)   ;;  %v883_v18 = vld [vmem:[%s1085_s1 + $0x20] sm:$0xff] (!%p138_p3)   ;;  %v887_v22 = vld [vmem:[%s1085_s1 + $0x28] sm:$0xff] (!%p138_p3)  }
   0xd   : > { %788 = vmatpush3.bf16.msra.mxu0 (!%p138_p3), %v871_v6  ;;  %v880_v15 = vld [vmem:[%s1085_s1 + $0x98] sm:$0xff] (!%p138_p3)   ;;  %v884_v19 = vld [vmem:[%s1085_s1 + $0xa0] sm:$0xff] (!%p138_p3)   ;;  %v888_v23 = vld [vmem:[%s1085_s1 + $0xa8] sm:$0xff] (!%p138_p3)  }
   0xe   : > { %816 = vmatpush3.bf16.msra.mxu1 %v872_v7  ;;  %789 = vmatprep.subr.bf16.mxu0 %v873_v8  ;;  %s1092_s21 = smov (!%p168_p4, %s718_s21), 7  ;;  %v889_v24 = vld [vmem:[%s1085_s1 + $0x70] sm:$0xff]   ;;  %v893_v28 = vld [vmem:[%s1085_s1 + $0x78] sm:$0xff]  }
   0xf   : > { %817 = vmatprep.subr.bf16.mxu1 %v874_v9  ;;  %v890_v25 = vld [vmem:[%s1085_s1 + $0xf0] sm:$0xff]   ;;  %s769_s19 = sshll.u32 %s1092_s21, 4  ;;  %v894_v29 = vld [vmem:[%s1085_s1 + $0xf8] sm:$0xff]   ;;  %s722_s5 = sshll.u32 %s1092_s21, 2 }
  0x10   : > { %v891_v26 = vld [vmem:[%s1085_s1 + $0x30] sm:$0xff]   ;;  %s172_s29 = scalar_lea.vmem %s1084_s0, %s769_s19  ;;  %v895_v30 = vld [vmem:[%s1085_s1 + $0x38] sm:$0xff]   ;;  %s185_s8 = scalar_lea.vmem %s1086_s2, %s722_s5 }
  0x11   : > { %790 = vmatpush3.bf16.msra.mxu0 %v875_v10  ;;  %v892_v27 = vld [vmem:[%s1085_s1 + $0xb0] sm:$0xff]   ;;  %v896_v31 = vld [vmem:[%s1085_s1 + $0xb8] sm:$0xff]  }
  0x12   : > { %818 = vmatpush3.bf16.msra.mxu1 %v876_v11  ;;  %791 = vmatprep.subr.bf16.mxu0 %v877_v12  ;;  %v897_v32 = vld [vmem:[%s172_s29] ss:$16 sps:$4 sm:$0xff]   ;;  %v899_v33 = vld [vmem:[%s172_s29 + $0x4] ss:$16 sps:$4 sm:$0xff]   ;;  %v900_v34 = vld [vmem:[%s172_s29 + $0x8] ss:$16 sps:$4 sm:$0xff]  }
  0x13   : > { %819 = vmatprep.subr.bf16.mxu1 %v878_v13  ;;  %v902_v35 = vld [vmem:[%s172_s29 + $0xc] ss:$16 sps:$4 sm:$0xff]   ;;  %524 = vmatprep.mubr.bf16.mxu0 %v899_v33  ;;  %v903_v36 = vld [vmem:[%s172_s29 + $0x24] ss:$16 sps:$4 sm:$0xff]   ;;  %v907_v38 = vld [vmem:[%s172_s29 + $0x20] ss:$16 sps:$4 sm:$0xff]  }
  0x14   : > { %573 = vmatprep.mubr.bf16.mxu1 %v902_v35  ;;  %v905_v37 = vld [vmem:[%s172_s29 + $0x2c] ss:$16 sps:$4 sm:$0xff]   ;;  %v908_v39 = vld [vmem:[%s172_s29 + $0x28] ss:$16 sps:$4 sm:$0xff]  }
  0x15   : > { %792 = vmatpush3.bf16.msra.mxu0 %v879_v14 }
  0x16   : > { %820 = vmatpush3.bf16.msra.mxu1 %v880_v15  ;;  %793 = vmatprep.subr.bf16.mxu0 %v881_v16 }
  0x17   : > { %821 = vmatprep.subr.bf16.mxu1 %v882_v17 }
  0x19   : > { %794 = vmatpush3.bf16.msra.mxu0 %v883_v18 }
  0x1a   : > { %822 = vmatpush3.bf16.msra.mxu1 %v884_v19  ;;  %795 = vmatprep.subr.bf16.mxu0 %v885_v20 }
  0x1b   : > { %823 = vmatprep.subr.bf16.mxu1 %v886_v21 }
  0x1d   : > { %796 = vmatpush3.bf16.msra.mxu0 %v887_v22 }
  0x1e   : > { %824 = vmatpush3.bf16.msra.mxu1 %v888_v23  ;;  %797 = vmatprep.subr.bf16.mxu0 %v889_v24 }
  0x1f   : > { %825 = vmatprep.subr.bf16.mxu1 %v890_v25 }
  0x21   : > { %798 = vmatpush3.bf16.msra.mxu0 %v891_v26 }
  0x22   : > { %826 = vmatpush3.bf16.msra.mxu1 %v892_v27  ;;  %799 = vmatprep.subr.bf16.mxu0 %v893_v28 }
  0x23   : > { %827 = vmatprep.subr.bf16.mxu1 %v894_v29 }
  0x25   : > { %800 = vmatpush3.bf16.msra.mxu0 %v895_v30 }
  0x26   : > { %828 = vmatpush3.bf16.msra.mxu1 %v896_v31 }
  0x28   : > { %525 = vmatmul.mubr.bf16.vlgmr.msra.gmra.mrb[0].mxu0 %v897_v32 }
  0x29   : > { %574 = vmatmul.mubr.bf16.vlgmr.msra.gmra.mrb[0].mxu1 %v900_v34  ;;  %532 = vmatprep.mubr.bf16.mxu0 %v903_v36 }
  0x2a   : > { %581 = vmatprep.mubr.bf16.mxu1 %v905_v37 }
  0x30   : > { %533 = vmatmul.mubr.bf16.gmra.mrb[4].mxu0 %v907_v38 }
  0x31   : > { %582 = vmatmul.mubr.bf16.gmra.mrb[4].mxu1 %v908_v39 }
  0xfb   : > { %v801_v40 = vpop.f32.mrb[0].mxu0 }
  0xfc   : > { %v829_v41 = vpop.f32.mrb[0].mxu1  ;;  %v802_v42 = vpop.f32.mrb[1].mxu0 }
  0xfd   : > { %v803_v43 = vadd.f32 %v802_v42, %v801_v40  ;;  %v830_v44 = vpop.f32.mrb[1].mxu1  ;;  %v804_v45 = vpop.f32.mrb[2].mxu0 }
  0xfe   : > { %v831_v46 = vadd.f32 %v830_v44, %v829_v41  ;;  %v832_v47 = vpop.f32.mrb[2].mxu1  ;;  %v805_v48 = vpop.f32.mrb[3].mxu0 }
  0xff   : > { %v806_v49 = vadd.f32 %v805_v48, %v804_v45  ;;  %v833_v50 = vpop.f32.mrb[3].mxu1 }
 0x100   : > { %v576_v51 = vadd.f32 %v831_v46, %v803_v43  ;;  %v834_v52 = vadd.f32 %v833_v50, %v832_v47 }
 0x102   : > { %v594_v53 = vmul.f32 0.2, %v576_v51  ;;  %v579_v54 = vadd.f32 %v834_v52, %v806_v49  ;;  %vm590_vm0 = vcmp.ge.f32.partialorder %v576_v51, 0.0 }
 0x103   : > { %v807_v55 = vpop.f32.mrb[4].mxu0 }
 0x104   : > { %vm591_vm1 = vcmp.ge.f32.partialorder %v579_v54, 0.0  ;;  %v595_v56 = vmul.f32 0.2, %v579_v54  ;;  %v835_v57 = vpop.f32.mrb[4].mxu1  ;;  %v808_v58 = vpop.f32.mrb[5].mxu0  ;;  %v598_v62 = vsel %vm590_vm0, %v576_v51, %v594_v53 }
 0x105   : > { %v809_v59 = vadd.f32 %v808_v58, %v807_v55  ;;  %v836_v60 = vpop.f32.mrb[5].mxu1  ;;  %v810_v61 = vpop.f32.mrb[6].mxu0 }
 0x106   : > { %v599_v63 = vsel %vm591_vm1, %v579_v54, %v595_v56  ;;  %v837_v0 = vadd.f32 %v836_v60, %v835_v57  ;;  %v838_v1 = vpop.f32.mrb[6].mxu1  ;;  %v811_v2 = vpop.f32.mrb[7].mxu0 }
 0x107   : > { %v777_v3 = vpack.c.bf16 %v599_v63, %v598_v62  ;;  %v812_v4 = vadd.f32 %v811_v2, %v810_v61  ;;  %v839_v5 = vpop.f32.mrb[7].mxu1 }
 0x108   : > { %v584_v6 = vadd.f32 %v837_v0, %v809_v59  ;;  %v840_v7 = vadd.f32 %v839_v5, %v838_v1 }
 0x109   : > { %778 = vst [vmem:[%s185_s8] sm:$0xff] %v777_v3  }
 0x10a   : > { %v596_v8 = vmul.f32 0.2, %v584_v6  ;;  %v587_v9 = vadd.f32 %v840_v7, %v812_v4  ;;  %vm592_vm2 = vcmp.ge.f32.partialorder %v584_v6, 0.0 }
 0x10c   : > { %vm593_vm3 = vcmp.ge.f32.partialorder %v587_v9, 0.0  ;;  %v597_v10 = vmul.f32 0.2, %v587_v9  ;;  %v600_v11 = vsel %vm592_vm2, %v584_v6, %v596_v8 }
 0x10e   : > { %v601_v12 = vsel %vm593_vm3, %v587_v9, %v597_v10 }
 0x10f   : > { %v782_v13 = vpack.c.bf16 %v601_v12, %v600_v11 }
 0x111   : > { %784 = vst [vmem:[%s185_s8 + $0x8] sm:$0xff] %v782_v13  }
 0x112 PF: > { %s12_s11 = sadd.s32 1, %s931_s11   ;;  %s1087_s9 = smov %s927_s10 }
 0x113   : > { %p9_p5 = scmp.ge.s32.totalorder %s12_s11, 4   ;;  %s1088_s10 = smov %s1090_s12 }
 0x115   :  { %11 = sbr.rel (!%p9_p5) target bundleno = 2 (0x2), region = 61 }

// kernel: discriminator_forward.12
= control target key start
LH: loop header
LB: loop body
LE: loop exit
PB: predicated region body
PF: predicated region fallthrough
CT: control target
= control target key end

     0   :  { %s1052_s17 = smov 0   ;;  %s1250_s0 = inlined_call_operand.vmem [shape: bf16[2,64,64], index: 0, kind: input, shape index: {}]   ;;  %s1251_s1 = inlined_call_operand.vmem [shape: bf16[80,64], index: 1, kind: input, shape index: {}]   ;;  %s1252_s2 = inlined_call_operand.vmem [shape: f32[80,1], index: 2, kind: input, shape index: {}]   ;;  %s1253_s3 = inlined_call_operand.<no memory space> [shape: f32[1], index: 3, kind: input, shape index: {}]   ;;  %s1254_s4 = inlined_call_operand.vmem [shape: bf16[2,64,64], index: 4, kind: output, shape index: {}]  }
   0x1   :  { %9 = sst [smem:[#allocation2]] %s1253_s3 }
   0x2 LB: > { %s823_s18 = sadd.s32 4294967295, %s1019_s17   ;;  %p827_p0 = scmp.ge.s32.totalorder %s1019_s17, 1  ;;  %s1019_s17 = sphi %s1052_s17, %s15_s17  }
   0x3   : > { %p163_p1 = scmp.lt.s32.totalorder %s1019_s17, 3 }
   0x5   : > { %p164_p2 = pnand %p827_p0, %p163_p1 }
   0x6   : > { %p189_p3 = scmp.lt.s32.totalorder (!%p164_p2), %s823_s18, 1  ;;  %v1021_v0 = vmov (!%p164_p2), 0.0   ;;  %vm1022_vm0 = vmmov (!%p164_p2), 0   ;;  %v218_v1 = vld [vmem:[%s1252_s2] sm:$0xff] (!%p164_p2)  ;;  %v1023_v2 = vmov (!%p164_p2), 0   ;;  %v219_v3 = vld [vmem:[%s1252_s2 + $0x8] sm:$0xff] (!%p164_p2) }
   0x7   : > { %167 = sbr.rel (%p164_p2) target bundleno = 1151 (0x47f), region = 36  ;;  %896 = vmatprep.subr.bf16.mxu0 (!%p164_p2), %v1021_v0  ;;  %904 = vmatprep.mubr.msk.bf16.mxu0 (!%p164_p2), %vm1022_vm0, %v1021_v0  ;;  %v972_v8 = vld [vmem:[%s1251_s1] sm:$0xff] (!%p164_p2)   ;;  %vm327_vm1 = vcmask (!%p164_p2), 523264   ;;  %vm451_vm2 = vcmask (!%p164_p2), 1043456   ;;  %vm438_vm3 = vcmask (!%p164_p2), 64512   ;;  %v973_v24 = vld [vmem:[%s1251_s1 + $0x8] sm:$0xff] (!%p164_p2)  }
   0x8   : > { %966 = vset.pattern.permute.xlu0 (!%p164_p2), %v1023_v2  ;;  %v974_v25 = vld [vmem:[%s1251_s1 + $0x10] sm:$0xff] (!%p164_p2)   ;;  %v975_v26 = vld [vmem:[%s1251_s1 + $0x18] sm:$0xff] (!%p164_p2)   ;;  %v976_v27 = vld [vmem:[%s1251_s1 + $0x20] sm:$0xff] (!%p164_p2)   ;;  %s701_s28 = sld [smem:[#allocation2]] (!%p164_p2)  ;;  %vm759_vm4 = vcmask (!%p164_p2), 519168  }
   0x9   : > { %230 = vperm.xlu0 (!%p164_p2), %966, %v218_v1  }
   0xd   : > { %235 = vperm.xlu0 (!%p164_p2), %966, %v219_v3  }
   0xe   : > { %s1256_s18 = smov (!%p189_p3, %s823_s18), 1 }
   0xf   : > { %s864_s20 = sshll.u32 %s1256_s18, 5 }
  0x10   : > { %s193_s25 = scalar_lea.vmem %s1250_s0, %s864_s20  ;;  %s1225_s5 = scalar_lea.vmem %s1254_s4, %s864_s20 }
  0x11   : > { %v1075_v4 = vld [vmem:[%s193_s25] sm:$0xff]   ;;  %v1077_v5 = vld [vmem:[%s193_s25 + $0x8] sm:$0xff]   ;;  %v1080_v6 = vld [vmem:[%s193_s25 + $0x10] sm:$0xff]  }
  0x12   : > { %897 = vmatpush3.bf16.msra.mxu0 %v1075_v4  ;;  %v1083_v7 = vld [vmem:[%s193_s25 + $0x18] sm:$0xff]  }
  0x13   : > { %898 = vmatprep.subr.bf16.mxu0 %v1021_v0 }
  0x16   : > { %899 = vmatpush3.bf16.msra.mxu0 %v1077_v5 }
  0x17   : > { %900 = vmatprep.subr.bf16.mxu0 %v1021_v0 }
  0x1a   : > { %901 = vmatpush3.bf16.msra.mxu0 %v1080_v6 }
  0x1b   : > { %902 = vmatprep.subr.bf16.mxu0 %v1021_v0 }
  0x1e   : > { %903 = vmatpush3.bf16.msra.mxu0 %v1083_v7 }
  0x21   : > { %905 = vmatmul.mubr.msk.bf16.vlgmr.msra.gmra.mrb[0].mxu0 %vm327_vm1, %v972_v8 }
  0x22   : > { %908 = vmatprep.mubr.msk.bf16.mxu0 %vm1022_vm0, %v1021_v0 }
  0x29   : > { %909 = vmatmul.mubr.msk.bf16.gmra.mrb[4].mxu0 %vm327_vm1, %v973_v24  ;;  %v220_v24 = vld [vmem:[%s1252_s2 + $0x10] sm:$0xff] }
  0x2a   : > { %912 = vmatprep.mubr.msk.bf16.mxu0 %vm1022_vm0, %v1021_v0 }
  0x31   : > { %913 = vmatmul.mubr.msk.bf16.gmra.mrb[8].mxu0 %vm327_vm1, %v974_v25 }
  0x32   : > { %916 = vmatprep.mubr.msk.bf16.mxu0 %vm1022_vm0, %v1021_v0 }
  0x39   : > { %917 = vmatmul.mubr.msk.bf16.gmra.mrb[12].mxu0 %vm327_vm1, %v975_v26  ;;  %v221_v26 = vld [vmem:[%s1252_s2 + $0x18] sm:$0xff] }
  0x3a   : > { %920 = vmatprep.mubr.msk.bf16.mxu0 %vm1022_vm0, %v1021_v0 }
  0x41   : > { %921 = vmatmul.mubr.msk.bf16.gmra.mrb[16].mxu0 %vm327_vm1, %v976_v27 }
  0x88   : > { %v231_v9 = vpop.permute.xlu0 %230 }
  0x8c   : > { %v236_v13 = vpop.permute.xlu0 %235 }
  0xf4   : > { %v377_v10 = vpop.f32.mrb[0].mxu0 }
  0xf5   : > { %v906_v11 = vpop.f32.mrb[1].mxu0  ;;  %v378_v12 = vadd.f32 %v377_v10, %v231_v9 }
  0xf6   : > { %v380_v14 = vpop.f32.mrb[2].mxu0 }
  0xf7   : > { %v381_v15 = vadd.f32 %v380_v14, %v236_v13  ;;  %v907_v16 = vpop.f32.mrb[3].mxu0  ;;  %v416_v17 = vpack.c.bf16 %v378_v12, %v378_v12 }
  0xf9   : > { %v417_v18 = vpack.c.bf16 %v381_v15, %v381_v15  ;;  %422 = vxpose.xlu1.c.b16.start.end [1/1] (short) (narrow) %v416_v17, 64 }
  0xfb   : > { %950 = vmatprep.subr.msk.bf16.mxu1 %vm451_vm2, %v417_v18  ;;  %v453_v19 = vsel %vm451_vm2, %v417_v18, 0 }
  0xfc   : > { %925 = vmatpush3.bf16.msra.mxu1 %v453_v19  ;;  %v1154_v25 = vpop.f32.mrb[4].mxu0 }
  0xfd   : > { %967 = vset.pattern.permute.xlu1 %v1023_v2  ;;  %v910_v27 = vpop.f32.mrb[5].mxu0 }
 0x15f   : > { %v430_v20 = vpop.trf.xlu1 }
 0x160   : > { %926 = vmatprep.mubr.msk.bf16.mxu1 %vm438_vm3, %v430_v20 }
 0x163   : > { %v431_v21 = vpop.trf.xlu1 }
 0x164   : > { %927 = vmatmul.mubr.msk.bf16.vlgmr.msra.gmra.mrb[0].mxu1 %vm438_vm3, %v431_v21 }
 0x167   : > { %v432_v22 = vpop.trf.xlu1 }
 0x168   : > { %930 = vmatprep.mubr.msk.bf16.mxu1 %vm438_vm3, %v432_v22 }
 0x16b   : > { %v433_v23 = vpop.trf.xlu1 }
 0x16c   : > { %931 = vmatmul.mubr.msk.bf16.gmra.mrb[4].mxu1 %vm438_vm3, %v433_v23 }
 0x237   : > { %v928_v28 = vpop.f32.mrb[0].mxu1 }
 0x238   : > { %v489_v29 = vpop.f32.mrb[1].mxu1  ;;  %v526_v34 = vsel %vm327_vm1, %v928_v28, -inf }
 0x239   : > { %v929_v30 = vpop.f32.mrb[2].mxu1  ;;  %v520_v31 = vsel %vm327_vm1, %v489_v29, -inf }
 0x23a   : > { %521 = vmax.xlane.f32.xlu1 %v520_v31  ;;  %v492_v32 = vpop.f32.mrb[3].mxu1  ;;  %v529_v38 = vsel %vm327_vm1, %v929_v30, -inf }
 0x23b   : > { %v523_v33 = vsel %vm327_vm1, %v492_v32, -inf }
 0x23c   : > { %524 = vmax.xlane.f32.xlu0 %v523_v33 }
 0x23e   : > { %527 = vmax.xlane.f32.xlu1 %v526_v34 }
 0x23f   : > { %v932_v35 = vpop.f32.mrb[4].mxu1 }
 0x240   : > { %v505_v36 = vpop.f32.mrb[5].mxu1  ;;  %v538_v43 = vsel %vm327_vm1, %v932_v35, -inf }
 0x241   : > { %v933_v37 = vpop.f32.mrb[6].mxu1  ;;  %v532_v41 = vsel %vm327_vm1, %v505_v36, -inf }
 0x242   : > { %530 = vmax.xlane.f32.xlu1 %v529_v38  ;;  %v508_v39 = vpop.f32.mrb[7].mxu1  ;;  %v541_v42 = vsel %vm327_vm1, %v933_v37, -inf  ;;  %v226_v38 = vld [vmem:[%s1252_s2 + $0x40] sm:$0xff] }
 0x243   : > { %v535_v40 = vsel %vm327_vm1, %v508_v39, -inf }
 0x244   : > { %536 = vmax.xlane.f32.xlu0 %v535_v40 }
 0x246   : > { %533 = vmax.xlane.f32.xlu1 %v532_v41 }
 0x248   : > { %542 = vmax.xlane.f32.xlu0 %v541_v42  ;;  %v225_v42 = vld [vmem:[%s1252_s2 + $0x38] sm:$0xff] }
 0x24a   : > { %539 = vmax.xlane.f32.xlu1 %v538_v43 }
 0x2c7   : > { %v522_v44 = vpop.xlane.xlu1 %521 }
 0x2c8   : > { %v544_v45 = vsub.f32 %v489_v29, %v522_v44 }
 0x2c9   : > { %v525_v46 = vpop.xlane.xlu0 %524 }
 0x2ca   : > { %v552_v47 = vmul.f32 1.442695, %v544_v45  ;;  %v545_v48 = vsub.f32 %v492_v32, %v525_v46  ;;  %v224_v32 = vld [vmem:[%s1252_s2 + $0x30] sm:$0xff]  ;;  %v227_v45 = vld [vmem:[%s1252_s2 + $0x48] sm:$0xff] }
 0x2cb   : > { %v528_v49 = vpop.xlane.xlu1 %527 }
 0x2cc   : > { %981 = vpow2.f32 %v552_v47  ;;  %v554_v50 = vmul.f32 1.442695, %v545_v48  ;;  %v546_v51 = vsub.f32 %v928_v28, %v528_v49  ;;  %v388_v28 = vpop.f32.mrb[6].mxu0 }
 0x2cd   : > { %v911_v29 = vpop.f32.mrb[7].mxu0 }
 0x2ce   : > { %983 = vpow2.f32 %v554_v50  ;;  %v556_v52 = vmul.f32 1.442695, %v546_v51  ;;  %v1162_v31 = vpop.f32.mrb[8].mxu0 }
 0x2cf   : > { %v531_v53 = vpop.xlane.xlu1 %530  ;;  %v914_v33 = vpop.f32.mrb[9].mxu0 }
 0x2d0   : > { %985 = vpow2.f32 %v556_v52  ;;  %v547_v54 = vsub.f32 %v929_v30, %v531_v53  ;;  %v222_v30 = vld [vmem:[%s1252_s2 + $0x20] sm:$0xff]  ;;  %v1167_v34 = vpop.f32.mrb[10].mxu0 }
 0x2d1   : > { %v537_v55 = vpop.xlane.xlu0 %536 }
 0x2d2   : > { %v558_v56 = vmul.f32 1.442695, %v547_v54  ;;  %v549_v57 = vsub.f32 %v508_v39, %v537_v55 }
 0x2d3   : > { %v534_v58 = vpop.xlane.xlu1 %533 }
 0x2d4   : > { %987 = vpow2.f32 %v558_v56  ;;  %v562_v59 = vmul.f32 1.442695, %v549_v57  ;;  %v548_v62 = vsub.f32 %v505_v36, %v534_v58  ;;  %v223_v36 = vld [vmem:[%s1252_s2 + $0x28] sm:$0xff] }
 0x2d5   : > { %v543_v60 = vpop.xlane.xlu0 %542 }
 0x2d6   : > { %v1119_v61 = vpop.eup %981  ;;  %989 = vpow2.f32 %v562_v59  ;;  %v551_v63 = vsub.f32 %v933_v37, %v543_v60  ;;  %v560_v11 = vmul.f32 1.442695, %v548_v62 }
 0x2d7   : > { %v540_v0 = vpop.xlane.xlu1 %539  ;;  %v568_v1 = vsel %vm327_vm1, %v1119_v61, 0.0 }
 0x2d8   : > { %v1123_v2 = vpop.eup %983  ;;  %v566_v3 = vmul.f32 1.442695, %v551_v63  ;;  %v550_v8 = vsub.f32 %v932_v35, %v540_v0  ;;  %569 = vadd.xlane.f32.xlu1 %v568_v1  ;;  %v915_v35 = vpop.f32.mrb[11].mxu0 }
 0x2d9   : > { %v571_v9 = vsel %vm327_vm1, %v1123_v2, 0.0  ;;  %v1172_v37 = vpop.f32.mrb[12].mxu0 }
 0x2da   : > { %v1127_v10 = vpop.eup %985  ;;  %991 = vpow2.f32 %v566_v3  ;;  %v564_v12 = vmul.f32 1.442695, %v550_v8  ;;  %572 = vadd.xlane.f32.xlu0 %v571_v9  ;;  %v918_v39 = vpop.f32.mrb[13].mxu0 }
 0x2db   : > { %v574_v13 = vsel %vm327_vm1, %v1127_v10, 0.0  ;;  %v1177_v40 = vpop.f32.mrb[14].mxu0 }
 0x2dc   : > { %993 = vpow2.f32 %v564_v12  ;;  %575 = vadd.xlane.f32.xlu1 %v574_v13  ;;  %v919_v41 = vpop.f32.mrb[15].mxu0 }
 0x2dd   : > { %995 = vpow2.f32 %v560_v11  ;;  %v1182_v43 = vpop.f32.mrb[16].mxu0 }
 0x2de   : > { %v1131_v14 = vpop.eup %987  ;;  %v922_v44 = vpop.f32.mrb[17].mxu0 }
 0x2df   : > { %v577_v15 = vsel %vm327_vm1, %v1131_v14, 0.0  ;;  %v1187_v46 = vpop.f32.mrb[18].mxu0 }
 0x2e0   : > { %v1135_v16 = vpop.eup %989  ;;  %578 = vadd.xlane.f32.xlu0 %v577_v15  ;;  %v923_v47 = vpop.f32.mrb[19].mxu0 }
 0x2e1   : > { %v583_v17 = vsel %vm327_vm1, %v1135_v16, 0.0  ;;  %v712_v47 = vunpack.c.h.bf16 %v1075_v4 }
 0x2e4   : > { %v1139_v18 = vpop.eup %991  ;;  %584 = vadd.xlane.f32.xlu0 %v583_v17 }
 0x2e5   : > { %v589_v21 = vsel %vm327_vm1, %v1139_v18, 0.0 }
 0x2e6   : > { %v1141_v19 = vpop.eup %993 }
 0x2e7   : > { %v586_v20 = vsel %vm327_vm1, %v1141_v19, 0.0  ;;  %v1147_v22 = vpop.eup %995 }
 0x2e8   : > { %587 = vadd.xlane.f32.xlu1 %v586_v20  ;;  %590 = vadd.xlane.f32.xlu0 %v589_v21  ;;  %v580_v23 = vsel %vm327_vm1, %v1147_v22, 0.0 }
 0x2ec   : > { %581 = vadd.xlane.f32.xlu1 %v580_v23 }
 0x2fd   : > { %240 = vperm.xlu1 %967, %v220_v24  }
 0x2fe   : > { %245 = vperm.xlu0 %966, %v221_v26  }
 0x301   : > { %250 = vperm.xlu1 %967, %v222_v30  }
 0x302   : > { %260 = vperm.xlu0 %966, %v224_v32  }
 0x305   : > { %255 = vperm.xlu1 %967, %v223_v36  }
 0x306   : > { %270 = vperm.xlu0 %966, %v226_v38  }
 0x309   : > { %265 = vperm.xlu1 %967, %v225_v42   ;;  %v711_v42 = vunpack.c.l.bf16 %v1075_v4 }
 0x30d   : > { %275 = vperm.xlu1 %967, %v227_v45  }
 0x365   : > { %v570_v48 = vpop.xlane.xlu1 %569 }
 0x366   : > { %997 = vrcp.f32 %v570_v48 }
 0x367   : > { %v573_v49 = vpop.xlane.xlu0 %572 }
 0x368   : > { %999 = vrcp.f32 %v573_v49 }
 0x369   : > { %v576_v50 = vpop.xlane.xlu1 %575 }
 0x36a   : > { %1001 = vrcp.f32 %v576_v50 }
 0x36d   : > { %v579_v51 = vpop.xlane.xlu0 %578 }
 0x36e   : > { %1003 = vrcp.f32 %v579_v51 }
 0x370   : > { %v998_v52 = vpop.eup %997 }
 0x371   : > { %v585_v53 = vpop.xlane.xlu0 %584  ;;  %v593_v55 = vmul.f32 %v998_v52, %v1119_v61 }
 0x372   : > { %v1000_v54 = vpop.eup %999  ;;  %1005 = vrcp.f32 %v585_v53 }
 0x373   : > { %v595_v56 = vmul.f32 %v1000_v54, %v1123_v2 }
 0x374   : > { %v1002_v60 = vpop.eup %1001 }
 0x375   : > { %v588_v57 = vpop.xlane.xlu1 %587  ;;  %v591_v58 = vpop.xlane.xlu0 %590  ;;  %v608_v59 = vpack.c.bf16 %v595_v56, %v593_v55  ;;  %v597_v1 = vmul.f32 %v1002_v60, %v1127_v10 }
 0x376   : > { %1007 = vrcp.f32 %v588_v57 }
 0x377   : > { %951 = vmatprep.subr.msk.bf16.mxu1 %vm327_vm1, %v608_v59  ;;  %v625_v62 = vsel %vm327_vm1, %v608_v59, 0  ;;  %1009 = vrcp.f32 %v591_v58  ;;  %v717_v58 = vunpack.c.l.bf16 %v1083_v7 }
 0x378   : > { %v1004_v63 = vpop.eup %1003  ;;  %935 = vmatpush3.bf16.xpose.msra.mxu1 %v625_v62  ;;  %v715_v62 = vunpack.c.l.bf16 %v1080_v6 }
 0x379   : > { %v582_v0 = vpop.xlane.xlu1 %581  ;;  %v599_v61 = vmul.f32 %v1004_v63, %v1131_v14 }
 0x37a   : > { %1011 = vrcp.f32 %v582_v0 }
 0x37b   : > { %v609_v2 = vpack.c.bf16 %v599_v61, %v597_v1  ;;  %v718_v1 = vunpack.c.h.bf16 %v1083_v7 }
 0x37c   : > { %v1006_v13 = vpop.eup %1005 }
 0x37d   : > { %v241_v3 = vpop.permute.xlu1 %240  ;;  %952 = vmatprep.subr.msk.bf16.mxu1 %vm327_vm1, %v609_v2  ;;  %v246_v8 = vpop.permute.xlu0 %245  ;;  %v628_v12 = vsel %vm327_vm1, %v609_v2, 0 }
 0x37e   : > { %v386_v9 = vadd.f32 %v1154_v25, %v241_v3  ;;  %v389_v11 = vadd.f32 %v388_v28, %v246_v8  ;;  %v603_v25 = vmul.f32 %v1006_v13, %v1135_v16  ;;  %v716_v3 = vunpack.c.h.bf16 %v1080_v6 }
 0x380   : > { %v418_v15 = vpack.c.bf16 %v389_v11, %v386_v9  ;;  %937 = vmatpush3.bf16.xpose.msra.mxu1 %v628_v12  ;;  %v1008_v17 = vpop.eup %1007 }
 0x381   : > { %v251_v20 = vpop.permute.xlu1 %250  ;;  %v1010_v21 = vpop.eup %1009  ;;  %v605_v27 = vmul.f32 %v1008_v17, %v1141_v19 }
 0x382   : > { %942 = vmatprep.mubr.msk.bf16.mxu1 %vm327_vm1, %v418_v15  ;;  %v394_v14 = vadd.f32 %v1162_v31, %v251_v20  ;;  %v261_v23 = vpop.permute.xlu0 %260  ;;  %v607_v28 = vmul.f32 %v1010_v21, %v1139_v18 }
 0x383   : > { %v402_v36 = vadd.f32 %v1172_v37, %v261_v23  ;;  %v702_v37 = vstv %s701_s28 }
 0x384   : > { %v1012_v10 = vpop.eup %1011  ;;  %v611_v31 = vpack.c.bf16 %v607_v28, %v605_v27 }
 0x385   : > { %v256_v24 = vpop.permute.xlu1 %255  ;;  %v601_v26 = vmul.f32 %v1012_v10, %v1147_v22 }
 0x386   : > { %v397_v29 = vadd.f32 %v1167_v34, %v256_v24  ;;  %v271_v16 = vpop.permute.xlu0 %270  ;;  %v634_v41 = vsel %vm327_vm1, %v611_v31, 0 }
 0x387   : > { %v610_v30 = vpack.c.bf16 %v603_v25, %v601_v26  ;;  %v410_v34 = vadd.f32 %v1182_v43, %v271_v16 }
 0x388   : > { %v419_v32 = vpack.c.bf16 %v397_v29, %v394_v14 }
 0x389   : > { %v266_v33 = vpop.permute.xlu1 %265  ;;  %953 = vmatprep.subr.msk.bf16.mxu1 %vm327_vm1, %v610_v30  ;;  %v631_v35 = vsel %vm327_vm1, %v610_v30, 0 }
 0x38a   : > { %v405_v22 = vadd.f32 %v1177_v40, %v266_v33  ;;  %939 = vmatpush3.bf16.xpose.msra.mxu1 %v631_v35  ;;  %v713_v40 = vunpack.c.l.bf16 %v1077_v5 }
 0x38b   : > { %954 = vmatprep.subr.msk.bf16.mxu1 %vm327_vm1, %v611_v31 }
 0x38c   : > { %v420_v19 = vpack.c.bf16 %v405_v22, %v402_v36 }
 0x38d   : > { %v276_v18 = vpop.permute.xlu1 %275 }
 0x38e   : > { %v413_v38 = vadd.f32 %v1187_v46, %v276_v18  ;;  %v714_v46 = vunpack.c.h.bf16 %v1077_v5 }
 0x390   : > { %v421_v39 = vpack.c.bf16 %v413_v38, %v410_v34 }
 0x392   : > { %941 = vmatpush3.bf16.xpose.msra.mxu1 %v634_v41 }
 0x399   : > { %943 = vmatmul.mubr.msk.bf16.vlgmr.msra.gmra.mrb[8].mxu1 %vm327_vm1, %v419_v32 }
 0x39a   : > { %946 = vmatprep.mubr.msk.bf16.mxu1 %vm327_vm1, %v420_v19 }
 0x3a1   : > { %947 = vmatmul.mubr.msk.bf16.gmra.mrb[12].mxu1 %vm327_vm1, %v421_v39 }
 0x46c   : > { %v944_v43 = vpop.f32.mrb[8].mxu1 }
 0x46d   : > { %v705_v44 = vmul.f32 %v944_v43, %v702_v37  ;;  %v670_v45 = vpop.f32.mrb[9].mxu1 }
 0x46e   : > { %v703_v48 = vmul.f32 %v702_v37, %v670_v45  ;;  %v945_v49 = vpop.f32.mrb[10].mxu1 }
 0x46f   : > { %v721_v50 = vadd.f32 %v713_v40, %v705_v44  ;;  %v706_v51 = vmul.f32 %v945_v49, %v702_v37  ;;  %v673_v52 = vpop.f32.mrb[11].mxu1 }
 0x470   : > { %v719_v53 = vadd.f32 %v711_v42, %v703_v48  ;;  %v704_v54 = vmul.f32 %v702_v37, %v673_v52 }
 0x471   : > { %v868_v5 = vpack.c.bf16 %v721_v50, %v721_v50  ;;  %v722_v4 = vadd.f32 %v714_v46, %v706_v51 }
 0x472   : > { %v866_v55 = vpack.c.bf16 %v719_v53, %v719_v53  ;;  %v720_v56 = vadd.f32 %v712_v47, %v704_v54 }
 0x473   : > { %762 = vst.msk [vmem:[%s1225_s5 + $0x8] sm:$0xf] %vm759_vm4, %v868_v5  ;;  %v869_v57 = vpack.c.bf16 %v722_v4, %v722_v4 }
 0x474   : > { %760 = vst.msk [vmem:[%s1225_s5] sm:$0xf] %vm759_vm4, %v866_v55  ;;  %v867_v59 = vpack.c.bf16 %v720_v56, %v720_v56  ;;  %v948_v60 = vpop.f32.mrb[12].mxu1 }
 0x475   : > { %763 = vst.msk [vmem:[%s1225_s5 + $0xc] sm:$0xf] %vm759_vm4, %v869_v57  ;;  %v709_v63 = vmul.f32 %v948_v60, %v702_v37  ;;  %v686_v0 = vpop.f32.mrb[13].mxu1 }
 0x476   : > { %761 = vst.msk [vmem:[%s1225_s5 + $0x4] sm:$0xf] %vm759_vm4, %v867_v59  ;;  %v707_v61 = vmul.f32 %v702_v37, %v686_v0  ;;  %v949_v2 = vpop.f32.mrb[14].mxu1 }
 0x477   : > { %v725_v8 = vadd.f32 %v717_v58, %v709_v63  ;;  %v710_v9 = vmul.f32 %v949_v2, %v702_v37  ;;  %v689_v11 = vpop.f32.mrb[15].mxu1 }
 0x478   : > { %v723_v12 = vadd.f32 %v715_v62, %v707_v61  ;;  %v708_v13 = vmul.f32 %v702_v37, %v689_v11 }
 0x479   : > { %v872_v15 = vpack.c.bf16 %v725_v8, %v725_v8  ;;  %v726_v17 = vadd.f32 %v718_v1, %v710_v9 }
 0x47a   : > { %v870_v20 = vpack.c.bf16 %v723_v12, %v723_v12  ;;  %v724_v21 = vadd.f32 %v716_v3, %v708_v13 }
 0x47b   : > { %766 = vst.msk [vmem:[%s1225_s5 + $0x18] sm:$0xf] %vm759_vm4, %v872_v15  ;;  %v873_v7 = vpack.c.bf16 %v726_v17, %v726_v17 }
 0x47c   : > { %764 = vst.msk [vmem:[%s1225_s5 + $0x10] sm:$0xf] %vm759_vm4, %v870_v20  ;;  %v871_v10 = vpack.c.bf16 %v724_v21, %v724_v21 }
 0x47d   : > { %767 = vst.msk [vmem:[%s1225_s5 + $0x1c] sm:$0xf] %vm759_vm4, %v873_v7 }
 0x47e   : > { %765 = vst.msk [vmem:[%s1225_s5 + $0x14] sm:$0xf] %vm759_vm4, %v871_v10 }
 0x47f PF: > { %s15_s17 = sadd.s32 1, %s1019_s17  }
 0x480   : > { %p12_p4 = scmp.ge.s32.totalorder %s15_s17, 4  }
 0x482   :  { %14 = sbr.rel (!%p12_p4) target bundleno = 2 (0x2), region = 66 }

// kernel: discriminator_forward.13
= control target key start
LH: loop header
LB: loop body
LE: loop exit
PB: predicated region body
PF: predicated region fallthrough
CT: control target
= control target key end

     0   :  { %s1720_s9 = smov 0   ;;  %s1722_s10 = smov 0   ;;  %s2022_s0 = inlined_call_operand.vmem [shape: bf16[128,1024], index: 0, kind: input, shape index: {}]   ;;  %s2023_s1 = inlined_call_operand.vmem [shape: bf16[1024,32], index: 1, kind: input, shape index: {}]   ;;  %s2024_s2 = inlined_call_operand.vmem [shape: bf16[128,32], index: 2, kind: output, shape index: {}]  }
   0x1   :  { %s1724_s11 = smov 0  }
   0x2 LB: > { %s24_s12 = sadd.s32 1, %s1699_s10  ;;  %p1312_p0 = scmp.ge.s32.totalorder %s1703_s11, 1  ;;  %s1703_s11 = sphi %s1724_s11, %s12_s11   ;;  %s1699_s10 = sphi %s1722_s10, %s2026_s10   ;;  %s1695_s9 = sphi %s1720_s9, %s2025_s9  }
   0x3   : > { %p26_p1 = scmp.ge.s32.totalorder %s24_s12, 2  ;;  %p137_p2 = scmp.lt.s32.totalorder %s1703_s11, 3 }
   0x5   : > { %s2028_s12 = smov (%p26_p1, %s24_s12), 0  ;;  %p138_p3 = pnand %p1312_p0, %p137_p2 }
   0x6   : > { %v1617_v0 = vld [vmem:[%s2023_s1 + $0x40] sm:$0xff] (!%p138_p3)   ;;  %v1621_v4 = vld [vmem:[%s2023_s1 + $0x48] sm:$0xff] (!%p138_p3)   ;;  %v1625_v8 = vld [vmem:[%s2023_s1 + $0x50] sm:$0xff] (!%p138_p3)   ;;  %s1313_s21 = sshll.u32 (!%p138_p3), %s1695_s9, 3  ;;  %vm1208_vm1 = vcmask (!%p138_p3), 257024  }
   0x7   : > { %141 = sbr.rel (%p138_p3) target bundleno = 323 (0x143), region = 28  ;;  %v1618_v1 = vld [vmem:[%s2023_s1 + $0xc0] sm:$0xff] (!%p138_p3)   ;;  %1433 = vmatprep.subr.bf16.mxu0 (!%p138_p3), %v1617_v0  ;;  %v1622_v5 = vld [vmem:[%s2023_s1 + $0xc8] sm:$0xff] (!%p138_p3)   ;;  %v1626_v9 = vld [vmem:[%s2023_s1 + $0xd0] sm:$0xff] (!%p138_p3)   ;;  %p168_p4 = scmp.lt.s32.totalorder (!%p138_p3), %s1313_s21, 15 }
   0x8   : > { %v1619_v2 = vld [vmem:[%s2023_s1] sm:$0xff] (!%p138_p3)   ;;  %1473 = vmatprep.subr.bf16.mxu1 (!%p138_p3), %v1618_v1  ;;  %v1623_v6 = vld [vmem:[%s2023_s1 + $0x8] sm:$0xff] (!%p138_p3)   ;;  %v1627_v10 = vld [vmem:[%s2023_s1 + $0x10] sm:$0xff] (!%p138_p3)  }
   0x9   : > { %v1620_v3 = vld [vmem:[%s2023_s1 + $0x80] sm:$0xff] (!%p138_p3)   ;;  %1434 = vmatpush3.bf16.msra.mxu0 (!%p138_p3), %v1619_v2  ;;  %v1624_v7 = vld [vmem:[%s2023_s1 + $0x88] sm:$0xff] (!%p138_p3)   ;;  %v1628_v11 = vld [vmem:[%s2023_s1 + $0x90] sm:$0xff] (!%p138_p3)  }
   0xa   : > { %1474 = vmatpush3.bf16.msra.mxu1 (!%p138_p3), %v1620_v3  ;;  %1435 = vmatprep.subr.bf16.mxu0 (!%p138_p3), %v1621_v4  ;;  %v1629_v12 = vld [vmem:[%s2023_s1 + $0x58] sm:$0xff] (!%p138_p3)   ;;  %v1633_v16 = vld [vmem:[%s2023_s1 + $0x60] sm:$0xff] (!%p138_p3)   ;;  %v1637_v20 = vld [vmem:[%s2023_s1 + $0x68] sm:$0xff] (!%p138_p3)  }
   0xb   : > { %1475 = vmatprep.subr.bf16.mxu1 (!%p138_p3), %v1622_v5  ;;  %v1630_v13 = vld [vmem:[%s2023_s1 + $0xd8] sm:$0xff] (!%p138_p3)   ;;  %v1634_v17 = vld [vmem:[%s2023_s1 + $0xe0] sm:$0xff] (!%p138_p3)   ;;  %v1638_v21 = vld [vmem:[%s2023_s1 + $0xe8] sm:$0xff] (!%p138_p3)  }
   0xc   : > { %v1631_v14 = vld [vmem:[%s2023_s1 + $0x18] sm:$0xff] (!%p138_p3)   ;;  %v1635_v18 = vld [vmem:[%s2023_s1 + $0x20] sm:$0xff] (!%p138_p3)   ;;  %v1639_v22 = vld [vmem:[%s2023_s1 + $0x28] sm:$0xff] (!%p138_p3)  }
   0xd   : > { %1436 = vmatpush3.bf16.msra.mxu0 (!%p138_p3), %v1623_v6  ;;  %v1632_v15 = vld [vmem:[%s2023_s1 + $0x98] sm:$0xff] (!%p138_p3)   ;;  %v1636_v19 = vld [vmem:[%s2023_s1 + $0xa0] sm:$0xff] (!%p138_p3)   ;;  %v1640_v23 = vld [vmem:[%s2023_s1 + $0xa8] sm:$0xff] (!%p138_p3)  }
   0xe   : > { %1476 = vmatpush3.bf16.msra.mxu1 %v1624_v7  ;;  %1437 = vmatprep.subr.bf16.mxu0 %v1625_v8  ;;  %s2030_s21 = smov (!%p168_p4, %s1313_s21), 15  ;;  %v1641_v24 = vld [vmem:[%s2023_s1 + $0x70] sm:$0xff]   ;;  %v1645_v28 = vld [vmem:[%s2023_s1 + $0x78] sm:$0xff]   ;;  %v1649_v40 = vld [vmem:[%s2023_s1 + $0x140] sm:$0xff]  }
   0xf   : > { %1477 = vmatprep.subr.bf16.mxu1 %v1626_v9  ;;  %v1642_v25 = vld [vmem:[%s2023_s1 + $0xf0] sm:$0xff]   ;;  %s1424_s19 = sshll.u32 %s2030_s21, 5  ;;  %v1646_v29 = vld [vmem:[%s2023_s1 + $0xf8] sm:$0xff]   ;;  %v1650_v41 = vld [vmem:[%s2023_s1 + $0x1c0] sm:$0xff]  }
  0x10   : > { %v1643_v26 = vld [vmem:[%s2023_s1 + $0x30] sm:$0xff]   ;;  %s1837_s29 = scalar_lea.vmem %s2022_s0, %s1424_s19  ;;  %v1647_v30 = vld [vmem:[%s2023_s1 + $0x38] sm:$0xff]   ;;  %v1651_v42 = vld [vmem:[%s2023_s1 + $0x100] sm:$0xff]  }
  0x11   : > { %1438 = vmatpush3.bf16.msra.mxu0 %v1627_v10  ;;  %v1644_v27 = vld [vmem:[%s2023_s1 + $0xb0] sm:$0xff]   ;;  %v1648_v31 = vld [vmem:[%s2023_s1 + $0xb8] sm:$0xff]   ;;  %v188_v32 = vld [vmem:[%s1837_s29] sm:$0xff] }
  0x12   : > { %1478 = vmatpush3.bf16.msra.mxu1 %v1628_v11  ;;  %1439 = vmatprep.subr.bf16.mxu0 %v1629_v12  ;;  %v192_v33 = vld [vmem:[%s1837_s29 + $0x20] sm:$0xff]  ;;  %v189_v34 = vld [vmem:[%s1837_s29 + $0x8] sm:$0xff]  ;;  %v1657_v56 = vld [vmem:[%s2023_s1 + $0x150] sm:$0xff]  }
  0x13   : > { %1479 = vmatprep.subr.bf16.mxu1 %v1630_v13  ;;  %v1318_v35 = vcombine.low %v188_v32, %v192_v33  ;;  %v1319_v36 = vcombine.high %v188_v32, %v192_v33  ;;  %v193_v37 = vld [vmem:[%s1837_s29 + $0x28] sm:$0xff]  ;;  %v1652_v43 = vld [vmem:[%s2023_s1 + $0x180] sm:$0xff]   ;;  %v1658_v57 = vld [vmem:[%s2023_s1 + $0x1d0] sm:$0xff]  }
  0x14   : > { %v1320_v38 = vcombine.low %v189_v34, %v193_v37  ;;  %v1321_v39 = vcombine.high %v189_v34, %v193_v37  ;;  %v1653_v44 = vld [vmem:[%s2023_s1 + $0x148] sm:$0xff]   ;;  %v196_v48 = vld [vmem:[%s1837_s29 + $0x40] sm:$0xff]  ;;  %v1659_v58 = vld [vmem:[%s2023_s1 + $0x110] sm:$0xff]  }
  0x15   : > { %1440 = vmatpush3.bf16.msra.mxu0 %v1631_v14  ;;  %924 = vmatprep.mubr.bf16.mxu0 %v1319_v36  ;;  %v1654_v45 = vld [vmem:[%s2023_s1 + $0x1c8] sm:$0xff]   ;;  %v200_v49 = vld [vmem:[%s1837_s29 + $0x60] sm:$0xff]  ;;  %v1660_v59 = vld [vmem:[%s2023_s1 + $0x190] sm:$0xff]  }
  0x16   : > { %1480 = vmatpush3.bf16.msra.mxu1 %v1632_v15  ;;  %1441 = vmatprep.subr.bf16.mxu0 %v1633_v16  ;;  %v1655_v46 = vld [vmem:[%s2023_s1 + $0x108] sm:$0xff]   ;;  %v1327_v50 = vcombine.high %v196_v48, %v200_v49  ;;  %v1326_v53 = vcombine.low %v196_v48, %v200_v49  ;;  %v1661_v60 = vld [vmem:[%s2023_s1 + $0x158] sm:$0xff]   ;;  %v204_v0 = vld [vmem:[%s1837_s29 + $0x80] sm:$0xff] }
  0x17   : > { %1481 = vmatprep.subr.bf16.mxu1 %v1634_v17  ;;  %989 = vmatprep.mubr.bf16.mxu1 %v1321_v39  ;;  %v1656_v47 = vld [vmem:[%s2023_s1 + $0x188] sm:$0xff]   ;;  %v1662_v61 = vld [vmem:[%s2023_s1 + $0x1d8] sm:$0xff]   ;;  %v208_v1 = vld [vmem:[%s1837_s29 + $0xa0] sm:$0xff] }
  0x18   : > { %v197_v51 = vld [vmem:[%s1837_s29 + $0x48] sm:$0xff]  ;;  %v1663_v62 = vld [vmem:[%s2023_s1 + $0x118] sm:$0xff]   ;;  %v1335_v4 = vcombine.high %v204_v0, %v208_v1  ;;  %v1334_v6 = vcombine.low %v204_v0, %v208_v1  ;;  %v1665_v8 = vld [vmem:[%s2023_s1 + $0x160] sm:$0xff]  }
  0x19   : > { %1442 = vmatpush3.bf16.msra.mxu0 %v1635_v18  ;;  %v201_v52 = vld [vmem:[%s1837_s29 + $0x68] sm:$0xff]  ;;  %v1664_v63 = vld [vmem:[%s2023_s1 + $0x198] sm:$0xff]   ;;  %v1666_v9 = vld [vmem:[%s2023_s1 + $0x1e0] sm:$0xff]  }
  0x1a   : > { %1482 = vmatpush3.bf16.msra.mxu1 %v1636_v19  ;;  %1443 = vmatprep.subr.bf16.mxu0 %v1637_v20  ;;  %v1329_v54 = vcombine.high %v197_v51, %v201_v52  ;;  %v1328_v55 = vcombine.low %v197_v51, %v201_v52  ;;  %v205_v2 = vld [vmem:[%s1837_s29 + $0x88] sm:$0xff]  ;;  %v1667_v10 = vld [vmem:[%s2023_s1 + $0x120] sm:$0xff]   ;;  %v190_v32 = vld [vmem:[%s1837_s29 + $0x10] sm:$0xff] }
  0x1b   : > { %1483 = vmatprep.subr.bf16.mxu1 %v1638_v21  ;;  %v209_v3 = vld [vmem:[%s1837_s29 + $0xa8] sm:$0xff]  ;;  %v1668_v11 = vld [vmem:[%s2023_s1 + $0x1a0] sm:$0xff]   ;;  %v194_v33 = vld [vmem:[%s1837_s29 + $0x30] sm:$0xff] }
  0x1c   : > { %v1337_v5 = vcombine.high %v205_v2, %v209_v3  ;;  %v1336_v7 = vcombine.low %v205_v2, %v209_v3  ;;  %v1669_v12 = vld [vmem:[%s2023_s1 + $0x168] sm:$0xff]   ;;  %v212_v16 = vld [vmem:[%s1837_s29 + $0xc0] sm:$0xff]  ;;  %v1322_v34 = vcombine.low %v190_v32, %v194_v33  ;;  %v191_v36 = vld [vmem:[%s1837_s29 + $0x18] sm:$0xff] }
  0x1d   : > { %1444 = vmatpush3.bf16.msra.mxu0 %v1639_v22  ;;  %v1670_v13 = vld [vmem:[%s2023_s1 + $0x1e8] sm:$0xff]   ;;  %v216_v17 = vld [vmem:[%s1837_s29 + $0xe0] sm:$0xff]  ;;  %v195_v37 = vld [vmem:[%s1837_s29 + $0x38] sm:$0xff] }
  0x1e   : > { %1484 = vmatpush3.bf16.msra.mxu1 %v1640_v23  ;;  %1445 = vmatprep.subr.bf16.mxu0 %v1641_v24  ;;  %v1671_v14 = vld [vmem:[%s2023_s1 + $0x128] sm:$0xff]   ;;  %v1343_v19 = vcombine.high %v212_v16, %v216_v17  ;;  %v1342_v21 = vcombine.low %v212_v16, %v216_v17  ;;  %v1673_v24 = vld [vmem:[%s2023_s1 + $0x170] sm:$0xff]   ;;  %v1324_v39 = vcombine.low %v191_v36, %v195_v37  ;;  %v207_v48 = vld [vmem:[%s1837_s29 + $0x98] sm:$0xff] }
  0x1f   : > { %1485 = vmatprep.subr.bf16.mxu1 %v1642_v25  ;;  %v1672_v15 = vld [vmem:[%s2023_s1 + $0x1a8] sm:$0xff]   ;;  %v1674_v25 = vld [vmem:[%s2023_s1 + $0x1f0] sm:$0xff]   ;;  %v211_v49 = vld [vmem:[%s1837_s29 + $0xb8] sm:$0xff] }
  0x20   : > { %v213_v18 = vld [vmem:[%s1837_s29 + $0xc8] sm:$0xff] }
  0x21   : > { %1446 = vmatpush3.bf16.msra.mxu0 %v1643_v26  ;;  %v217_v20 = vld [vmem:[%s1837_s29 + $0xe8] sm:$0xff]  ;;  %v1675_v26 = vld [vmem:[%s2023_s1 + $0x130] sm:$0xff]  }
  0x22   : > { %1486 = vmatpush3.bf16.msra.mxu1 %v1644_v27  ;;  %1447 = vmatprep.subr.bf16.mxu0 %v1645_v28  ;;  %v1345_v22 = vcombine.high %v213_v18, %v217_v20  ;;  %v1344_v23 = vcombine.low %v213_v18, %v217_v20  ;;  %v1676_v27 = vld [vmem:[%s2023_s1 + $0x1b0] sm:$0xff]   ;;  %v1677_v28 = vld [vmem:[%s2023_s1 + $0x178] sm:$0xff]  }
  0x23   : > { %1487 = vmatprep.subr.bf16.mxu1 %v1646_v29  ;;  %v1678_v29 = vld [vmem:[%s2023_s1 + $0x1f8] sm:$0xff]  }
  0x25   : > { %1448 = vmatpush3.bf16.msra.mxu0 %v1647_v30  ;;  %v1679_v30 = vld [vmem:[%s2023_s1 + $0x138] sm:$0xff]  }
  0x26   : > { %1488 = vmatpush3.bf16.msra.mxu1 %v1648_v31  ;;  %1513 = vmatprep.subr.bf16.mxu0 %v1649_v40  ;;  %v1680_v31 = vld [vmem:[%s2023_s1 + $0x1b8] sm:$0xff]   ;;  %v1325_v40 = vcombine.high %v191_v36, %v195_v37 }
  0x27   : > { %1553 = vmatprep.subr.bf16.mxu1 %v1650_v41  ;;  %v202_v41 = vld [vmem:[%s1837_s29 + $0x70] sm:$0xff] }
  0x28   : > { %925 = vmatmul.mubr.bf16.vlgmr.msra.gmra.mrb[0].mxu0 %v1318_v35  ;;  %v1323_v35 = vcombine.high %v190_v32, %v194_v33 }
  0x29   : > { %990 = vmatmul.mubr.bf16.vlgmr.msra.gmra.mrb[0].mxu1 %v1320_v38  ;;  %1514 = vmatpush3.bf16.msra.mxu0 %v1651_v42  ;;  %v198_v38 = vld [vmem:[%s1837_s29 + $0x50] sm:$0xff]  ;;  %v199_v42 = vld [vmem:[%s1837_s29 + $0x58] sm:$0xff] }
  0x2a   : > { %1554 = vmatpush3.bf16.msra.mxu1 %v1652_v43  ;;  %1515 = vmatprep.subr.bf16.mxu0 %v1653_v44  ;;  %v203_v43 = vld [vmem:[%s1837_s29 + $0x78] sm:$0xff]  ;;  %v1331_v44 = vcombine.high %v198_v38, %v202_v41 }
  0x2b   : > { %1555 = vmatprep.subr.bf16.mxu1 %v1654_v45  ;;  %932 = vmatprep.mubr.bf16.mxu0 %v1327_v50  ;;  %v1333_v45 = vcombine.high %v199_v42, %v203_v43  ;;  %v1330_v50 = vcombine.low %v198_v38, %v202_v41  ;;  %v1332_v51 = vcombine.low %v199_v42, %v203_v43 }
  0x2c   : > { %997 = vmatprep.mubr.bf16.mxu1 %v1329_v54  ;;  %v214_v54 = vld [vmem:[%s1837_s29 + $0xd0] sm:$0xff] }
  0x2d   : > { %1516 = vmatpush3.bf16.msra.mxu0 %v1655_v46  ;;  %v206_v46 = vld [vmem:[%s1837_s29 + $0x90] sm:$0xff] }
  0x2e   : > { %1556 = vmatpush3.bf16.msra.mxu1 %v1656_v47  ;;  %1517 = vmatprep.subr.bf16.mxu0 %v1657_v56  ;;  %v210_v47 = vld [vmem:[%s1837_s29 + $0xb0] sm:$0xff]  ;;  %v215_v56 = vld [vmem:[%s1837_s29 + $0xd8] sm:$0xff] }
  0x2f   : > { %1557 = vmatprep.subr.bf16.mxu1 %v1658_v57  ;;  %v1339_v52 = vcombine.high %v206_v46, %v210_v47  ;;  %v219_v57 = vld [vmem:[%s1837_s29 + $0xf8] sm:$0xff] }
  0x30   : > { %933 = vmatmul.mubr.bf16.gmra.mrb[4].mxu0 %v1326_v53  ;;  %v1341_v53 = vcombine.high %v207_v48, %v211_v49 }
  0x31   : > { %998 = vmatmul.mubr.bf16.gmra.mrb[4].mxu1 %v1328_v55  ;;  %1518 = vmatpush3.bf16.msra.mxu0 %v1659_v58  ;;  %v218_v55 = vld [vmem:[%s1837_s29 + $0xf0] sm:$0xff]  ;;  %v1338_v58 = vcombine.low %v206_v46, %v210_v47  ;;  %s1317_s29 = sshll.u32 %s2030_s21, 2 }
  0x32   : > { %1558 = vmatpush3.bf16.msra.mxu1 %v1660_v59  ;;  %1519 = vmatprep.subr.bf16.mxu0 %v1661_v60  ;;  %v1340_v59 = vcombine.low %v207_v48, %v211_v49  ;;  %v1347_v60 = vcombine.high %v214_v54, %v218_v55  ;;  %s1989_s30 = scalar_lea.vmem %s2024_s2, %s1317_s29 }
  0x33   : > { %1559 = vmatprep.subr.bf16.mxu1 %v1662_v61  ;;  %940 = vmatprep.mubr.bf16.mxu0 %v1335_v4  ;;  %v1349_v61 = vcombine.high %v215_v56, %v219_v57 }
  0x34   : > { %1005 = vmatprep.mubr.bf16.mxu1 %v1337_v5 }
  0x35   : > { %1520 = vmatpush3.bf16.msra.mxu0 %v1663_v62  ;;  %v1346_v62 = vcombine.low %v214_v54, %v218_v55 }
  0x36   : > { %1560 = vmatpush3.bf16.msra.mxu1 %v1664_v63  ;;  %1521 = vmatprep.subr.bf16.mxu0 %v1665_v8  ;;  %v1348_v63 = vcombine.low %v215_v56, %v219_v57 }
  0x37   : > { %1561 = vmatprep.subr.bf16.mxu1 %v1666_v9 }
  0x38   : > { %941 = vmatmul.mubr.bf16.gmra.mrb[8].mxu0 %v1334_v6 }
  0x39   : > { %1006 = vmatmul.mubr.bf16.gmra.mrb[8].mxu1 %v1336_v7  ;;  %1522 = vmatpush3.bf16.msra.mxu0 %v1667_v10 }
  0x3a   : > { %1562 = vmatpush3.bf16.msra.mxu1 %v1668_v11  ;;  %1523 = vmatprep.subr.bf16.mxu0 %v1669_v12 }
  0x3b   : > { %1563 = vmatprep.subr.bf16.mxu1 %v1670_v13  ;;  %948 = vmatprep.mubr.bf16.mxu0 %v1343_v19 }
  0x3c   : > { %1013 = vmatprep.mubr.bf16.mxu1 %v1345_v22 }
  0x3d   : > { %1524 = vmatpush3.bf16.msra.mxu0 %v1671_v14 }
  0x3e   : > { %1564 = vmatpush3.bf16.msra.mxu1 %v1672_v15  ;;  %1525 = vmatprep.subr.bf16.mxu0 %v1673_v24 }
  0x3f   : > { %1565 = vmatprep.subr.bf16.mxu1 %v1674_v25 }
  0x40   : > { %949 = vmatmul.mubr.bf16.gmra.mrb[12].mxu0 %v1342_v21 }
  0x41   : > { %1014 = vmatmul.mubr.bf16.gmra.mrb[12].mxu1 %v1344_v23  ;;  %1526 = vmatpush3.bf16.msra.mxu0 %v1675_v26 }
  0x42   : > { %1566 = vmatpush3.bf16.msra.mxu1 %v1676_v27  ;;  %1527 = vmatprep.subr.bf16.mxu0 %v1677_v28 }
  0x43   : > { %1567 = vmatprep.subr.bf16.mxu1 %v1678_v29  ;;  %1054 = vmatprep.mubr.bf16.mxu0 %v1323_v35 }
  0x44   : > { %1119 = vmatprep.mubr.bf16.mxu1 %v1325_v40 }
  0x45   : > { %1528 = vmatpush3.bf16.msra.mxu0 %v1679_v30 }
  0x46   : > { %1568 = vmatpush3.bf16.msra.mxu1 %v1680_v31 }
  0x48   : > { %1055 = vmatmul.mubr.bf16.vlgmr.msra.gmra.mrb[16].mxu0 %v1322_v34 }
  0x49   : > { %1120 = vmatmul.mubr.bf16.vlgmr.msra.gmra.mrb[16].mxu1 %v1324_v39  ;;  %1062 = vmatprep.mubr.bf16.mxu0 %v1331_v44 }
  0x4a   : > { %1127 = vmatprep.mubr.bf16.mxu1 %v1333_v45 }
  0x50   : > { %1063 = vmatmul.mubr.bf16.gmra.mrb[20].mxu0 %v1330_v50 }
  0x51   : > { %1128 = vmatmul.mubr.bf16.gmra.mrb[20].mxu1 %v1332_v51  ;;  %1070 = vmatprep.mubr.bf16.mxu0 %v1339_v52 }
  0x52   : > { %1135 = vmatprep.mubr.bf16.mxu1 %v1341_v53 }
  0x58   : > { %1071 = vmatmul.mubr.bf16.gmra.mrb[24].mxu0 %v1338_v58 }
  0x59   : > { %1136 = vmatmul.mubr.bf16.gmra.mrb[24].mxu1 %v1340_v59  ;;  %1078 = vmatprep.mubr.bf16.mxu0 %v1347_v60 }
  0x5a   : > { %1143 = vmatprep.mubr.bf16.mxu1 %v1349_v61 }
  0x60   : > { %1079 = vmatmul.mubr.bf16.gmra.mrb[28].mxu0 %v1346_v62 }
  0x61   : > { %1144 = vmatmul.mubr.bf16.gmra.mrb[28].mxu1 %v1348_v63 }
  0xfb   : > { %v1449_v0 = vpop.f32.mrb[0].mxu0 }
  0xfc   : > { %v1489_v1 = vpop.f32.mrb[0].mxu1  ;;  %v1450_v2 = vpop.f32.mrb[1].mxu0 }
  0xfd   : > { %v1451_v3 = vadd.f32 %v1450_v2, %v1449_v0  ;;  %v1490_v4 = vpop.f32.mrb[1].mxu1  ;;  %v1452_v5 = vpop.f32.mrb[2].mxu0 }
  0xfe   : > { %v1491_v6 = vadd.f32 %v1490_v4, %v1489_v1  ;;  %v1492_v7 = vpop.f32.mrb[2].mxu1  ;;  %v1453_v8 = vpop.f32.mrb[3].mxu0 }
  0xff   : > { %v1454_v9 = vadd.f32 %v1453_v8, %v1452_v5  ;;  %v1493_v10 = vpop.f32.mrb[3].mxu1 }
 0x100   : > { %v992_v11 = vadd.f32 %v1491_v6, %v1451_v3  ;;  %v1494_v12 = vadd.f32 %v1493_v10, %v1492_v7 }
 0x102   : > { %v995_v13 = vadd.f32 %v1494_v12, %v1454_v9 }
 0x103   : > { %v1455_v14 = vpop.f32.mrb[4].mxu0 }
 0x104   : > { %v1495_v15 = vpop.f32.mrb[4].mxu1  ;;  %v1456_v16 = vpop.f32.mrb[5].mxu0 }
 0x105   : > { %v1457_v17 = vadd.f32 %v1456_v16, %v1455_v14  ;;  %v1496_v18 = vpop.f32.mrb[5].mxu1  ;;  %v1458_v19 = vpop.f32.mrb[6].mxu0 }
 0x106   : > { %v1497_v20 = vadd.f32 %v1496_v18, %v1495_v15  ;;  %v1498_v21 = vpop.f32.mrb[6].mxu1  ;;  %v1459_v22 = vpop.f32.mrb[7].mxu0 }
 0x107   : > { %v1460_v23 = vadd.f32 %v1459_v22, %v1458_v19  ;;  %v1499_v24 = vpop.f32.mrb[7].mxu1 }
 0x108   : > { %v1973_v25 = vadd.f32 %v1497_v20, %v1457_v17  ;;  %v1500_v26 = vadd.f32 %v1499_v24, %v1498_v21 }
 0x10a   : > { %v1975_v27 = vadd.f32 %v1500_v26, %v1460_v23 }
 0x10b   : > { %v1461_v28 = vpop.f32.mrb[8].mxu0 }
 0x10c   : > { %v1501_v29 = vpop.f32.mrb[8].mxu1  ;;  %v1462_v30 = vpop.f32.mrb[9].mxu0 }
 0x10d   : > { %v1502_v31 = vpop.f32.mrb[9].mxu1  ;;  %v1463_v32 = vadd.f32 %v1462_v30, %v1461_v28  ;;  %v1464_v34 = vpop.f32.mrb[10].mxu0 }
 0x10e   : > { %v1503_v33 = vadd.f32 %v1502_v31, %v1501_v29  ;;  %v1504_v35 = vpop.f32.mrb[10].mxu1  ;;  %v1465_v36 = vpop.f32.mrb[11].mxu0 }
 0x10f   : > { %v1505_v37 = vpop.f32.mrb[11].mxu1  ;;  %v1466_v39 = vadd.f32 %v1465_v36, %v1464_v34 }
 0x110   : > { %v1977_v38 = vadd.f32 %v1503_v33, %v1463_v32  ;;  %v1506_v40 = vadd.f32 %v1505_v37, %v1504_v35 }
 0x112   : > { %v1979_v41 = vadd.f32 %v1506_v40, %v1466_v39 }
 0x113   : > { %v1467_v42 = vpop.f32.mrb[12].mxu0 }
 0x114   : > { %v1507_v43 = vpop.f32.mrb[12].mxu1  ;;  %v1468_v44 = vpop.f32.mrb[13].mxu0 }
 0x115   : > { %v1469_v45 = vadd.f32 %v1468_v44, %v1467_v42  ;;  %v1508_v46 = vpop.f32.mrb[13].mxu1  ;;  %v1470_v47 = vpop.f32.mrb[14].mxu0 }
 0x116   : > { %v1509_v48 = vadd.f32 %v1508_v46, %v1507_v43  ;;  %v1510_v49 = vpop.f32.mrb[14].mxu1  ;;  %v1471_v50 = vpop.f32.mrb[15].mxu0 }
 0x117   : > { %v1472_v51 = vadd.f32 %v1471_v50, %v1470_v47  ;;  %v1511_v52 = vpop.f32.mrb[15].mxu1 }
 0x118   : > { %v1981_v53 = vadd.f32 %v1509_v48, %v1469_v45  ;;  %v1512_v54 = vadd.f32 %v1511_v52, %v1510_v49 }
 0x11a   : > { %v1983_v55 = vadd.f32 %v1512_v54, %v1472_v51 }
 0x11b   : > { %v1529_v56 = vpop.f32.mrb[16].mxu0 }
 0x11c   : > { %v1569_v57 = vpop.f32.mrb[16].mxu1  ;;  %v1530_v58 = vpop.f32.mrb[17].mxu0 }
 0x11d   : > { %v1531_v59 = vadd.f32 %v1530_v58, %v1529_v56  ;;  %v1570_v60 = vpop.f32.mrb[17].mxu1  ;;  %v1532_v61 = vpop.f32.mrb[18].mxu0 }
 0x11e   : > { %v1571_v62 = vadd.f32 %v1570_v60, %v1569_v57  ;;  %v1572_v63 = vpop.f32.mrb[18].mxu1  ;;  %v1533_v0 = vpop.f32.mrb[19].mxu0 }
 0x11f   : > { %v1057_v1 = vadd.f32 %v1531_v59, %v992_v11  ;;  %v1534_v2 = vadd.f32 %v1533_v0, %v1532_v61  ;;  %v1573_v3 = vpop.f32.mrb[19].mxu1 }
 0x120   : > { %v1574_v4 = vadd.f32 %v1573_v3, %v1572_v63 }
 0x121   : > { %v1122_v5 = vadd.f32 %v1571_v62, %v1057_v1  ;;  %v1060_v6 = vadd.f32 %v1534_v2, %v995_v13 }
 0x123   : > { %vm1152_vm0 = vcmp.ge.f32.partialorder %v1122_v5, 0.0  ;;  %v1160_v7 = vmul.f32 0.2, %v1122_v5  ;;  %v1125_v8 = vadd.f32 %v1574_v4, %v1060_v6  ;;  %v1535_v9 = vpop.f32.mrb[20].mxu0 }
 0x124   : > { %v1575_v10 = vpop.f32.mrb[20].mxu1  ;;  %v1536_v12 = vpop.f32.mrb[21].mxu0 }
 0x125   : > { %v1168_v11 = vsel %vm1152_vm0, %v1122_v5, %v1160_v7  ;;  %vm1153_vm2 = vcmp.ge.f32.partialorder %v1125_v8, 0.0  ;;  %v1161_v14 = vmul.f32 0.2, %v1125_v8  ;;  %v1537_v15 = vadd.f32 %v1536_v12, %v1535_v9  ;;  %v1576_v13 = vpop.f32.mrb[21].mxu1  ;;  %v1538_v16 = vpop.f32.mrb[22].mxu0 }
 0x126   : > { %v1425_v17 = vpack.c.bf16 %v1168_v11, %v1168_v11  ;;  %v1577_v18 = vadd.f32 %v1576_v13, %v1575_v10  ;;  %v1578_v19 = vpop.f32.mrb[22].mxu1  ;;  %v1539_v20 = vpop.f32.mrb[23].mxu0 }
 0x127   : > { %v1169_v21 = vsel %vm1153_vm2, %v1125_v8, %v1161_v14  ;;  %v1065_v22 = vadd.f32 %v1537_v15, %v1973_v25  ;;  %v1540_v23 = vadd.f32 %v1539_v20, %v1538_v16  ;;  %v1579_v24 = vpop.f32.mrb[23].mxu1 }
 0x128   : > { %1209 = vst.msk [vmem:[%s1989_s30] sm:$0xf] %vm1208_vm1, %v1425_v17  ;;  %v1426_v26 = vpack.c.bf16 %v1169_v21, %v1169_v21  ;;  %v1580_v28 = vadd.f32 %v1579_v24, %v1578_v19 }
 0x129   : > { %v1130_v29 = vadd.f32 %v1577_v18, %v1065_v22  ;;  %v1068_v30 = vadd.f32 %v1540_v23, %v1975_v27 }
 0x12a   : > { %1210 = vst.msk [vmem:[%s1989_s30 + $0x4] sm:$0xf] %vm1208_vm1, %v1426_v26 }
 0x12b   : > { %vm1154_vm3 = vcmp.ge.f32.partialorder %v1130_v29, 0.0  ;;  %v1162_v31 = vmul.f32 0.2, %v1130_v29  ;;  %v1133_v32 = vadd.f32 %v1580_v28, %v1068_v30  ;;  %v1541_v33 = vpop.f32.mrb[24].mxu0 }
 0x12c   : > { %v1581_v34 = vpop.f32.mrb[24].mxu1  ;;  %v1542_v35 = vpop.f32.mrb[25].mxu0 }
 0x12d   : > { %v1170_v36 = vsel %vm1154_vm3, %v1130_v29, %v1162_v31  ;;  %vm1155_vm4 = vcmp.ge.f32.partialorder %v1133_v32, 0.0  ;;  %v1163_v25 = vmul.f32 0.2, %v1133_v32  ;;  %v1543_v37 = vadd.f32 %v1542_v35, %v1541_v33  ;;  %v1582_v39 = vpop.f32.mrb[25].mxu1  ;;  %v1544_v40 = vpop.f32.mrb[26].mxu0 }
 0x12e   : > { %v1427_v42 = vpack.c.bf16 %v1170_v36, %v1170_v36  ;;  %v1583_v43 = vadd.f32 %v1582_v39, %v1581_v34  ;;  %v1584_v44 = vpop.f32.mrb[26].mxu1  ;;  %v1545_v27 = vpop.f32.mrb[27].mxu0 }
 0x12f   : > { %v1171_v45 = vsel %vm1155_vm4, %v1133_v32, %v1163_v25  ;;  %v1073_v46 = vadd.f32 %v1543_v37, %v1977_v38  ;;  %v1546_v47 = vadd.f32 %v1545_v27, %v1544_v40  ;;  %v1585_v48 = vpop.f32.mrb[27].mxu1 }
 0x130   : > { %1211 = vst.msk [vmem:[%s1989_s30 + $0x8] sm:$0xf] %vm1208_vm1, %v1427_v42  ;;  %v1428_v49 = vpack.c.bf16 %v1171_v45, %v1171_v45  ;;  %v1586_v50 = vadd.f32 %v1585_v48, %v1584_v44 }
 0x131   : > { %v1138_v51 = vadd.f32 %v1583_v43, %v1073_v46  ;;  %v1076_v52 = vadd.f32 %v1546_v47, %v1979_v41 }
 0x132   : > { %1212 = vst.msk [vmem:[%s1989_s30 + $0xc] sm:$0xf] %vm1208_vm1, %v1428_v49 }
 0x133   : > { %vm1156_vm5 = vcmp.ge.f32.partialorder %v1138_v51, 0.0  ;;  %v1164_v54 = vmul.f32 0.2, %v1138_v51  ;;  %v1141_v56 = vadd.f32 %v1586_v50, %v1076_v52  ;;  %v1547_v57 = vpop.f32.mrb[28].mxu0 }
 0x134   : > { %v1587_v58 = vpop.f32.mrb[28].mxu1  ;;  %v1548_v59 = vpop.f32.mrb[29].mxu0 }
 0x135   : > { %v1172_v60 = vsel %vm1156_vm5, %v1138_v51, %v1164_v54  ;;  %vm1157_vm6 = vcmp.ge.f32.partialorder %v1141_v56, 0.0  ;;  %v1165_v38 = vmul.f32 0.2, %v1141_v56  ;;  %v1549_v61 = vadd.f32 %v1548_v59, %v1547_v57  ;;  %v1588_v62 = vpop.f32.mrb[29].mxu1  ;;  %v1550_v63 = vpop.f32.mrb[30].mxu0 }
 0x136   : > { %v1429_v0 = vpack.c.bf16 %v1172_v60, %v1172_v60  ;;  %v1589_v1 = vadd.f32 %v1588_v62, %v1587_v58  ;;  %v1590_v2 = vpop.f32.mrb[30].mxu1  ;;  %v1551_v41 = vpop.f32.mrb[31].mxu0 }
 0x137   : > { %v1173_v3 = vsel %vm1157_vm6, %v1141_v56, %v1165_v38  ;;  %v1081_v4 = vadd.f32 %v1549_v61, %v1981_v53  ;;  %v1552_v5 = vadd.f32 %v1551_v41, %v1550_v63  ;;  %v1591_v6 = vpop.f32.mrb[31].mxu1 }
 0x138   : > { %1213 = vst.msk [vmem:[%s1989_s30 + $0x10] sm:$0xf] %vm1208_vm1, %v1429_v0  ;;  %v1430_v7 = vpack.c.bf16 %v1173_v3, %v1173_v3  ;;  %v1592_v8 = vadd.f32 %v1591_v6, %v1590_v2 }
 0x139   : > { %v1146_v9 = vadd.f32 %v1589_v1, %v1081_v4  ;;  %v1084_v10 = vadd.f32 %v1552_v5, %v1983_v55 }
 0x13a   : > { %1214 = vst.msk [vmem:[%s1989_s30 + $0x14] sm:$0xf] %vm1208_vm1, %v1430_v7 }
 0x13b   : > { %vm1158_vm7 = vcmp.ge.f32.partialorder %v1146_v9, 0.0  ;;  %v1166_v12 = vmul.f32 0.2, %v1146_v9  ;;  %v1149_v11 = vadd.f32 %v1592_v8, %v1084_v10 }
 0x13d   : > { %v1174_v14 = vsel %vm1158_vm7, %v1146_v9, %v1166_v12  ;;  %vm1159_vm8 = vcmp.ge.f32.partialorder %v1149_v11, 0.0  ;;  %v1167_v15 = vmul.f32 0.2, %v1149_v11 }
 0x13e   : > { %v1431_v53 = vpack.c.bf16 %v1174_v14, %v1174_v14 }
 0x13f   : > { %v1175_v13 = vsel %vm1159_vm8, %v1149_v11, %v1167_v15 }
 0x140   : > { %1215 = vst.msk [vmem:[%s1989_s30 + $0x18] sm:$0xf] %vm1208_vm1, %v1431_v53  ;;  %v1432_v16 = vpack.c.bf16 %v1175_v13, %v1175_v13 }
 0x142   : > { %1216 = vst.msk [vmem:[%s1989_s30 + $0x1c] sm:$0xf] %vm1208_vm1, %v1432_v16 }
 0x143 PF: > { %s12_s11 = sadd.s32 1, %s1703_s11   ;;  %s2025_s9 = smov %s1699_s10 }
 0x144   : > { %p9_p5 = scmp.ge.s32.totalorder %s12_s11, 4   ;;  %s2026_s10 = smov %s2028_s12 }
 0x146   :  { %11 = sbr.rel (!%p9_p5) target bundleno = 2 (0x2), region = 61 }

</bundles_post_ra>
